<compile_context>
chip_gen: v6e
topology: v6e:2x2x1
jax: 0.10.0
libtpu: 0.0.40
codegen_flags: <defaults>
</compile_context>

<pallas_src>
import functools

import jax
import jax.numpy as jnp
from jax import lax
from jax.experimental import pallas as pl
from jax.experimental.pallas import tpu as pltpu


# ---------------------------------------------------------------------------
# Kernel 1: axial channel attention, one whole batch (all S slices) per step.
# ---------------------------------------------------------------------------
def _axial_attn_kernel(feat_ref, enc_ref, out_ref):
    feat = feat_ref[0]                                    # (S, C, L) f32
    enc_t = enc_ref[0]                                    # (S, C, L) f32 (encode^T per slice)
    feat_b = feat.astype(jnp.bfloat16)
    enc_b = enc_t.astype(jnp.bfloat16)
    # energy[s, c, k] = sum_l feat[s, c, l] * enc_s[l, k]
    energy = jnp.einsum("scl,skl->sck", feat_b, enc_b,
                        preferred_element_type=jnp.float32)       # (S, C, C)
    m = jnp.max(energy, axis=-1, keepdims=True)
    p = jnp.exp(energy - m)
    rel = p / jnp.sum(p, axis=-1, keepdims=True)                  # softmax(dim=-1), f32
    aug = jnp.einsum("sck,skl->scl", rel.astype(jnp.bfloat16), feat_b,
                     preferred_element_type=jnp.float32)          # (S, C, L)
    out_ref[0] = aug


def axial_attention(feat, enc_rep_t):
    # feat:      (B, S, C, L) -- S slices per batch, each (C, L)
    # enc_rep_t: (B, S, C, L) -- per-slice encode^T, expanded with the torch `repeat` quirk
    B, S, C, L = feat.shape
    blk = pl.BlockSpec((1, S, C, L), lambda b: (b, 0, 0, 0))
    return pl.pallas_call(
        _axial_attn_kernel,
        out_shape=jax.ShapeDtypeStruct((B, S, C, L), jnp.float32),
        grid=(B,),
        in_specs=[blk, blk],
        out_specs=blk,
        compiler_params=pltpu.CompilerParams(dimension_semantics=("parallel",)),
    )(feat, enc_rep_t)


# ---------------------------------------------------------------------------
# Kernel 2: fused [gamma*(aug_h+aug_w)+body] + 3x3 conv (9 shifted matmuls)
#           + folded BatchNorm(eval) + ReLU.  One batch image per grid step.
# ---------------------------------------------------------------------------
def _conv_bn_relu_kernel(gamma_ref, body_ref, ah_ref, aw_ref, w_ref, b_ref,
                         out_ref, prep_ref, *, width):
    C, HW = body_ref.shape[1], body_ref.shape[2]
    K = width + 1                                         # halo in the flattened spatial axis

    g = gamma_ref[0]
    pre = g * (ah_ref[0] + aw_ref[0]) + body_ref[0]       # (C, HW) f32, fused combine

    # Zero-padded flat slab in VMEM: prep[:, K:K+HW] = pre, zeros on both sides.
    prep_ref[:, 0:K] = jnp.zeros((C, K), jnp.float32)
    prep_ref[:, K + HW:K + HW + K] = jnp.zeros((C, K), jnp.float32)
    prep_ref[:, K:K + HW] = pre

    col = lax.broadcasted_iota(jnp.int32, (1, HW), 1) % width
    first_col = col == 0
    last_col = col == width - 1

    acc = jnp.zeros((C, HW), jnp.float32)
    for ky in range(3):                                   # static, unrolled 9-tap loop
        for kx in range(3):
            off = (ky - 1) * width + (kx - 1)
            sl = prep_ref[:, K + off:K + off + HW]        # (C, HW): pre shifted by `off`
            if kx == 0:                                   # mask columns that wrapped a row
                sl = jnp.where(first_col, 0.0, sl)
            elif kx == 2:
                sl = jnp.where(last_col, 0.0, sl)
            acc = acc + jnp.dot(w_ref[ky * 3 + kx], sl.astype(jnp.bfloat16),
                                preferred_element_type=jnp.float32)
    out_ref[0] = jnp.maximum(acc + b_ref[...], 0.0)


def conv_bn_relu_fused(gamma, body_f, aug_h_f, aug_w_f, w_taps, bias, *, width):
    B, C, HW = body_f.shape
    blk = pl.BlockSpec((1, C, HW), lambda b: (b, 0, 0))
    kernel = functools.partial(_conv_bn_relu_kernel, width=width)
    return pl.pallas_call(
        kernel,
        out_shape=jax.ShapeDtypeStruct((B, C, HW), jnp.float32),
        grid=(B,),
        in_specs=[
            pl.BlockSpec(memory_space=pltpu.MemorySpace.SMEM),    # gamma (1,)
            blk, blk, blk,                                        # body, aug_h, aug_w (NCHW-flat)
            pl.BlockSpec((9, C, C), lambda b: (0, 0, 0)),         # conv weights, BN-scale folded
            pl.BlockSpec((C, 1), lambda b: (0, 0)),               # folded BN bias
        ],
        out_specs=blk,
        scratch_shapes=[pltpu.VMEM((C, HW + 2 * (width + 1)), jnp.float32)],
        compiler_params=pltpu.CompilerParams(dimension_semantics=("parallel",)),
    )(gamma, body_f, aug_h_f, aug_w_f, w_taps, bias)


# ---------------------------------------------------------------------------
# Full forward (glue reshapes / tiny Linear in XLA, hot paths in Pallas)
# ---------------------------------------------------------------------------
def body_han1_forward(body, ex_layer, params):
    B, C, H, W = body.shape
    HW = H * W

    # Slice-major views of body (inherent layout changes, done once in XLA).
    feat_h = jnp.transpose(body, (0, 3, 1, 2))            # (B, W, C, H)
    feat_w = jnp.transpose(body, (0, 2, 1, 3))            # (B, H, C, W)

    # Pooled excitation + Linear, hoisted out of the attention kernel (runs once).
    pooled_h = jnp.transpose(jnp.mean(ex_layer, axis=3), (0, 2, 1))   # (B, H, C)
    pooled_w = jnp.transpose(jnp.mean(ex_layer, axis=2), (0, 2, 1))   # (B, W, C)
    enc_h_t = jnp.transpose(pooled_h @ params["w1"].T + params["b1"], (0, 2, 1))  # (B, C, H)
    enc_w_t = jnp.transpose(pooled_w @ params["w2"].T + params["b2"], (0, 2, 1))  # (B, C, W)

    # torch `encode.repeat(S, 1, 1)` quirk: slice j = b*S + s uses encode[(b*S + s) % B].
    enc_rep_h = jnp.tile(enc_h_t, (W, 1, 1)).reshape(B, W, C, H)
    enc_rep_w = jnp.tile(enc_w_t, (H, 1, 1)).reshape(B, H, C, W)

    aug_h = axial_attention(feat_h, enc_rep_h)            # (B, W, C, H)
    aug_w = axial_attention(feat_w, enc_rep_w)            # (B, H, C, W)

    aug_h_f = jnp.transpose(aug_h, (0, 2, 3, 1)).reshape(B, C, HW)    # -> NCHW-flat
    aug_w_f = jnp.transpose(aug_w, (0, 2, 1, 3)).reshape(B, C, HW)
    body_f = body.reshape(B, C, HW)

    # Fold BatchNorm (eval) into conv weights / bias; weights pre-cast to bf16 for the MXU.
    scale = params["bn_w"] / jnp.sqrt(params["bn_var"] + 1e-5)
    bias = (params["bn_b"] - params["bn_mean"] * scale)[:, None]                  # (C, 1)
    w_taps = jnp.transpose(params["conv_w"], (2, 3, 0, 1)) * scale[None, None, :, None]
    w_taps = w_taps.reshape(9, C, C).astype(jnp.bfloat16)                         # (tap, Cout, Cin)

    out = conv_bn_relu_fused(params["gamma"], body_f, aug_h_f, aug_w_f,
                             w_taps, bias, width=W)
    return out.reshape(B, C, H, W)


# ---------------------------------------------------------------------------
# Pure-JAX reference (f32, highest precision) for validation
# ---------------------------------------------------------------------------
def reference_forward(body, ex, params):
    B, C, H, W = body.shape
    hi = lax.Precision.HIGHEST
    feat_h = jnp.transpose(body, (0, 3, 1, 2)).reshape(B * W, C, H)
    feat_w = jnp.transpose(body, (0, 2, 1, 3)).reshape(B * H, C, W)
    enc_h = jnp.transpose(ex.mean(axis=3), (0, 2, 1)) @ params["w1"].T + params["b1"]
    enc_w = jnp.transpose(ex.mean(axis=2), (0, 2, 1)) @ params["w2"].T + params["b2"]
    e_h = jnp.einsum("nch,nhk->nck", feat_h, jnp.tile(enc_h, (W, 1, 1)), precision=hi)
    e_w = jnp.einsum("ncw,nwk->nck", feat_w, jnp.tile(enc_w, (H, 1, 1)), precision=hi)
    r_h = jax.nn.softmax(e_h, axis=-1)
    r_w = jax.nn.softmax(e_w, axis=-1)
    aug_h = jnp.einsum("nck,nkh->nch", r_h, feat_h, precision=hi)
    aug_w = jnp.einsum("nck,nkw->ncw", r_w, feat_w, precision=hi)
    aug_h = aug_h.reshape(B, W, C, H).transpose(0, 2, 3, 1)
    aug_w = aug_w.reshape(B, H, C, W).transpose(0, 2, 1, 3)
    pre = params["gamma"] * (aug_h + aug_w) + body
    y = lax.conv_general_dilated(pre, params["conv_w"], (1, 1), "SAME",
                                 dimension_numbers=("NCHW", "OIHW", "NCHW"), precision=hi)
    scale = params["bn_w"] / jnp.sqrt(params["bn_var"] + 1e-5)
    y = y * scale[None, :, None, None] + \
        (params["bn_b"] - params["bn_mean"] * scale)[None, :, None, None]
    return jnp.maximum(y, 0.0)


if __name__ == "__main__":
    # plane = 256 in the real module; scaled down for a small synthetic test.
    B, C, H, W = 2, 32, 16, 16
    key = jax.random.PRNGKey(0)
    ks = jax.random.split(key, 8)
    params = {
        "w1": jax.random.normal(ks[0], (C, C), jnp.float32) * 0.1,    # conv1: Linear(plane, plane)
        "b1": jax.random.normal(ks[1], (C,), jnp.float32) * 0.1,
        "w2": jax.random.normal(ks[2], (C, C), jnp.float32) * 0.1,    # conv2: Linear(plane, plane)
        "b2": jax.random.normal(ks[3], (C,), jnp.float32) * 0.1,
        "conv_w": jax.random.normal(ks[4], (C, C, 3, 3), jnp.float32) * 0.05,  # Conv2d(plane, plane, 3)
        # nn.Parameter(torch.zeros(1)) in __init__; nonzero so the attention branch contributes.
        "gamma": jnp.array([0.5], jnp.float32),
        "bn_w": jnp.ones((C,), jnp.float32),       # norm_layer(plane) default init, eval mode
        "bn_b": jnp.zeros((C,), jnp.float32),
        "bn_mean": jnp.zeros((C,), jnp.float32),
        "bn_var": jnp.ones((C,), jnp.float32),
    }
    body = jax.random.normal(ks[5], (B, C, H, W), jnp.float32)
    ex_layer = jax.random.normal(ks[6], (B, C, H, W), jnp.float32)

    fwd = jax.jit(body_han1_forward)
    out = jax.block_until_ready(fwd(body, ex_layer, params))
    ref = jax.block_until_ready(reference_forward(body, ex_layer, params))

    assert out.shape == (B, C, H, W) and out.dtype == jnp.float32
    # Tolerance reflects bf16 MXU operands (f32 accumulation) vs. the f32/HIGHEST reference.
    if not bool(jnp.allclose(out, ref, atol=2e-2, rtol=2e-2)):
        max_err = float(jnp.max(jnp.abs(out - ref)))
        raise AssertionError(f"Pallas output does not match JAX reference (max abs err {max_err:.4e})")
    print("KERNEL_OK")
</pallas_src>

<mosaic_0001>
module attributes {stable_mosaic.version = 11 : i64} {
  func.func @_axial_attn_kernel(%arg0: i32, %arg1: memref<1x16x32x16xf32, #tpu.memory_space<vmem>>, %arg2: memref<1x16x32x16xf32, #tpu.memory_space<vmem>>, %arg3: memref<1x16x32x16xf32, #tpu.memory_space<vmem>>) attributes {dimension_semantics = [#tpu.dimension_semantics<parallel>], iteration_bounds = array<i64: 2>, scalar_prefetch = 0 : i64, scratch_operands = 0 : i64, tpu.core_type = #tpu.core_type<tc>, window_params = [{transform_indices = @transform_0, window_bounds = array<i64: 1, 16, 32, 16>}, {transform_indices = @transform_1, window_bounds = array<i64: 1, 16, 32, 16>}, {transform_indices = @transform_2, window_bounds = array<i64: 1, 16, 32, 16>}]} {
    %c0 = arith.constant 0 : index
    %c0_0 = arith.constant 0 : index
    %c0_1 = arith.constant 0 : index
    %c0_2 = arith.constant 0 : index
    %0 = vector.load %arg1[%c0, %c0_0, %c0_1, %c0_2] : memref<1x16x32x16xf32, #tpu.memory_space<vmem>>, vector<1x16x32x16xf32>
    %1 = vector.shape_cast %0 : vector<1x16x32x16xf32> to vector<16x32x16xf32>
    %c0_3 = arith.constant 0 : index
    %c0_4 = arith.constant 0 : index
    %c0_5 = arith.constant 0 : index
    %c0_6 = arith.constant 0 : index
    %2 = vector.load %arg2[%c0_3, %c0_4, %c0_5, %c0_6] : memref<1x16x32x16xf32, #tpu.memory_space<vmem>>, vector<1x16x32x16xf32>
    %3 = vector.shape_cast %2 : vector<1x16x32x16xf32> to vector<16x32x16xf32>
    %4 = arith.truncf %1 : vector<16x32x16xf32> to vector<16x32x16xbf16>
    %5 = arith.truncf %3 : vector<16x32x16xf32> to vector<16x32x16xbf16>
    "tpu.trace_start"() <{level = 10 : i32, message = "scl,skl->sck"}> : () -> ()
    %cst = arith.constant dense<0.000000e+00> : vector<16x32x32xf32>
    %6 = tpu.matmul %4, %5, %cst {dimension_numbers = #tpu.dot_dimension_numbers<[2], [2], [1], [1], [0, 0, 0, 1, 1, 1], [0], [0]>} : vector<16x32x16xbf16>, vector<16x32x16xbf16>, vector<16x32x32xf32> -> vector<16x32x32xf32>
    "tpu.trace_stop"() : () -> ()
    %cst_7 = arith.constant dense<0xFF800000> : vector<16x32xf32>
    %7 = vector.multi_reduction <maximumf>, %6, %cst_7 [2] : vector<16x32x32xf32> to vector<16x32xf32>
    %8 = vector.shape_cast %7 : vector<16x32xf32> to vector<16x32x1xf32>
    %9 = vector.broadcast %8 : vector<16x32x1xf32> to vector<16x32x32xf32>
    %10 = arith.subf %6, %9 : vector<16x32x32xf32>
    %11 = math.exp %10 : vector<16x32x32xf32>
    %cst_8 = arith.constant dense<0.000000e+00> : vector<16x32xf32>
    %12 = vector.multi_reduction <add>, %11, %cst_8 [2] : vector<16x32x32xf32> to vector<16x32xf32>
    %13 = vector.shape_cast %12 : vector<16x32xf32> to vector<16x32x1xf32>
    %14 = vector.broadcast %13 : vector<16x32x1xf32> to vector<16x32x32xf32>
    %15 = arith.divf %11, %14 : vector<16x32x32xf32>
    %16 = arith.truncf %15 : vector<16x32x32xf32> to vector<16x32x32xbf16>
    "tpu.trace_start"() <{level = 10 : i32, message = "sck,skl->scl"}> : () -> ()
    %cst_9 = arith.constant dense<0.000000e+00> : vector<16x32x16xf32>
    %17 = tpu.matmul %16, %4, %cst_9 {dimension_numbers = #tpu.dot_dimension_numbers<[2], [1], [1], [2], [0, 0, 0, 1, 1, 2], [0], [0]>} : vector<16x32x32xbf16>, vector<16x32x16xbf16>, vector<16x32x16xf32> -> vector<16x32x16xf32>
    "tpu.trace_stop"() : () -> ()
    %c0_10 = arith.constant 0 : index
    %c0_11 = arith.constant 0 : index
    %c0_12 = arith.constant 0 : index
    %c0_13 = arith.constant 0 : index
    %18 = vector.load %arg3[%c0_10, %c0_11, %c0_12, %c0_13] : memref<1x16x32x16xf32, #tpu.memory_space<vmem>>, vector<1x16x32x16xf32>
    %19 = vector.shape_cast %18 : vector<1x16x32x16xf32> to vector<16x32x16xf32>
    %20 = vector.shape_cast %17 : vector<16x32x16xf32> to vector<1x16x32x16xf32>
    tpu.vector_store %arg3[%c0_10, %c0_11, %c0_12, %c0_13], %20 {strides = array<i32>} : memref<1x16x32x16xf32, #tpu.memory_space<vmem>>, vector<1x16x32x16xf32>,
    return
  }
  func.func @transform_0(%arg0: i32) -> (i32, i32, i32, i32) {
    %c0_i32 = arith.constant 0 : i32
    %c0_i32_0 = arith.constant 0 : i32
    %c0_i32_1 = arith.constant 0 : i32
    %c0_i32_2 = arith.constant 0 : i32
    return %arg0, %c0_i32, %c0_i32_0, %c0_i32_1 : i32, i32, i32, i32
  }
  func.func @transform_1(%arg0: i32) -> (i32, i32, i32, i32) {
    %c0_i32 = arith.constant 0 : i32
    %c0_i32_0 = arith.constant 0 : i32
    %c0_i32_1 = arith.constant 0 : i32
    %c0_i32_2 = arith.constant 0 : i32
    return %arg0, %c0_i32, %c0_i32_0, %c0_i32_1 : i32, i32, i32, i32
  }
  func.func @transform_2(%arg0: i32) -> (i32, i32, i32, i32) {
    %c0_i32 = arith.constant 0 : i32
    %c0_i32_0 = arith.constant 0 : i32
    %c0_i32_1 = arith.constant 0 : i32
    %c0_i32_2 = arith.constant 0 : i32
    return %arg0, %c0_i32, %c0_i32_0, %c0_i32_1 : i32, i32, i32, i32
  }
}

module attributes {stable_mosaic.version = 11 : i64} {
  func.func @_conv_bn_relu_kernel(%arg0: i32, %arg1: memref<1xf32, #tpu.memory_space<smem>>, %arg2: memref<1x32x256xf32, #tpu.memory_space<vmem>>, %arg3: memref<1x32x256xf32, #tpu.memory_space<vmem>>, %arg4: memref<1x32x256xf32, #tpu.memory_space<vmem>>, %arg5: memref<9x32x32xbf16, #tpu.memory_space<vmem>>, %arg6: memref<32x1xf32, #tpu.memory_space<vmem>>, %arg7: memref<1x32x256xf32, #tpu.memory_space<vmem>>, %arg8: memref<32x290xf32, #tpu.memory_space<vmem>>) attributes {dimension_semantics = [#tpu.dimension_semantics<parallel>], iteration_bounds = array<i64: 2>, scalar_prefetch = 0 : i64, scratch_operands = 1 : i64, tpu.core_type = #tpu.core_type<tc>, window_params = [{transform_indices = @transform_0, window_bounds = array<i64: 1>}, {transform_indices = @transform_1, window_bounds = array<i64: 1, 32, 256>}, {transform_indices = @transform_2, window_bounds = array<i64: 1, 32, 256>}, {transform_indices = @transform_3, window_bounds = array<i64: 1, 32, 256>}, {pipeline_mode = #tpu.pipeline_mode<synchronous>, transform_indices = @transform_4, window_bounds = array<i64: 9, 32, 32>}, {pipeline_mode = #tpu.pipeline_mode<synchronous>, transform_indices = @transform_5, window_bounds = array<i64: 32, 1>}, {transform_indices = @transform_6, window_bounds = array<i64: 1, 32, 256>}]} {
    %c0 = arith.constant 0 : index
    %0 = memref.load %arg1[%c0] : memref<1xf32, #tpu.memory_space<smem>>
    %c0_0 = arith.constant 0 : index
    %c0_1 = arith.constant 0 : index
    %c0_2 = arith.constant 0 : index
    %1 = vector.load %arg3[%c0_0, %c0_1, %c0_2] : memref<1x32x256xf32, #tpu.memory_space<vmem>>, vector<1x32x256xf32>
    %2 = vector.shape_cast %1 : vector<1x32x256xf32> to vector<32x256xf32>
    %c0_3 = arith.constant 0 : index
    %c0_4 = arith.constant 0 : index
    %c0_5 = arith.constant 0 : index
    %3 = vector.load %arg4[%c0_3, %c0_4, %c0_5] : memref<1x32x256xf32, #tpu.memory_space<vmem>>, vector<1x32x256xf32>
    %4 = vector.shape_cast %3 : vector<1x32x256xf32> to vector<32x256xf32>
    %5 = arith.addf %2, %4 : vector<32x256xf32>
    %6 = vector.broadcast %0 : f32 to vector<32x256xf32>
    %7 = arith.mulf %6, %5 : vector<32x256xf32>
    %c0_6 = arith.constant 0 : index
    %c0_7 = arith.constant 0 : index
    %c0_8 = arith.constant 0 : index
    %8 = vector.load %arg2[%c0_6, %c0_7, %c0_8] : memref<1x32x256xf32, #tpu.memory_space<vmem>>, vector<1x32x256xf32>
    %9 = vector.shape_cast %8 : vector<1x32x256xf32> to vector<32x256xf32>
    %10 = arith.addf %7, %9 : vector<32x256xf32>
    %cst = arith.constant 0.000000e+00 : f32
    %11 = vector.broadcast %cst : f32 to vector<32x17xf32>
    %c0_9 = arith.constant 0 : index
    %c0_10 = arith.constant 0 : index
    %12 = vector.load %arg8[%c0_9, %c0_10] : memref<32x290xf32, #tpu.memory_space<vmem>>, vector<32x17xf32>
    tpu.vector_store %arg8[%c0_9, %c0_10], %11 {strides = array<i32>} : memref<32x290xf32, #tpu.memory_space<vmem>>, vector<32x17xf32>,
    %cst_11 = arith.constant 0.000000e+00 : f32
    %13 = vector.broadcast %cst_11 : f32 to vector<32x17xf32>
    %c0_12 = arith.constant 0 : index
    %c273 = arith.constant 273 : index
    %14 = vector.load %arg8[%c0_12, %c273] : memref<32x290xf32, #tpu.memory_space<vmem>>, vector<32x17xf32>
    tpu.vector_store %arg8[%c0_12, %c273], %13 {strides = array<i32>} : memref<32x290xf32, #tpu.memory_space<vmem>>, vector<32x17xf32>,
    %c0_13 = arith.constant 0 : index
    %c17 = arith.constant 17 : index
    %15 = vector.load %arg8[%c0_13, %c17] : memref<32x290xf32, #tpu.memory_space<vmem>>, vector<32x256xf32>
    tpu.vector_store %arg8[%c0_13, %c17], %10 {strides = array<i32>} : memref<32x290xf32, #tpu.memory_space<vmem>>, vector<32x256xf32>,
    %16 = tpu.iota {dimensions = array<i32: 1>} : vector<1x256xi32>
    %c16_i32 = arith.constant 16 : i32
    %c0_i32 = arith.constant 0 : i32
    %17 = arith.cmpi eq, %c16_i32, %c0_i32 : i32
    %c1_i32 = arith.constant 1 : i32
    %18 = arith.select %17, %c1_i32, %c16_i32 : i32
    %19 = vector.broadcast %18 : i32 to vector<1x256xi32>
    %20 = arith.remsi %16, %19 : vector<1x256xi32>
    %c0_i32_14 = arith.constant 0 : i32
    %21 = vector.broadcast %c0_i32_14 : i32 to vector<1x256xi32>
    %22 = arith.cmpi ne, %20, %21 : vector<1x256xi32>
    %c0_i32_15 = arith.constant 0 : i32
    %23 = vector.broadcast %c0_i32_15 : i32 to vector<1x256xi32>
    %24 = arith.cmpi slt, %20, %23 : vector<1x256xi32>
    %c0_i32_16 = arith.constant 0 : i32
    %25 = arith.cmpi slt, %18, %c0_i32_16 : i32
    %26 = vector.broadcast %25 : i1 to vector<1x256xi1>
    %27 = vector.broadcast %26 : vector<1x256xi1> to vector<1x256xi1>
    %28 = arith.xori %24, %27 : vector<1x256xi1>
    %29 = arith.andi %28, %22 : vector<1x256xi1>
    %30 = vector.broadcast %18 : i32 to vector<1x256xi32>
    %31 = arith.addi %20, %30 : vector<1x256xi32>
    %32 = arith.select %29, %31, %20 : vector<1x256xi1>, vector<1x256xi32>
    %c0_i32_17 = arith.constant 0 : i32
    %33 = vector.broadcast %c0_i32_17 : i32 to vector<1x256xi32>
    %34 = arith.cmpi eq, %32, %33 : vector<1x256xi32>
    %c15_i32 = arith.constant 15 : i32
    %35 = vector.broadcast %c15_i32 : i32 to vector<1x256xi32>
    %36 = arith.cmpi eq, %32, %35 : vector<1x256xi32>
    %cst_18 = arith.constant 0.000000e+00 : f32
    %37 = vector.broadcast %cst_18 : f32 to vector<32x256xf32>
    %c0_19 = arith.constant 0 : index
    %c0_20 = arith.constant 0 : index
    %38 = vector.load %arg8[%c0_19, %c0_20] : memref<32x290xf32, #tpu.memory_space<vmem>>, vector<32x256xf32>
    %cst_21 = arith.constant 0.000000e+00 : f32
    %39 = vector.shape_cast %34 : vector<1x256xi1> to vector<1x256xi1>
    %40 = vector.broadcast %39 : vector<1x256xi1> to vector<32x256xi1>
    %41 = vector.broadcast %cst_21 : f32 to vector<32x256xf32>
    %42 = arith.select %40, %41, %38 : vector<32x256xi1>, vector<32x256xf32>
    %c0_22 = arith.constant 0 : index
    %c0_23 = arith.constant 0 : index
    %c0_24 = arith.constant 0 : index
    %43 = vector.load %arg5[%c0_22, %c0_23, %c0_24] : memref<9x32x32xbf16, #tpu.memory_space<vmem>>, vector<1x32x32xbf16>
    %44 = vector.shape_cast %43 : vector<1x32x32xbf16> to vector<32x32xbf16>
    %45 = arith.truncf %42 : vector<32x256xf32> to vector<32x256xbf16>
    %cst_25 = arith.constant dense<0.000000e+00> : vector<32x256xf32>
    %46 = tpu.matmul %44, %45, %cst_25 {dimension_numbers = #tpu.dot_dimension_numbers<[1], [0], [0], [1], [0, 0, 1, 1], [], []>} : vector<32x32xbf16>, vector<32x256xbf16>, vector<32x256xf32> -> vector<32x256xf32>
    %47 = arith.addf %37, %46 : vector<32x256xf32>
    %c0_26 = arith.constant 0 : index
    %c1 = arith.constant 1 : index
    %48 = vector.load %arg8[%c0_26, %c1] : memref<32x290xf32, #tpu.memory_space<vmem>>, vector<32x256xf32>
    %c1_27 = arith.constant 1 : index
    %c0_28 = arith.constant 0 : index
    %c0_29 = arith.constant 0 : index
    %49 = vector.load %arg5[%c1_27, %c0_28, %c0_29] : memref<9x32x32xbf16, #tpu.memory_space<vmem>>, vector<1x32x32xbf16>
    %50 = vector.shape_cast %49 : vector<1x32x32xbf16> to vector<32x32xbf16>
    %51 = arith.truncf %48 : vector<32x256xf32> to vector<32x256xbf16>
    %cst_30 = arith.constant dense<0.000000e+00> : vector<32x256xf32>
    %52 = tpu.matmul %50, %51, %cst_30 {dimension_numbers = #tpu.dot_dimension_numbers<[1], [0], [0], [1], [0, 0, 1, 1], [], []>} : vector<32x32xbf16>, vector<32x256xbf16>, vector<32x256xf32> -> vector<32x256xf32>
    %53 = arith.addf %47, %52 : vector<32x256xf32>
    %c0_31 = arith.constant 0 : index
    %c2 = arith.constant 2 : index
    %54 = vector.load %arg8[%c0_31, %c2] : memref<32x290xf32, #tpu.memory_space<vmem>>, vector<32x256xf32>
    %cst_32 = arith.constant 0.000000e+00 : f32
    %55 = vector.shape_cast %36 : vector<1x256xi1> to vector<1x256xi1>
    %56 = vector.broadcast %55 : vector<1x256xi1> to vector<32x256xi1>
    %57 = vector.broadcast %cst_32 : f32 to vector<32x256xf32>
    %58 = arith.select %56, %57, %54 : vector<32x256xi1>, vector<32x256xf32>
    %c2_33 = arith.constant 2 : index
    %c0_34 = arith.constant 0 : index
    %c0_35 = arith.constant 0 : index
    %59 = vector.load %arg5[%c2_33, %c0_34, %c0_35] : memref<9x32x32xbf16, #tpu.memory_space<vmem>>, vector<1x32x32xbf16>
    %60 = vector.shape_cast %59 : vector<1x32x32xbf16> to vector<32x32xbf16>
    %61 = arith.truncf %58 : vector<32x256xf32> to vector<32x256xbf16>
    %cst_36 = arith.constant dense<0.000000e+00> : vector<32x256xf32>
    %62 = tpu.matmul %60, %61, %cst_36 {dimension_numbers = #tpu.dot_dimension_numbers<[1], [0], [0], [1], [0, 0, 1, 1], [], []>} : vector<32x32xbf16>, vector<32x256xbf16>, vector<32x256xf32> -> vector<32x256xf32>
    %63 = arith.addf %53, %62 : vector<32x256xf32>
    %c0_37 = arith.constant 0 : index
    %c16 = arith.constant 16 : index
    %64 = vector.load %arg8[%c0_37, %c16] : memref<32x290xf32, #tpu.memory_space<vmem>>, vector<32x256xf32>
    %cst_38 = arith.constant 0.000000e+00 : f32
    %65 = vector.shape_cast %34 : vector<1x256xi1> to vector<1x256xi1>
    %66 = vector.broadcast %65 : vector<1x256xi1> to vector<32x256xi1>
    %67 = vector.broadcast %cst_38 : f32 to vector<32x256xf32>
    %68 = arith.select %66, %67, %64 : vector<32x256xi1>, vector<32x256xf32>
    %c3 = arith.constant 3 : index
    %c0_39 = arith.constant 0 : index
    %c0_40 = arith.constant 0 : index
    %69 = vector.load %arg5[%c3, %c0_39, %c0_40] : memref<9x32x32xbf16, #tpu.memory_space<vmem>>, vector<1x32x32xbf16>
    %70 = vector.shape_cast %69 : vector<1x32x32xbf16> to vector<32x32xbf16>
    %71 = arith.truncf %68 : vector<32x256xf32> to vector<32x256xbf16>
    %cst_41 = arith.constant dense<0.000000e+00> : vector<32x256xf32>
    %72 = tpu.matmul %70, %71, %cst_41 {dimension_numbers = #tpu.dot_dimension_numbers<[1], [0], [0], [1], [0, 0, 1, 1], [], []>} : vector<32x32xbf16>, vector<32x256xbf16>, vector<32x256xf32> -> vector<32x256xf32>
    %73 = arith.addf %63, %72 : vector<32x256xf32>
    %c0_42 = arith.constant 0 : index
    %c17_43 = arith.constant 17 : index
    %74 = vector.load %arg8[%c0_42, %c17_43] : memref<32x290xf32, #tpu.memory_space<vmem>>, vector<32x256xf32>
    %c4 = arith.constant 4 : index
    %c0_44 = arith.constant 0 : index
    %c0_45 = arith.constant 0 : index
    %75 = vector.load %arg5[%c4, %c0_44, %c0_45] : memref<9x32x32xbf16, #tpu.memory_space<vmem>>, vector<1x32x32xbf16>
    %76 = vector.shape_cast %75 : vector<1x32x32xbf16> to vector<32x32xbf16>
    %77 = arith.truncf %74 : vector<32x256xf32> to vector<32x256xbf16>
    %cst_46 = arith.constant dense<0.000000e+00> : vector<32x256xf32>
    %78 = tpu.matmul %76, %77, %cst_46 {dimension_numbers = #tpu.dot_dimension_numbers<[1], [0], [0], [1], [0, 0, 1, 1], [], []>} : vector<32x32xbf16>, vector<32x256xbf16>, vector<32x256xf32> -> vector<32x256xf32>
    %79 = arith.addf %73, %78 : vector<32x256xf32>
    %c0_47 = arith.constant 0 : index
    %c18 = arith.constant 18 : index
    %80 = vector.load %arg8[%c0_47, %c18] : memref<32x290xf32, #tpu.memory_space<vmem>>, vector<32x256xf32>
    %cst_48 = arith.constant 0.000000e+00 : f32
    %81 = vector.shape_cast %36 : vector<1x256xi1> to vector<1x256xi1>
    %82 = vector.broadcast %81 : vector<1x256xi1> to vector<32x256xi1>
    %83 = vector.broadcast %cst_48 : f32 to vector<32x256xf32>
    %84 = arith.select %82, %83, %80 : vector<32x256xi1>, vector<32x256xf32>
    %c5 = arith.constant 5 : index
    %c0_49 = arith.constant 0 : index
    %c0_50 = arith.constant 0 : index
    %85 = vector.load %arg5[%c5, %c0_49, %c0_50] : memref<9x32x32xbf16, #tpu.memory_space<vmem>>, vector<1x32x32xbf16>
    %86 = vector.shape_cast %85 : vector<1x32x32xbf16> to vector<32x32xbf16>
    %87 = arith.truncf %84 : vector<32x256xf32> to vector<32x256xbf16>
    %cst_51 = arith.constant dense<0.000000e+00> : vector<32x256xf32>
    %88 = tpu.matmul %86, %87, %cst_51 {dimension_numbers = #tpu.dot_dimension_numbers<[1], [0], [0], [1], [0, 0, 1, 1], [], []>} : vector<32x32xbf16>, vector<32x256xbf16>, vector<32x256xf32> -> vector<32x256xf32>
    %89 = arith.addf %79, %88 : vector<32x256xf32>
    %c0_52 = arith.constant 0 : index
    %c32 = arith.constant 32 : index
    %90 = vector.load %arg8[%c0_52, %c32] : memref<32x290xf32, #tpu.memory_space<vmem>>, vector<32x256xf32>
    %cst_53 = arith.constant 0.000000e+00 : f32
    %91 = vector.shape_cast %34 : vector<1x256xi1> to vector<1x256xi1>
    %92 = vector.broadcast %91 : vector<1x256xi1> to vector<32x256xi1>
    %93 = vector.broadcast %cst_53 : f32 to vector<32x256xf32>
    %94 = arith.select %92, %93, %90 : vector<32x256xi1>, vector<32x256xf32>
    %c6 = arith.constant 6 : index
    %c0_54 = arith.constant 0 : index
    %c0_55 = arith.constant 0 : index
    %95 = vector.load %arg5[%c6, %c0_54, %c0_55] : memref<9x32x32xbf16, #tpu.memory_space<vmem>>, vector<1x32x32xbf16>
    %96 = vector.shape_cast %95 : vector<1x32x32xbf16> to vector<32x32xbf16>
    %97 = arith.truncf %94 : vector<32x256xf32> to vector<32x256xbf16>
    %cst_56 = arith.constant dense<0.000000e+00> : vector<32x256xf32>
    %98 = tpu.matmul %96, %97, %cst_56 {dimension_numbers = #tpu.dot_dimension_numbers<[1], [0], [0], [1], [0, 0, 1, 1], [], []>} : vector<32x32xbf16>, vector<32x256xbf16>, vector<32x256xf32> -> vector<32x256xf32>
    %99 = arith.addf %89, %98 : vector<32x256xf32>
    %c0_57 = arith.constant 0 : index
    %c33 = arith.constant 33 : index
    %100 = vector.load %arg8[%c0_57, %c33] : memref<32x290xf32, #tpu.memory_space<vmem>>, vector<32x256xf32>
    %c7 = arith.constant 7 : index
    %c0_58 = arith.constant 0 : index
    %c0_59 = arith.constant 0 : index
    %101 = vector.load %arg5[%c7, %c0_58, %c0_59] : memref<9x32x32xbf16, #tpu.memory_space<vmem>>, vector<1x32x32xbf16>
    %102 = vector.shape_cast %101 : vector<1x32x32xbf16> to vector<32x32xbf16>
    %103 = arith.truncf %100 : vector<32x256xf32> to vector<32x256xbf16>
    %cst_60 = arith.constant dense<0.000000e+00> : vector<32x256xf32>
    %104 = tpu.matmul %102, %103, %cst_60 {dimension_numbers = #tpu.dot_dimension_numbers<[1], [0], [0], [1], [0, 0, 1, 1], [], []>} : vector<32x32xbf16>, vector<32x256xbf16>, vector<32x256xf32> -> vector<32x256xf32>
    %105 = arith.addf %99, %104 : vector<32x256xf32>
    %c0_61 = arith.constant 0 : index
    %c34 = arith.constant 34 : index
    %106 = vector.load %arg8[%c0_61, %c34] : memref<32x290xf32, #tpu.memory_space<vmem>>, vector<32x256xf32>
    %cst_62 = arith.constant 0.000000e+00 : f32
    %107 = vector.shape_cast %36 : vector<1x256xi1> to vector<1x256xi1>
    %108 = vector.broadcast %107 : vector<1x256xi1> to vector<32x256xi1>
    %109 = vector.broadcast %cst_62 : f32 to vector<32x256xf32>
    %110 = arith.select %108, %109, %106 : vector<32x256xi1>, vector<32x256xf32>
    %c8 = arith.constant 8 : index
    %c0_63 = arith.constant 0 : index
    %c0_64 = arith.constant 0 : index
    %111 = vector.load %arg5[%c8, %c0_63, %c0_64] : memref<9x32x32xbf16, #tpu.memory_space<vmem>>, vector<1x32x32xbf16>
    %112 = vector.shape_cast %111 : vector<1x32x32xbf16> to vector<32x32xbf16>
    %113 = arith.truncf %110 : vector<32x256xf32> to vector<32x256xbf16>
    %cst_65 = arith.constant dense<0.000000e+00> : vector<32x256xf32>
    %114 = tpu.matmul %112, %113, %cst_65 {dimension_numbers = #tpu.dot_dimension_numbers<[1], [0], [0], [1], [0, 0, 1, 1], [], []>} : vector<32x32xbf16>, vector<32x256xbf16>, vector<32x256xf32> -> vector<32x256xf32>
    %115 = arith.addf %105, %114 : vector<32x256xf32>
    %c0_66 = arith.constant 0 : index
    %c0_67 = arith.constant 0 : index
    %116 = vector.load %arg6[%c0_66, %c0_67] : memref<32x1xf32, #tpu.memory_space<vmem>>, vector<32x1xf32>
    %117 = vector.broadcast %116 : vector<32x1xf32> to vector<32x256xf32>
    %118 = arith.addf %115, %117 : vector<32x256xf32>
    %cst_68 = arith.constant 0.000000e+00 : f32
    %119 = vector.broadcast %cst_68 : f32 to vector<32x256xf32>
    %120 = arith.maximumf %118, %119 : vector<32x256xf32>
    %c0_69 = arith.constant 0 : index
    %c0_70 = arith.constant 0 : index
    %c0_71 = arith.constant 0 : index
    %121 = vector.load %arg7[%c0_69, %c0_70, %c0_71] : memref<1x32x256xf32, #tpu.memory_space<vmem>>, vector<1x32x256xf32>
    %122 = vector.shape_cast %121 : vector<1x32x256xf32> to vector<32x256xf32>
    %123 = vector.shape_cast %120 : vector<32x256xf32> to vector<1x32x256xf32>
    tpu.vector_store %arg7[%c0_69, %c0_70, %c0_71], %123 {strides = array<i32>} : memref<1x32x256xf32, #tpu.memory_space<vmem>>, vector<1x32x256xf32>,
    return
  }
  func.func @transform_0(%arg0: i32) -> i32 {
    %c0_i32 = arith.constant 0 : i32
    %c0_i32_0 = arith.constant 0 : i32
    return %c0_i32 : i32
  }
  func.func @transform_1(%arg0: i32) -> (i32, i32, i32) {
    %c0_i32 = arith.constant 0 : i32
    %c0_i32_0 = arith.constant 0 : i32
    %c0_i32_1 = arith.constant 0 : i32
    return %arg0, %c0_i32, %c0_i32_0 : i32, i32, i32
  }
  func.func @transform_2(%arg0: i32) -> (i32, i32, i32) {
    %c0_i32 = arith.constant 0 : i32
    %c0_i32_0 = arith.constant 0 : i32
    %c0_i32_1 = arith.constant 0 : i32
    return %arg0, %c0_i32, %c0_i32_0 : i32, i32, i32
  }
  func.func @transform_3(%arg0: i32) -> (i32, i32, i32) {
    %c0_i32 = arith.constant 0 : i32
    %c0_i32_0 = arith.constant 0 : i32
    %c0_i32_1 = arith.constant 0 : i32
    return %arg0, %c0_i32, %c0_i32_0 : i32, i32, i32
  }
  func.func @transform_4(%arg0: i32) -> (i32, i32, i32) {
    %c0_i32 = arith.constant 0 : i32
    %c0_i32_0 = arith.constant 0 : i32
    %c0_i32_1 = arith.constant 0 : i32
    %c0_i32_2 = arith.constant 0 : i32
    return %c0_i32, %c0_i32_0, %c0_i32_1 : i32, i32, i32
  }
  func.func @transform_5(%arg0: i32) -> (i32, i32) {
    %c0_i32 = arith.constant 0 : i32
    %c0_i32_0 = arith.constant 0 : i32
    %c0_i32_1 = arith.constant 0 : i32
    return %c0_i32, %c0_i32_0 : i32, i32
  }
  func.func @transform_6(%arg0: i32) -> (i32, i32, i32) {
    %c0_i32 = arith.constant 0 : i32
    %c0_i32_0 = arith.constant 0 : i32
    %c0_i32_1 = arith.constant 0 : i32
    return %arg0, %c0_i32, %c0_i32_0 : i32, i32, i32
  }
}

</mosaic_0001>

<bundles_post_ra>
// kernel: body_han1_forward.3
= control target key start
LH: loop header
LB: loop body
LE: loop exit
PB: predicated region body
PF: predicated region fallthrough
CT: control target
= control target key end

     0   :  { %s3865_s9 = smov 0   ;;  %s5080_s0 = inlined_call_operand.vmem [shape: f32[2,16,32,16], index: 0, kind: input, shape index: {}]   ;;  %s5081_s1 = inlined_call_operand.vmem [shape: f32[2,16,32,16], index: 1, kind: input, shape index: {}]   ;;  %s5082_s2 = inlined_call_operand.vmem [shape: f32[2,16,32,16], index: 2, kind: output, shape index: {}]  }
   0x1 LB: > { %s3082_s10 = sadd.s32 4294967295, %s3848_s9   ;;  %p3086_p0 = scmp.ge.s32.totalorder %s3848_s9, 1  ;;  %s3848_s9 = sphi %s3865_s9, %s12_s9  }
   0x2   : > { %p122_p1 = scmp.lt.s32.totalorder %s3848_s9, 3 }
   0x4   : > { %p123_p2 = pnand %p3086_p0, %p122_p1 }
   0x6   : > { %126 = sbr.rel (%p123_p2) target bundleno = 875 (0x36b), region = 28 }
   0xb   : > { %p149_p3 = scmp.lt.s32.totalorder %s3082_s10, 1  ;;  %vm357_vm0 = vcmask 130048   ;;  %vm1334_vm1 = vcmask 261120  }
   0xd   : > { %s5302_s10 = smov (!%p149_p3, %s3082_s10), 1 }
   0xe   : > { %s3873_s11 = sshll.u32 %s5302_s10, 9 }
   0xf   : > { %s3879_s14 = scalar_lea.vmem %s5081_s1, %s3873_s11  ;;  %s3885_s17 = scalar_lea.vmem %s5080_s0, %s3873_s11 }
  0x10   : > { %v231_v0 = vld [vmem:[%s3879_s14 + $0x10] sm:$0xff]  ;;  %v232_v1 = vld [vmem:[%s3879_s14 + $0x18] sm:$0xff]  ;;  %v229_v5 = vld [vmem:[%s3879_s14] sm:$0xff]  ;;  %s4947_s20 = scalar_lea.vmem %s5082_s2, %s3873_s11 }
  0x11   : > { %v235_v2 = vld [vmem:[%s3879_s14 + $0x30] sm:$0xff]  ;;  %v326_v3 = vpack.c.bf16 %v232_v1, %v231_v0  ;;  %v236_v4 = vld [vmem:[%s3879_s14 + $0x38] sm:$0xff]  ;;  %v230_v6 = vld [vmem:[%s3879_s14 + $0x8] sm:$0xff] }
  0x12   : > { %v328_v7 = vpack.c.bf16 %v236_v4, %v235_v2  ;;  %v325_v8 = vpack.c.bf16 %v230_v6, %v229_v5  ;;  %v233_v9 = vld [vmem:[%s3879_s14 + $0x20] sm:$0xff]  ;;  %v234_v10 = vld [vmem:[%s3879_s14 + $0x28] sm:$0xff]  ;;  %v239_v20 = vld [vmem:[%s3879_s14 + $0x50] sm:$0xff] }
  0x13   : > { %v165_v11 = vld [vmem:[%s3885_s17] sm:$0xff]  ;;  %3546 = vmatprep.subr.msk.bf16.mxu0 %vm357_vm0, %v326_v3  ;;  %v368_v12 = vsel %vm357_vm0, %v326_v3, 0  ;;  %v327_v13 = vpack.c.bf16 %v234_v10, %v233_v9  ;;  %v166_v14 = vld [vmem:[%s3885_s17 + $0x8] sm:$0xff]  ;;  %v240_v21 = vld [vmem:[%s3879_s14 + $0x58] sm:$0xff] }
  0x14   : > { %v169_v15 = vld [vmem:[%s3885_s17 + $0x20] sm:$0xff]  ;;  %v170_v16 = vld [vmem:[%s3885_s17 + $0x28] sm:$0xff]  ;;  %3548 = vmatprep.subr.msk.bf16.mxu1 %vm357_vm0, %v328_v7  ;;  %3291 = vmatpush3.bf16.xpose.msra.mxu0 %v368_v12  ;;  %v429_v17 = vsel %vm357_vm0, %v328_v7, 0  ;;  %v3903_v18 = vpack.c.bf16 %v166_v14, %v165_v11  ;;  %v243_v22 = vld [vmem:[%s3879_s14 + $0x70] sm:$0xff]  ;;  %v365_v24 = vsel %vm357_vm0, %v325_v8, 0  ;;  %v330_v25 = vpack.c.bf16 %v240_v21, %v239_v20 }
  0x15   : > { %v3905_v19 = vpack.c.bf16 %v170_v16, %v169_v15  ;;  %3299 = vmatpush3.bf16.xpose.msra.mxu1 %v429_v17  ;;  %3547 = vmatprep.subr.msk.bf16.mxu0 %vm357_vm0, %v325_v8  ;;  %v244_v23 = vld [vmem:[%s3879_s14 + $0x78] sm:$0xff]  ;;  %v426_v26 = vsel %vm357_vm0, %v327_v13, 0  ;;  %v167_v28 = vld [vmem:[%s3885_s17 + $0x10] sm:$0xff]  ;;  %v237_v32 = vld [vmem:[%s3879_s14 + $0x40] sm:$0xff] }
  0x16   : > { %3549 = vmatprep.subr.msk.bf16.mxu1 %vm357_vm0, %v327_v13  ;;  %3294 = vmatprep.mubr.msk.bf16.mxu0 %vm357_vm0, %v3903_v18  ;;  %v332_v27 = vpack.c.bf16 %v244_v23, %v243_v22  ;;  %v168_v29 = vld [vmem:[%s3885_s17 + $0x18] sm:$0xff]  ;;  %v171_v30 = vld [vmem:[%s3885_s17 + $0x30] sm:$0xff]  ;;  %v238_v33 = vld [vmem:[%s3879_s14 + $0x48] sm:$0xff]  ;;  %v490_v42 = vsel %vm357_vm0, %v330_v25, 0 }
  0x17   : > { %3302 = vmatprep.mubr.msk.bf16.mxu1 %vm357_vm0, %v3905_v19  ;;  %v172_v31 = vld [vmem:[%s3885_s17 + $0x38] sm:$0xff]  ;;  %v241_v34 = vld [vmem:[%s3879_s14 + $0x60] sm:$0xff]  ;;  %v3928_v35 = vpack.c.bf16 %v168_v29, %v167_v28  ;;  %v242_v36 = vld [vmem:[%s3879_s14 + $0x68] sm:$0xff]  ;;  %v329_v43 = vpack.c.bf16 %v238_v33, %v237_v32 }
  0x18   : > { %v173_v37 = vld [vmem:[%s3885_s17 + $0x40] sm:$0xff]  ;;  %v174_v38 = vld [vmem:[%s3885_s17 + $0x48] sm:$0xff]  ;;  %v3933_v39 = vpack.c.bf16 %v172_v31, %v171_v30  ;;  %v551_v44 = vsel %vm357_vm0, %v332_v27, 0  ;;  %v331_v45 = vpack.c.bf16 %v242_v36, %v241_v34  ;;  %v247_v48 = vld [vmem:[%s3879_s14 + $0x90] sm:$0xff] }
  0x19   : > { %v177_v40 = vld [vmem:[%s3885_s17 + $0x60] sm:$0xff]  ;;  %v178_v41 = vld [vmem:[%s3885_s17 + $0x68] sm:$0xff]  ;;  %v3939_v46 = vpack.c.bf16 %v174_v38, %v173_v37  ;;  %v248_v49 = vld [vmem:[%s3879_s14 + $0x98] sm:$0xff]  ;;  %v487_v52 = vsel %vm357_vm0, %v329_v43, 0 }
  0x1a   : > { %v3943_v47 = vpack.c.bf16 %v178_v41, %v177_v40  ;;  %v251_v50 = vld [vmem:[%s3879_s14 + $0xb0] sm:$0xff]  ;;  %v252_v51 = vld [vmem:[%s3879_s14 + $0xb8] sm:$0xff]  ;;  %v334_v53 = vpack.c.bf16 %v248_v49, %v247_v48  ;;  %v548_v54 = vsel %vm357_vm0, %v331_v45, 0  ;;  %v245_v60 = vld [vmem:[%s3879_s14 + $0x80] sm:$0xff] }
  0x1b   : > { %5173 = vst [vmem:[#allocation2_spill] sm:$0xff] %v3939_v46  ;;  %v336_v55 = vpack.c.bf16 %v252_v51, %v251_v50  ;;  %v175_v56 = vld [vmem:[%s3885_s17 + $0x50] sm:$0xff]  ;;  %v176_v57 = vld [vmem:[%s3885_s17 + $0x58] sm:$0xff]  ;;  %v246_v61 = vld [vmem:[%s3879_s14 + $0x88] sm:$0xff] }
  0x1c   : > { %3293 = vmatpush3.bf16.xpose.msra.mxu0 %v365_v24  ;;  %5174 = vst [vmem:[#allocation3_spill] sm:$0xff] %v3943_v47  ;;  %v179_v58 = vld [vmem:[%s3885_s17 + $0x70] sm:$0xff]  ;;  %v180_v59 = vld [vmem:[%s3885_s17 + $0x78] sm:$0xff]  ;;  %v249_v62 = vld [vmem:[%s3879_s14 + $0xa0] sm:$0xff]  ;;  %v3968_v63 = vpack.c.bf16 %v176_v57, %v175_v56  ;;  %v612_v6 = vsel %vm357_vm0, %v334_v53, 0  ;;  %v333_v7 = vpack.c.bf16 %v246_v61, %v245_v60 }
  0x1d   : > { %3301 = vmatpush3.bf16.xpose.msra.mxu1 %v426_v26  ;;  %3550 = vmatprep.subr.msk.bf16.mxu0 %vm357_vm0, %v330_v25  ;;  %v250_v0 = vld [vmem:[%s3879_s14 + $0xa8] sm:$0xff]  ;;  %v181_v1 = vld [vmem:[%s3885_s17 + $0x80] sm:$0xff]  ;;  %v3973_v3 = vpack.c.bf16 %v180_v59, %v179_v58  ;;  %v673_v8 = vsel %vm357_vm0, %v336_v55, 0  ;;  %v255_v12 = vld [vmem:[%s3879_s14 + $0xd0] sm:$0xff] }
  0x1e   : > { %3552 = vmatprep.subr.msk.bf16.mxu1 %vm357_vm0, %v332_v27  ;;  %5175 = vst [vmem:[#allocation4_spill] sm:$0xff] %v3968_v63  ;;  %v182_v2 = vld [vmem:[%s3885_s17 + $0x88] sm:$0xff]  ;;  %v185_v4 = vld [vmem:[%s3885_s17 + $0xa0] sm:$0xff]  ;;  %v335_v9 = vpack.c.bf16 %v250_v0, %v249_v62  ;;  %v256_v13 = vld [vmem:[%s3879_s14 + $0xd8] sm:$0xff]  ;;  %v609_v16 = vsel %vm357_vm0, %v333_v7, 0 }
  0x1f   : > { %5176 = vst [vmem:[#allocation5_spill] sm:$0xff] %v3973_v3  ;;  %v186_v5 = vld [vmem:[%s3885_s17 + $0xa8] sm:$0xff]  ;;  %v3979_v10 = vpack.c.bf16 %v182_v2, %v181_v1  ;;  %v259_v14 = vld [vmem:[%s3879_s14 + $0xf0] sm:$0xff]  ;;  %v260_v15 = vld [vmem:[%s3879_s14 + $0xf8] sm:$0xff]  ;;  %v338_v17 = vpack.c.bf16 %v256_v13, %v255_v12 }
  0x20   : > { %v3983_v11 = vpack.c.bf16 %v186_v5, %v185_v4  ;;  %v670_v20 = vsel %vm357_vm0, %v335_v9, 0  ;;  %v340_v21 = vpack.c.bf16 %v260_v15, %v259_v14  ;;  %v183_v22 = vld [vmem:[%s3885_s17 + $0x90] sm:$0xff]  ;;  %v184_v23 = vld [vmem:[%s3885_s17 + $0x98] sm:$0xff]  ;;  %v253_v26 = vld [vmem:[%s3879_s14 + $0xc0] sm:$0xff] }
  0x21   : > { %5177 = vst [vmem:[#allocation6_spill] sm:$0xff] %v3979_v10  ;;  %v187_v24 = vld [vmem:[%s3885_s17 + $0xb0] sm:$0xff]  ;;  %v188_v25 = vld [vmem:[%s3885_s17 + $0xb8] sm:$0xff]  ;;  %v254_v27 = vld [vmem:[%s3879_s14 + $0xc8] sm:$0xff]  ;;  %v4008_v29 = vpack.c.bf16 %v184_v23, %v183_v22  ;;  %v734_v37 = vsel %vm357_vm0, %v338_v17, 0 }
  0x22   : > { %5178 = vst [vmem:[#allocation7_spill] sm:$0xff] %v3983_v11  ;;  %v257_v28 = vld [vmem:[%s3879_s14 + $0xe0] sm:$0xff]  ;;  %v258_v30 = vld [vmem:[%s3879_s14 + $0xe8] sm:$0xff]  ;;  %v4013_v33 = vpack.c.bf16 %v188_v25, %v187_v24  ;;  %v337_v38 = vpack.c.bf16 %v254_v27, %v253_v26  ;;  %v795_v40 = vsel %vm357_vm0, %v340_v21, 0  ;;  %v267_v48 = vld [vmem:[%s3879_s14 + $0x130] sm:$0xff] }
  0x23   : > { %3295 = vmatmul.mubr.msk.bf16.vlgmr.msra.gmra.mxu0 %vm357_vm0, %v3928_v35  ;;  %5179 = vst [vmem:[#allocation8_spill] sm:$0xff] %v4008_v29  ;;  %v189_v31 = vld [vmem:[%s3885_s17 + $0xc0] sm:$0xff]  ;;  %v190_v32 = vld [vmem:[%s3885_s17 + $0xc8] sm:$0xff]  ;;  %v339_v41 = vpack.c.bf16 %v258_v30, %v257_v28  ;;  %v268_v49 = vld [vmem:[%s3879_s14 + $0x138] sm:$0xff] }
  0x24   : > { %3303 = vmatmul.mubr.msk.bf16.vlgmr.msra.gmra.mxu1 %vm357_vm0, %v3933_v39  ;;  %3307 = vmatpush3.bf16.xpose.msra.mxu0 %v490_v42  ;;  %5180 = vst [vmem:[#allocation9_spill] sm:$0xff] %v4013_v33  ;;  %v193_v34 = vld [vmem:[%s3885_s17 + $0xe0] sm:$0xff]  ;;  %v194_v36 = vld [vmem:[%s3885_s17 + $0xe8] sm:$0xff]  ;;  %v4019_v42 = vpack.c.bf16 %v190_v32, %v189_v31  ;;  %v731_v50 = vsel %vm357_vm0, %v337_v38, 0  ;;  %v195_v56 = vld [vmem:[%s3885_s17 + $0xf0] sm:$0xff] }
  0x25   : > { %3315 = vmatpush3.bf16.xpose.msra.mxu1 %v551_v44  ;;  %3551 = vmatprep.subr.msk.bf16.mxu0 %vm357_vm0, %v329_v43  ;;  %v4023_v43 = vpack.c.bf16 %v194_v36, %v193_v34  ;;  %v263_v44 = vld [vmem:[%s3879_s14 + $0x110] sm:$0xff]  ;;  %v196_v57 = vld [vmem:[%s3885_s17 + $0xf8] sm:$0xff]  ;;  %v261_v58 = vld [vmem:[%s3879_s14 + $0x100] sm:$0xff] }
  0x26   : > { %3553 = vmatprep.subr.msk.bf16.mxu1 %vm357_vm0, %v331_v45  ;;  %3310 = vmatprep.mubr.msk.bf16.mxu0 %vm357_vm0, %v3939_v46  ;;  %5181 = vst [vmem:[#allocation10_spill] sm:$0xff] %v4019_v42  ;;  %v264_v45 = vld [vmem:[%s3879_s14 + $0x118] sm:$0xff]  ;;  %v262_v59 = vld [vmem:[%s3879_s14 + $0x108] sm:$0xff]  ;;  %v265_v60 = vld [vmem:[%s3879_s14 + $0x120] sm:$0xff]  ;;  %v4053_v2 = vpack.c.bf16 %v196_v57, %v195_v56 }
  0x27   : > { %3318 = vmatprep.mubr.msk.bf16.mxu1 %vm357_vm0, %v3943_v47  ;;  %5182 = vst [vmem:[#allocation11_spill] sm:$0xff] %v4023_v43  ;;  %v342_v51 = vpack.c.bf16 %v264_v45, %v263_v44  ;;  %v266_v62 = vld [vmem:[%s3879_s14 + $0x128] sm:$0xff]  ;;  %v197_v0 = vld [vmem:[%s3885_s17 + $0x100] sm:$0xff]  ;;  %v271_v14 = vld [vmem:[%s3879_s14 + $0x150] sm:$0xff] }
  0x28   : > { %v198_v1 = vld [vmem:[%s3885_s17 + $0x108] sm:$0xff]  ;;  %5184 = vst [vmem:[#allocation13_spill] sm:$0xff] %v4053_v2  ;;  %v201_v4 = vld [vmem:[%s3885_s17 + $0x120] sm:$0xff]  ;;  %v272_v15 = vld [vmem:[%s3879_s14 + $0x158] sm:$0xff] }
  0x29   : > { %v202_v5 = vld [vmem:[%s3885_s17 + $0x128] sm:$0xff]  ;;  %v4059_v12 = vpack.c.bf16 %v198_v1, %v197_v0  ;;  %v199_v24 = vld [vmem:[%s3885_s17 + $0x110] sm:$0xff]  ;;  %v200_v25 = vld [vmem:[%s3885_s17 + $0x118] sm:$0xff] }
  0x2a   : > { %v4063_v13 = vpack.c.bf16 %v202_v5, %v201_v4  ;;  %v203_v26 = vld [vmem:[%s3885_s17 + $0x130] sm:$0xff]  ;;  %v204_v27 = vld [vmem:[%s3885_s17 + $0x138] sm:$0xff]  ;;  %v269_v28 = vld [vmem:[%s3879_s14 + $0x140] sm:$0xff]  ;;  %v4088_v32 = vpack.c.bf16 %v200_v25, %v199_v24 }
  0x2b   : > { %5185 = vst [vmem:[#allocation14_spill] sm:$0xff] %v4059_v12  ;;  %v270_v30 = vld [vmem:[%s3879_s14 + $0x148] sm:$0xff]  ;;  %v273_v31 = vld [vmem:[%s3879_s14 + $0x160] sm:$0xff]  ;;  %v211_v0 = vld [vmem:[%s3885_s17 + $0x170] sm:$0xff] }
  0x2c   : > { %3309 = vmatpush3.bf16.xpose.msra.mxu0 %v487_v52  ;;  %v792_v52 = vsel %vm357_vm0, %v339_v41, 0  ;;  %5186 = vst [vmem:[#allocation15_spill] sm:$0xff] %v4063_v13  ;;  %5187 = vst [vmem:[#allocation16_spill] sm:$0xff] %v4088_v32  ;;  %v274_v34 = vld [vmem:[%s3879_s14 + $0x168] sm:$0xff]  ;;  %v205_v36 = vld [vmem:[%s3885_s17 + $0x140] sm:$0xff]  ;;  %v345_v45 = vpack.c.bf16 %v270_v30, %v269_v28 }
  0x2d   : > { %3317 = vmatpush3.bf16.xpose.msra.mxu1 %v548_v54  ;;  %3554 = vmatprep.subr.msk.bf16.mxu0 %vm357_vm0, %v334_v53  ;;  %v344_v53 = vpack.c.bf16 %v268_v49, %v267_v48  ;;  %v191_v54 = vld [vmem:[%s3885_s17 + $0xd0] sm:$0xff]  ;;  %v347_v49 = vpack.c.bf16 %v274_v34, %v273_v31  ;;  %v212_v1 = vld [vmem:[%s3885_s17 + $0x178] sm:$0xff]  ;;  %v277_v4 = vld [vmem:[%s3879_s14 + $0x180] sm:$0xff] }
  0x2e   : > { %3556 = vmatprep.subr.msk.bf16.mxu1 %vm357_vm0, %v336_v55  ;;  %v192_v55 = vld [vmem:[%s3885_s17 + $0xd8] sm:$0xff]  ;;  %v975_v56 = vsel %vm357_vm0, %v345_v45, 0  ;;  %v278_v5 = vld [vmem:[%s3879_s14 + $0x188] sm:$0xff]  ;;  %v291_v28 = vld [vmem:[%s3879_s14 + $0x1f0] sm:$0xff] }
  0x2f   : > { %v4048_v61 = vpack.c.bf16 %v192_v55, %v191_v54  ;;  %v283_v54 = vld [vmem:[%s3879_s14 + $0x1b0] sm:$0xff]  ;;  %v284_v55 = vld [vmem:[%s3879_s14 + $0x1b8] sm:$0xff] }
  0x30   : > { %v292_v30 = vld [vmem:[%s3879_s14 + $0x1f8] sm:$0xff] }
  0x31   : > { %5183 = vst [vmem:[#allocation12_spill] sm:$0xff] %v4048_v61 }
  0x33   : > { %3311 = vmatmul.mubr.msk.bf16.vlgmr.msra.gmra.mxu0 %vm357_vm0, %v3968_v63 }
  0x34   : > { %3319 = vmatmul.mubr.msk.bf16.vlgmr.msra.gmra.mxu1 %vm357_vm0, %v3973_v3  ;;  %3323 = vmatpush3.bf16.xpose.msra.mxu0 %v612_v6  ;;  %v856_v6 = vsel %vm357_vm0, %v342_v51, 0 }
  0x35   : > { %3331 = vmatpush3.bf16.xpose.msra.mxu1 %v673_v8  ;;  %3555 = vmatprep.subr.msk.bf16.mxu0 %vm357_vm0, %v333_v7  ;;  %v341_v7 = vpack.c.bf16 %v262_v59, %v261_v58  ;;  %v917_v8 = vsel %vm357_vm0, %v344_v53, 0  ;;  %v1036_v58 = vsel %vm357_vm0, %v347_v49, 0  ;;  %v352_v59 = vpack.c.bf16 %v284_v55, %v283_v54  ;;  %v290_v54 = vld [vmem:[%s3879_s14 + $0x1e8] sm:$0xff]  ;;  %v221_v55 = vld [vmem:[%s3885_s17 + $0x1c0] sm:$0xff] }
  0x36   : > { %3557 = vmatprep.subr.msk.bf16.mxu1 %vm357_vm0, %v335_v9  ;;  %3326 = vmatprep.mubr.msk.bf16.mxu0 %vm357_vm0, %v3979_v10  ;;  %v343_v9 = vpack.c.bf16 %v266_v62, %v265_v60  ;;  %v207_v60 = vld [vmem:[%s3885_s17 + $0x150] sm:$0xff]  ;;  %v208_v62 = vld [vmem:[%s3885_s17 + $0x158] sm:$0xff] }
  0x37   : > { %3334 = vmatprep.mubr.msk.bf16.mxu1 %vm357_vm0, %v3983_v11 }
  0x38   : > { %v914_v22 = vsel %vm357_vm0, %v343_v9, 0 }
  0x3c   : > { %3325 = vmatpush3.bf16.xpose.msra.mxu0 %v609_v16  ;;  %v275_v16 = vld [vmem:[%s3879_s14 + $0x170] sm:$0xff] }
  0x3d   : > { %3333 = vmatpush3.bf16.xpose.msra.mxu1 %v670_v20  ;;  %3558 = vmatprep.subr.msk.bf16.mxu0 %vm357_vm0, %v338_v17  ;;  %v276_v17 = vld [vmem:[%s3879_s14 + $0x178] sm:$0xff]  ;;  %v853_v20 = vsel %vm357_vm0, %v341_v7, 0 }
  0x3e   : > { %3560 = vmatprep.subr.msk.bf16.mxu1 %vm357_vm0, %v340_v21  ;;  %v346_v21 = vpack.c.bf16 %v272_v15, %v271_v14  ;;  %v348_v23 = vpack.c.bf16 %v276_v17, %v275_v16  ;;  %v214_v14 = vld [vmem:[%s3885_s17 + $0x188] sm:$0xff]  ;;  %v4133_v15 = vpack.c.bf16 %v212_v1, %v211_v0  ;;  %v217_v16 = vld [vmem:[%s3885_s17 + $0x1a0] sm:$0xff] }
  0x3f   : > { %v218_v17 = vld [vmem:[%s3885_s17 + $0x1a8] sm:$0xff] }
  0x40   : > { %v978_v44 = vsel %vm357_vm0, %v346_v21, 0  ;;  %v1039_v48 = vsel %vm357_vm0, %v348_v23, 0  ;;  %5192 = vst [vmem:[#allocation21_spill] sm:$0xff] %v4133_v15  ;;  %v4143_v25 = vpack.c.bf16 %v218_v17, %v217_v16  ;;  %v227_v16 = vld [vmem:[%s3885_s17 + $0x1f0] sm:$0xff]  ;;  %v228_v17 = vld [vmem:[%s3885_s17 + $0x1f8] sm:$0xff] }
  0x42   : > { %5194 = vst [vmem:[#allocation23_spill] sm:$0xff] %v4143_v25 }
  0x43   : > { %3327 = vmatmul.mubr.msk.bf16.vlgmr.msra.gmra.mxu0 %vm357_vm0, %v4008_v29 }
  0x44   : > { %3335 = vmatmul.mubr.msk.bf16.vlgmr.msra.gmra.mxu1 %vm357_vm0, %v4013_v33  ;;  %3339 = vmatpush3.bf16.xpose.msra.mxu0 %v734_v37  ;;  %v206_v37 = vld [vmem:[%s3885_s17 + $0x148] sm:$0xff] }
  0x45   : > { %3347 = vmatpush3.bf16.xpose.msra.mxu1 %v795_v40  ;;  %3559 = vmatprep.subr.msk.bf16.mxu0 %vm357_vm0, %v337_v38  ;;  %v4093_v38 = vpack.c.bf16 %v204_v27, %v203_v26  ;;  %v209_v40 = vld [vmem:[%s3885_s17 + $0x160] sm:$0xff]  ;;  %v287_v26 = vld [vmem:[%s3879_s14 + $0x1d0] sm:$0xff]  ;;  %v288_v27 = vld [vmem:[%s3879_s14 + $0x1d8] sm:$0xff] }
  0x46   : > { %3561 = vmatprep.subr.msk.bf16.mxu1 %vm357_vm0, %v339_v41  ;;  %3342 = vmatprep.mubr.msk.bf16.mxu0 %vm357_vm0, %v4019_v42  ;;  %v210_v41 = vld [vmem:[%s3885_s17 + $0x168] sm:$0xff]  ;;  %v354_v34 = vpack.c.bf16 %v288_v27, %v287_v26 }
  0x47   : > { %3350 = vmatprep.mubr.msk.bf16.mxu1 %vm357_vm0, %v4023_v43  ;;  %5188 = vst [vmem:[#allocation17_spill] sm:$0xff] %v4093_v38 }
  0x4c   : > { %3341 = vmatpush3.bf16.xpose.msra.mxu0 %v731_v50  ;;  %v4099_v50 = vpack.c.bf16 %v206_v37, %v205_v36  ;;  %v356_v37 = vpack.c.bf16 %v292_v30, %v291_v28 }
  0x4d   : > { %3349 = vmatpush3.bf16.xpose.msra.mxu1 %v792_v52  ;;  %3562 = vmatprep.subr.msk.bf16.mxu0 %vm357_vm0, %v342_v51  ;;  %v4103_v51 = vpack.c.bf16 %v210_v41, %v209_v40  ;;  %v279_v52 = vld [vmem:[%s3879_s14 + $0x190] sm:$0xff]  ;;  %v216_v41 = vld [vmem:[%s3885_s17 + $0x198] sm:$0xff] }
  0x4e   : > { %3564 = vmatprep.subr.msk.bf16.mxu1 %vm357_vm0, %v344_v53  ;;  %5189 = vst [vmem:[#allocation18_spill] sm:$0xff] %v4099_v50  ;;  %v280_v53 = vld [vmem:[%s3879_s14 + $0x198] sm:$0xff]  ;;  %v215_v40 = vld [vmem:[%s3885_s17 + $0x190] sm:$0xff]  ;;  %v1283_v0 = vsel %vm357_vm0, %v356_v37, 0 }
  0x4f   : > { %5190 = vst [vmem:[#allocation19_spill] sm:$0xff] %v4103_v51  ;;  %v350_v57 = vpack.c.bf16 %v280_v53, %v279_v52  ;;  %v289_v52 = vld [vmem:[%s3879_s14 + $0x1e0] sm:$0xff]  ;;  %v4168_v53 = vpack.c.bf16 %v216_v41, %v215_v40 }
  0x50   : > { %v355_v1 = vpack.c.bf16 %v290_v54, %v289_v52 }
  0x51   : > { %5195 = vst [vmem:[#allocation24_spill] sm:$0xff] %v4168_v53 }
  0x53   : > { %3343 = vmatmul.mubr.msk.bf16.vlgmr.msra.gmra.mxu0 %vm357_vm0, %v4048_v61 }
  0x54   : > { %3351 = vmatmul.mubr.msk.bf16.vlgmr.msra.gmra.mxu1 %vm357_vm0, %v4053_v2  ;;  %3355 = vmatpush3.bf16.xpose.msra.mxu0 %v856_v6  ;;  %v281_v6 = vld [vmem:[%s3879_s14 + $0x1a0] sm:$0xff] }
  0x55   : > { %3363 = vmatpush3.bf16.xpose.msra.mxu1 %v917_v8  ;;  %3563 = vmatprep.subr.msk.bf16.mxu0 %vm357_vm0, %v341_v7  ;;  %v4128_v7 = vpack.c.bf16 %v208_v62, %v207_v60  ;;  %v282_v8 = vld [vmem:[%s3879_s14 + $0x1a8] sm:$0xff]  ;;  %v1222_v60 = vsel %vm357_vm0, %v354_v34, 0 }
  0x56   : > { %3565 = vmatprep.subr.msk.bf16.mxu1 %vm357_vm0, %v343_v9  ;;  %3358 = vmatprep.mubr.msk.bf16.mxu0 %vm357_vm0, %v4059_v12  ;;  %v213_v9 = vld [vmem:[%s3885_s17 + $0x180] sm:$0xff] }
  0x57   : > { %3366 = vmatprep.mubr.msk.bf16.mxu1 %vm357_vm0, %v4063_v13  ;;  %5191 = vst [vmem:[#allocation20_spill] sm:$0xff] %v4128_v7  ;;  %v4139_v24 = vpack.c.bf16 %v214_v14, %v213_v9  ;;  %v223_v9 = vld [vmem:[%s3885_s17 + $0x1d0] sm:$0xff]  ;;  %v224_v14 = vld [vmem:[%s3885_s17 + $0x1d8] sm:$0xff] }
  0x59   : > { %5193 = vst [vmem:[#allocation22_spill] sm:$0xff] %v4139_v24 }
  0x5c   : > { %3357 = vmatpush3.bf16.xpose.msra.mxu0 %v853_v20  ;;  %v1100_v20 = vsel %vm357_vm0, %v350_v57, 0 }
  0x5d   : > { %3365 = vmatpush3.bf16.xpose.msra.mxu1 %v914_v22  ;;  %3566 = vmatprep.subr.msk.bf16.mxu0 %vm357_vm0, %v346_v21  ;;  %v349_v21 = vpack.c.bf16 %v278_v5, %v277_v4  ;;  %v1161_v22 = vsel %vm357_vm0, %v352_v59, 0 }
  0x5e   : > { %3568 = vmatprep.subr.msk.bf16.mxu1 %vm357_vm0, %v348_v23  ;;  %v351_v23 = vpack.c.bf16 %v282_v8, %v281_v6  ;;  %v1280_v8 = vsel %vm357_vm0, %v355_v1, 0 }
  0x5f   : > { %v1097_v31 = vsel %vm357_vm0, %v349_v21, 0 }
  0x60   : > { %v1158_v36 = vsel %vm357_vm0, %v351_v23, 0 }
  0x63   : > { %3359 = vmatmul.mubr.msk.bf16.vlgmr.msra.gmra.mxu0 %vm357_vm0, %v4088_v32 }
  0x64   : > { %3367 = vmatmul.mubr.msk.bf16.vlgmr.msra.gmra.mxu1 %vm357_vm0, %v4093_v38  ;;  %3371 = vmatpush3.bf16.xpose.msra.mxu0 %v978_v44  ;;  %v219_v44 = vld [vmem:[%s3885_s17 + $0x1b0] sm:$0xff] }
  0x65   : > { %3379 = vmatpush3.bf16.xpose.msra.mxu1 %v1039_v48  ;;  %3567 = vmatprep.subr.msk.bf16.mxu0 %vm357_vm0, %v345_v45  ;;  %v220_v45 = vld [vmem:[%s3885_s17 + $0x1b8] sm:$0xff]  ;;  %v285_v48 = vld [vmem:[%s3879_s14 + $0x1c0] sm:$0xff] }
  0x66   : > { %3569 = vmatprep.subr.msk.bf16.mxu1 %vm357_vm0, %v347_v49  ;;  %3374 = vmatprep.mubr.msk.bf16.mxu0 %vm357_vm0, %v4099_v50  ;;  %v286_v49 = vld [vmem:[%s3879_s14 + $0x1c8] sm:$0xff] }
  0x67   : > { %3382 = vmatprep.mubr.msk.bf16.mxu1 %vm357_vm0, %v4103_v51  ;;  %v353_v62 = vpack.c.bf16 %v286_v49, %v285_v48 }
  0x69   : > { %v1219_v6 = vsel %vm357_vm0, %v353_v62, 0 }
  0x6c   : > { %3373 = vmatpush3.bf16.xpose.msra.mxu0 %v975_v56  ;;  %v222_v56 = vld [vmem:[%s3885_s17 + $0x1c8] sm:$0xff] }
  0x6d   : > { %3381 = vmatpush3.bf16.xpose.msra.mxu1 %v1036_v58  ;;  %3570 = vmatprep.subr.msk.bf16.mxu0 %vm357_vm0, %v350_v57  ;;  %v4173_v57 = vpack.c.bf16 %v220_v45, %v219_v44  ;;  %v225_v58 = vld [vmem:[%s3885_s17 + $0x1e0] sm:$0xff]  ;;  %v4179_v4 = vpack.c.bf16 %v222_v56, %v221_v55 }
  0x6e   : > { %3572 = vmatprep.subr.msk.bf16.mxu1 %vm357_vm0, %v352_v59  ;;  %v226_v59 = vld [vmem:[%s3885_s17 + $0x1e8] sm:$0xff] }
  0x6f   : > { %5196 = vst [vmem:[#allocation25_spill] sm:$0xff] %v4173_v57  ;;  %5197 = vst [vmem:[#allocation26_spill] sm:$0xff] %v4179_v4  ;;  %v4183_v5 = vpack.c.bf16 %v226_v59, %v225_v58 }
  0x71   : > { %5198 = vst [vmem:[#allocation27_spill] sm:$0xff] %v4183_v5 }
  0x73   : > { %3375 = vmatmul.mubr.msk.bf16.vlgmr.msra.gmra.mxu0 %vm357_vm0, %v4128_v7 }
  0x74   : > { %3383 = vmatmul.mubr.msk.bf16.vlgmr.msra.gmra.mxu1 %vm357_vm0, %v4133_v15  ;;  %3387 = vmatpush3.bf16.xpose.msra.mxu0 %v1100_v20  ;;  %v4201_v20 = vpack.c.bf16 %v224_v14, %v223_v9 }
  0x75   : > { %3395 = vmatpush3.bf16.xpose.msra.mxu1 %v1161_v22  ;;  %3571 = vmatprep.subr.msk.bf16.mxu0 %vm357_vm0, %v349_v21  ;;  %v4203_v21 = vpack.c.bf16 %v228_v17, %v227_v16 }
  0x76   : > { %3573 = vmatprep.subr.msk.bf16.mxu1 %vm357_vm0, %v351_v23  ;;  %3390 = vmatprep.mubr.msk.bf16.mxu0 %vm357_vm0, %v4139_v24  ;;  %5199 = vst [vmem:[#allocation28_spill] sm:$0xff] %v4201_v20 }
  0x77   : > { %3398 = vmatprep.mubr.msk.bf16.mxu1 %vm357_vm0, %v4143_v25  ;;  %5200 = vst [vmem:[#allocation29_spill] sm:$0xff] %v4203_v21 }
  0x7c   : > { %3389 = vmatpush3.bf16.xpose.msra.mxu0 %v1097_v31 }
  0x7d   : > { %3397 = vmatpush3.bf16.xpose.msra.mxu1 %v1158_v36  ;;  %3574 = vmatprep.subr.msk.bf16.mxu0 %vm357_vm0, %v354_v34 }
  0x7e   : > { %3576 = vmatprep.subr.msk.bf16.mxu1 %vm357_vm0, %v356_v37 }
  0x83   : > { %3391 = vmatmul.mubr.msk.bf16.vlgmr.msra.gmra.mxu0 %vm357_vm0, %v4168_v53 }
  0x84   : > { %3399 = vmatmul.mubr.msk.bf16.vlgmr.msra.gmra.mxu1 %vm357_vm0, %v4173_v57  ;;  %3403 = vmatpush3.bf16.xpose.msra.mxu0 %v1222_v60 }
  0x85   : > { %3411 = vmatpush3.bf16.xpose.msra.mxu1 %v1283_v0  ;;  %3575 = vmatprep.subr.msk.bf16.mxu0 %vm357_vm0, %v353_v62 }
  0x86   : > { %3577 = vmatprep.subr.msk.bf16.mxu1 %vm357_vm0, %v355_v1  ;;  %3406 = vmatprep.mubr.msk.bf16.mxu0 %vm357_vm0, %v4179_v4 }
  0x87   : > { %3414 = vmatprep.mubr.msk.bf16.mxu1 %vm357_vm0, %v4183_v5 }
  0x8c   : > { %3405 = vmatpush3.bf16.xpose.msra.mxu0 %v1219_v6 }
  0x8d   : > { %3413 = vmatpush3.bf16.xpose.msra.mxu1 %v1280_v8  ;;  %3418 = vmatprep.subr.bf16.mxu0 %v3928_v35 }
  0x8e   : > { %3426 = vmatprep.subr.bf16.mxu1 %v3933_v39 }
  0x93   : > { %3407 = vmatmul.mubr.msk.bf16.vlgmr.msra.gmra.mxu0 %vm357_vm0, %v4201_v20 }
  0x94   : > { %3415 = vmatmul.mubr.msk.bf16.vlgmr.msra.gmra.mxu1 %vm357_vm0, %v4203_v21  ;;  %3419 = vmatpush3.bf16.msra.mxu0 %v3928_v35 }
  0x95   : > { %3420 = vmatprep.subr.bf16.mxu0 %v3903_v18  ;;  %3427 = vmatpush3.bf16.msra.mxu1 %v3933_v39 }
  0x96   : > { %3428 = vmatprep.subr.bf16.mxu1 %v3905_v19 }
  0x98   : > { %3421 = vmatpush3.bf16.msra.mxu0 %v3903_v18 }
  0x99   : > { %3429 = vmatpush3.bf16.msra.mxu1 %v3905_v19  ;;  %3434 = vmatprep.subr.bf16.mxu0 %v3968_v63 }
  0x9a   : > { %3442 = vmatprep.subr.bf16.mxu1 %v3973_v3 }
  0xe3   : > { %v4217_v22 = vpop.f32.mrf.mxu0 }
  0xe4   : > { %v4219_v23 = vpop.f32.mrf.mxu1  ;;  %v1341_v35 = vsel %vm1334_vm1, %v4217_v22, -inf }
  0xe5   : > { %1342 = vmax.xlane.f32.xlu0 %v1341_v35  ;;  %v4223_v39 = vpop.f32.mrf.mxu0  ;;  %v1353_v27 = vsel %vm1334_vm1, %v4219_v23, -inf }
  0xe6   : > { %v4225_v26 = vpop.f32.mrf.mxu1  ;;  %v1335_v31 = vsel %vm1334_vm1, %v4223_v39, -inf }
  0xe7   : > { %v1347_v18 = vsel %vm1334_vm1, %v4225_v26, -inf  ;;  %v4229_v19 = vpop.f32.mrf.mxu0 }
  0xe8   : > { %1348 = vmax.xlane.f32.xlu1 %v1347_v18  ;;  %v1344_v28 = vsel %vm1334_vm1, %v4229_v19, -inf  ;;  %v4235_v30 = vpop.f32.mrf.mxu1 }
  0xe9   : > { %1354 = vmax.xlane.f32.xlu0 %v1353_v27  ;;  %v4239_v34 = vpop.f32.mrf.mxu0  ;;  %v1356_v36 = vsel %vm1334_vm1, %v4235_v30, -inf }
  0xea   : > { %v4243_v37 = vpop.f32.mrf.mxu1  ;;  %v1338_v40 = vsel %vm1334_vm1, %v4239_v34, -inf }
  0xeb   : > { %v1350_v41 = vsel %vm1334_vm1, %v4243_v37, -inf }
  0xec   : > { %1345 = vmax.xlane.f32.xlu1 %v1344_v28 }
  0xed   : > { %1336 = vmax.xlane.f32.xlu0 %v1335_v31 }
  0xf0   : > { %1357 = vmax.xlane.f32.xlu1 %v1356_v36 }
  0xf1   : > { %1339 = vmax.xlane.f32.xlu0 %v1338_v40 }
  0xf3   : > { %v4249_v44 = vpop.f32.mrf.mxu0 }
  0xf4   : > { %v4251_v45 = vpop.f32.mrf.mxu1  ;;  %1351 = vmax.xlane.f32.xlu1 %v1350_v41  ;;  %v1365_v48 = vsel %vm1334_vm1, %v4249_v44, -inf }
  0xf5   : > { %1366 = vmax.xlane.f32.xlu0 %v1365_v48  ;;  %v4255_v49 = vpop.f32.mrf.mxu0  ;;  %v1377_v54 = vsel %vm1334_vm1, %v4251_v45, -inf }
  0xf6   : > { %v4257_v52 = vpop.f32.mrf.mxu1  ;;  %v1359_v59 = vsel %vm1334_vm1, %v4255_v49, -inf }
  0xf7   : > { %v4261_v55 = vpop.f32.mrf.mxu0  ;;  %v1371_v0 = vsel %vm1334_vm1, %v4257_v52, -inf }
  0xf8   : > { %v1368_v56 = vsel %vm1334_vm1, %v4261_v55, -inf  ;;  %v4265_v58 = vpop.f32.mrf.mxu1 }
  0xf9   : > { %1378 = vmax.xlane.f32.xlu0 %v1377_v54  ;;  %1369 = vmax.xlane.f32.xlu1 %v1368_v56  ;;  %v1380_v60 = vsel %vm1334_vm1, %v4265_v58, -inf  ;;  %v4271_v62 = vpop.f32.mrf.mxu0 }
  0xfa   : > { %v1362_v1 = vsel %vm1334_vm1, %v4271_v62, -inf  ;;  %v4277_v6 = vpop.f32.mrf.mxu1 }
  0xfb   : > { %v1374_v14 = vsel %vm1334_vm1, %v4277_v6, -inf }
  0xfd   : > { %1360 = vmax.xlane.f32.xlu0 %v1359_v59  ;;  %1381 = vmax.xlane.f32.xlu1 %v1380_v60 }
 0x101   : > { %1372 = vmax.xlane.f32.xlu0 %v1371_v0  ;;  %1363 = vmax.xlane.f32.xlu1 %v1362_v1 }
 0x103   : > { %v4279_v8 = vpop.f32.mrf.mxu0 }
 0x104   : > { %v4281_v9 = vpop.f32.mrf.mxu1  ;;  %v1389_v16 = vsel %vm1334_vm1, %v4279_v8, -inf }
 0x105   : > { %1375 = vmax.xlane.f32.xlu1 %v1374_v14  ;;  %1390 = vmax.xlane.f32.xlu0 %v1389_v16  ;;  %v4287_v17 = vpop.f32.mrf.mxu0  ;;  %v1401_v18 = vsel %vm1334_vm1, %v4281_v9, -inf }
 0x106   : > { %v4289_v35 = vpop.f32.mrf.mxu1  ;;  %v1383_v36 = vsel %vm1334_vm1, %v4287_v17, -inf }
 0x107   : > { %v4293_v27 = vpop.f32.mrf.mxu0  ;;  %v1395_v48 = vsel %vm1334_vm1, %v4289_v35, -inf }
 0x108   : > { %v1392_v28 = vsel %vm1334_vm1, %v4293_v27, -inf  ;;  %v4297_v31 = vpop.f32.mrf.mxu1 }
 0x109   : > { %1402 = vmax.xlane.f32.xlu0 %v1401_v18  ;;  %1393 = vmax.xlane.f32.xlu1 %v1392_v28  ;;  %v1404_v40 = vsel %vm1334_vm1, %v4297_v31, -inf  ;;  %v4303_v41 = vpop.f32.mrf.mxu0 }
 0x10a   : > { %v1386_v54 = vsel %vm1334_vm1, %v4303_v41, -inf  ;;  %v4309_v56 = vpop.f32.mrf.mxu1 }
 0x10b   : > { %v1398_v0 = vsel %vm1334_vm1, %v4309_v56, -inf }
 0x10d   : > { %1384 = vmax.xlane.f32.xlu0 %v1383_v36  ;;  %1405 = vmax.xlane.f32.xlu1 %v1404_v40 }
 0x111   : > { %1396 = vmax.xlane.f32.xlu0 %v1395_v48  ;;  %1387 = vmax.xlane.f32.xlu1 %v1386_v54 }
 0x113   : > { %v4311_v59 = vpop.f32.mrf.mxu0 }
 0x114   : > { %v4313_v60 = vpop.f32.mrf.mxu1  ;;  %v1413_v1 = vsel %vm1334_vm1, %v4311_v59, -inf }
 0x115   : > { %1399 = vmax.xlane.f32.xlu1 %v1398_v0  ;;  %1414 = vmax.xlane.f32.xlu0 %v1413_v1  ;;  %v4319_v14 = vpop.f32.mrf.mxu0  ;;  %v1425_v18 = vsel %vm1334_vm1, %v4313_v60, -inf }
 0x116   : > { %v4321_v16 = vpop.f32.mrf.mxu1  ;;  %v1407_v48 = vsel %vm1334_vm1, %v4319_v14, -inf }
 0x117   : > { %v4325_v28 = vpop.f32.mrf.mxu0  ;;  %v1419_v1 = vsel %vm1334_vm1, %v4321_v16, -inf }
 0x118   : > { %v1416_v36 = vsel %vm1334_vm1, %v4325_v28, -inf  ;;  %v4329_v40 = vpop.f32.mrf.mxu1 }
 0x119   : > { %1426 = vmax.xlane.f32.xlu0 %v1425_v18  ;;  %1417 = vmax.xlane.f32.xlu1 %v1416_v36  ;;  %v1428_v54 = vsel %vm1334_vm1, %v4329_v40, -inf  ;;  %v4335_v0 = vpop.f32.mrf.mxu0 }
 0x11a   : > { %v1410_v5 = vsel %vm1334_vm1, %v4335_v0, -inf  ;;  %v4341_v4 = vpop.f32.mrf.mxu1 }
 0x11b   : > { %v1422_v21 = vsel %vm1334_vm1, %v4341_v4, -inf }
 0x11d   : > { %1408 = vmax.xlane.f32.xlu0 %v1407_v48  ;;  %1429 = vmax.xlane.f32.xlu1 %v1428_v54 }
 0x121   : > { %1420 = vmax.xlane.f32.xlu0 %v1419_v1  ;;  %1411 = vmax.xlane.f32.xlu1 %v1410_v5 }
 0x123   : > { %v4343_v18 = vpop.f32.mrf.mxu0 }
 0x124   : > { %v4345_v36 = vpop.f32.mrf.mxu1  ;;  %v1437_v48 = vsel %vm1334_vm1, %v4343_v18, -inf }
 0x125   : > { %1423 = vmax.xlane.f32.xlu1 %v1422_v21  ;;  %1438 = vmax.xlane.f32.xlu0 %v1437_v48  ;;  %v4351_v54 = vpop.f32.mrf.mxu0  ;;  %v1449_v1 = vsel %vm1334_vm1, %v4345_v36, -inf }
 0x126   : > { %v4353_v20 = vpop.f32.mrf.mxu1  ;;  %v1431_v21 = vsel %vm1334_vm1, %v4351_v54, -inf }
 0x127   : > { %v4357_v5 = vpop.f32.mrf.mxu0  ;;  %v1443_v53 = vsel %vm1334_vm1, %v4353_v20, -inf }
 0x128   : > { %v1440_v25 = vsel %vm1334_vm1, %v4357_v5, -inf  ;;  %v4361_v24 = vpop.f32.mrf.mxu1 }
 0x129   : > { %1450 = vmax.xlane.f32.xlu0 %v1449_v1  ;;  %1441 = vmax.xlane.f32.xlu1 %v1440_v25  ;;  %v1452_v48 = vsel %vm1334_vm1, %v4361_v24, -inf  ;;  %v4367_v57 = vpop.f32.mrf.mxu0 }
 0x12a   : > { %v1434_v51 = vsel %vm1334_vm1, %v4367_v57, -inf  ;;  %v4373_v50 = vpop.f32.mrf.mxu1 }
 0x12b   : > { %v1446_v15 = vsel %vm1334_vm1, %v4373_v50, -inf }
 0x12d   : > { %1432 = vmax.xlane.f32.xlu0 %v1431_v21  ;;  %1453 = vmax.xlane.f32.xlu1 %v1452_v48 }
 0x131   : > { %1444 = vmax.xlane.f32.xlu0 %v1443_v53  ;;  %1435 = vmax.xlane.f32.xlu1 %v1434_v51 }
 0x133   : > { %v4375_v25 = vpop.f32.mrf.mxu0 }
 0x134   : > { %v4377_v1 = vpop.f32.mrf.mxu1  ;;  %v1461_v21 = vsel %vm1334_vm1, %v4375_v25, -inf }
 0x135   : > { %1447 = vmax.xlane.f32.xlu1 %v1446_v15  ;;  %1462 = vmax.xlane.f32.xlu0 %v1461_v21  ;;  %v4383_v48 = vpop.f32.mrf.mxu0  ;;  %v1473_v53 = vsel %vm1334_vm1, %v4377_v1, -inf }
 0x136   : > { %v4385_v7 = vpop.f32.mrf.mxu1  ;;  %v1455_v15 = vsel %vm1334_vm1, %v4383_v48, -inf }
 0x137   : > { %v4389_v51 = vpop.f32.mrf.mxu0  ;;  %v1467_v32 = vsel %vm1334_vm1, %v4385_v7, -inf }
 0x138   : > { %v1464_v13 = vsel %vm1334_vm1, %v4389_v51, -inf  ;;  %v4393_v12 = vpop.f32.mrf.mxu1 }
 0x139   : > { %1474 = vmax.xlane.f32.xlu0 %v1473_v53  ;;  %1465 = vmax.xlane.f32.xlu1 %v1464_v13  ;;  %v1476_v21 = vsel %vm1334_vm1, %v4393_v12, -inf  ;;  %v4399_v38 = vpop.f32.mrf.mxu0 }
 0x13a   : > { %v1458_v43 = vsel %vm1334_vm1, %v4399_v38, -inf  ;;  %v4405_v42 = vpop.f32.mrf.mxu1 }
 0x13b   : > { %v1470_v2 = vsel %vm1334_vm1, %v4405_v42, -inf }
 0x13d   : > { %1456 = vmax.xlane.f32.xlu0 %v1455_v15  ;;  %1477 = vmax.xlane.f32.xlu1 %v1476_v21 }
 0x141   : > { %1468 = vmax.xlane.f32.xlu0 %v1467_v32  ;;  %1459 = vmax.xlane.f32.xlu1 %v1458_v43 }
 0x143   : > { %v4407_v13 = vpop.f32.mrf.mxu0 }
 0x144   : > { %v4409_v53 = vpop.f32.mrf.mxu1  ;;  %v1485_v15 = vsel %vm1334_vm1, %v4407_v13, -inf }
 0x145   : > { %5201 = vst [vmem:[#allocation30_spill] sm:$0xff] %v4409_v53  ;;  %1471 = vmax.xlane.f32.xlu1 %v1470_v2  ;;  %1486 = vmax.xlane.f32.xlu0 %v1485_v15  ;;  %v4415_v21 = vpop.f32.mrf.mxu0  ;;  %v1497_v32 = vsel %vm1334_vm1, %v4409_v53, -inf }
 0x146   : > { %5202 = vst [vmem:[#allocation31_spill] sm:$0xff] %v4415_v21  ;;  %v4417_v61 = vpop.f32.mrf.mxu1  ;;  %v1479_v2 = vsel %vm1334_vm1, %v4415_v21, -inf }
 0x147   : > { %5203 = vst [vmem:[#allocation32_spill] sm:$0xff] %v4417_v61  ;;  %v4421_v43 = vpop.f32.mrf.mxu0  ;;  %v1491_v29 = vsel %vm1334_vm1, %v4417_v61, -inf }
 0x148   : > { %5204 = vst [vmem:[#allocation33_spill] sm:$0xff] %v4421_v43  ;;  %v1488_v11 = vsel %vm1334_vm1, %v4421_v43, -inf  ;;  %v4425_v10 = vpop.f32.mrf.mxu1 }
 0x149   : > { %5205 = vst [vmem:[#allocation34_spill] sm:$0xff] %v4425_v10  ;;  %1498 = vmax.xlane.f32.xlu0 %v1497_v32  ;;  %1489 = vmax.xlane.f32.xlu1 %v1488_v11  ;;  %v1500_v15 = vsel %vm1334_vm1, %v4425_v10, -inf  ;;  %v4431_v33 = vpop.f32.mrf.mxu0 }
 0x14a   : > { %5206 = vst [vmem:[#allocation35_spill] sm:$0xff] %v4431_v33  ;;  %v1482_v47 = vsel %vm1334_vm1, %v4431_v33, -inf  ;;  %v4437_v3 = vpop.f32.mrf.mxu1 }
 0x14b   : > { %5207 = vst [vmem:[#allocation36_spill] sm:$0xff] %v4437_v3  ;;  %v1494_v46 = vsel %vm1334_vm1, %v4437_v3, -inf }
 0x14d   : > { %1480 = vmax.xlane.f32.xlu0 %v1479_v2  ;;  %1501 = vmax.xlane.f32.xlu1 %v1500_v15 }
 0x151   : > { %1492 = vmax.xlane.f32.xlu0 %v1491_v29  ;;  %1483 = vmax.xlane.f32.xlu1 %v1482_v47 }
 0x153   : > { %v4439_v11 = vpop.f32.mrf.mxu0 }
 0x154   : > { %5208 = vst [vmem:[#allocation37_spill] sm:$0xff] %v4439_v11  ;;  %v4441_v32 = vpop.f32.mrf.mxu1  ;;  %v1509_v2 = vsel %vm1334_vm1, %v4439_v11, -inf }
 0x155   : > { %5209 = vst [vmem:[#allocation38_spill] sm:$0xff] %v4441_v32  ;;  %1495 = vmax.xlane.f32.xlu1 %v1494_v46  ;;  %1510 = vmax.xlane.f32.xlu0 %v1509_v2  ;;  %v4447_v15 = vpop.f32.mrf.mxu0  ;;  %v1521_v29 = vsel %vm1334_vm1, %v4441_v32, -inf }
 0x156   : > { %5210 = vst [vmem:[#allocation39_spill] sm:$0xff] %v4447_v15  ;;  %v4449_v63 = vpop.f32.mrf.mxu1  ;;  %v1503_v46 = vsel %vm1334_vm1, %v4447_v15, -inf }
 0x157   : > { %5211 = vst [vmem:[#allocation40_spill] sm:$0xff] %v4449_v63  ;;  %v4453_v47 = vpop.f32.mrf.mxu0  ;;  %v1515_v32 = vsel %vm1334_vm1, %v4449_v63, -inf }
 0x158   : > { %5212 = vst [vmem:[#allocation41_spill] sm:$0xff] %v4453_v47  ;;  %v1512_v33 = vsel %vm1334_vm1, %v4453_v47, -inf  ;;  %v4457_v61 = vpop.f32.mrf.mxu1 }
 0x159   : > { %5213 = vst [vmem:[#allocation42_spill] sm:$0xff] %v4457_v61  ;;  %1522 = vmax.xlane.f32.xlu0 %v1521_v29  ;;  %1513 = vmax.xlane.f32.xlu1 %v1512_v33  ;;  %v1524_v2 = vsel %vm1334_vm1, %v4457_v61, -inf  ;;  %v4463_v11 = vpop.f32.mrf.mxu0 }
 0x15a   : > { %5214 = vst [vmem:[#allocation43_spill] sm:$0xff] %v4463_v11  ;;  %v1506_v47 = vsel %vm1334_vm1, %v4463_v11, -inf  ;;  %v4469_v3 = vpop.f32.mrf.mxu1 }
 0x15b   : > { %5215 = vst [vmem:[#allocation44_spill] sm:$0xff] %v4469_v3  ;;  %v1518_v33 = vsel %vm1334_vm1, %v4469_v3, -inf }
 0x15d   : > { %1504 = vmax.xlane.f32.xlu0 %v1503_v46  ;;  %1525 = vmax.xlane.f32.xlu1 %v1524_v2 }
 0x161   : > { %1516 = vmax.xlane.f32.xlu0 %v1515_v32  ;;  %1507 = vmax.xlane.f32.xlu1 %v1506_v47 }
 0x165   : > { %1519 = vmax.xlane.f32.xlu1 %v1518_v33 }
 0x16e   : > { %v1343_v29 = vpop.xlane.xlu0 %1342 }
 0x16f   : > { %v1529_v61 = vsub.f32 %v4217_v22, %v1343_v29 }
 0x171   : > { %v1595_v15 = vmul.f32 1.442695, %v1529_v61  ;;  %v1349_v46 = vpop.xlane.xlu1 %1348 }
 0x172   : > { %v1355_v2 = vpop.xlane.xlu0 %1354  ;;  %v1531_v10 = vsub.f32 %v4225_v26, %v1349_v46 }
 0x173   : > { %3586 = vpow2.f32 %v1595_v15  ;;  %v1533_v63 = vsub.f32 %v4219_v23, %v1355_v2 }
 0x174   : > { %v1599_v43 = vmul.f32 1.442695, %v1531_v10 }
 0x175   : > { %v1603_v11 = vmul.f32 1.442695, %v1533_v63  ;;  %v1346_v21 = vpop.xlane.xlu1 %1345 }
 0x176   : > { %v1530_v32 = vsub.f32 %v4229_v19, %v1346_v21  ;;  %v1337_v47 = vpop.xlane.xlu0 %1336 }
 0x177   : > { %3588 = vpow2.f32 %v1603_v11  ;;  %v1527_v3 = vsub.f32 %v4223_v39, %v1337_v47 }
 0x178   : > { %v1597_v33 = vmul.f32 1.442695, %v1530_v32 }
 0x179   : > { %v1591_v53 = vmul.f32 1.442695, %v1527_v3  ;;  %v1358_v22 = vpop.xlane.xlu1 %1357 }
 0x17a   : > { %3590 = vpow2.f32 %v1597_v33  ;;  %v1534_v61 = vsub.f32 %v4235_v30, %v1358_v22  ;;  %v1340_v15 = vpop.xlane.xlu0 %1339 }
 0x17b   : > { %3592 = vpow2.f32 %v1591_v53  ;;  %v1528_v23 = vsub.f32 %v4239_v34, %v1340_v15 }
 0x17c   : > { %v1605_v26 = vmul.f32 1.442695, %v1534_v61  ;;  %3594 = vpow2.f32 %v1599_v43 }
 0x17d   : > { %v1593_v63 = vmul.f32 1.442695, %v1528_v23  ;;  %v1352_v29 = vpop.xlane.xlu1 %1351 }
 0x17e   : > { %3596 = vpow2.f32 %v1605_v26  ;;  %v1532_v19 = vsub.f32 %v4243_v37, %v1352_v29  ;;  %v1367_v21 = vpop.xlane.xlu0 %1366 }
 0x17f   : > { %v1537_v39 = vsub.f32 %v4249_v44, %v1367_v21  ;;  %3598 = vpow2.f32 %v1593_v63 }
 0x180   : > { %v4482_v10 = vpop.eup %3586  ;;  %v1601_v3 = vmul.f32 1.442695, %v1532_v19 }
 0x181   : > { %v1611_v11 = vmul.f32 1.442695, %v1537_v39  ;;  %v1725_v30 = vsel %vm1334_vm1, %v4482_v10, 0.0 }
 0x182   : > { %v1379_v53 = vpop.xlane.xlu0 %1378  ;;  %v1370_v34 = vpop.xlane.xlu1 %1369  ;;  %1726 = vadd.xlane.f32.xlu0 %v1725_v30 }
 0x183   : > { %3600 = vpow2.f32 %v1611_v11  ;;  %v1541_v43 = vsub.f32 %v4251_v45, %v1379_v53  ;;  %v1538_v46 = vsub.f32 %v4261_v55, %v1370_v34 }
 0x184   : > { %v4488_v37 = vpop.eup %3588  ;;  %3602 = vpow2.f32 %v1601_v3 }
 0x185   : > { %v1619_v44 = vmul.f32 1.442695, %v1541_v43  ;;  %v1613_v2 = vmul.f32 1.442695, %v1538_v46  ;;  %v1737_v32 = vsel %vm1334_vm1, %v4488_v37, 0.0 }
 0x186   : > { %v1361_v47 = vpop.xlane.xlu0 %1360  ;;  %v1382_v33 = vpop.xlane.xlu1 %1381  ;;  %1738 = vadd.xlane.f32.xlu0 %v1737_v32 }
 0x187   : > { %v4492_v22 = vpop.eup %3590  ;;  %3604 = vpow2.f32 %v1619_v44  ;;  %v1535_v61 = vsub.f32 %v4255_v49, %v1361_v47  ;;  %v1542_v45 = vsub.f32 %v4265_v58, %v1382_v33 }
 0x188   : > { %v4496_v15 = vpop.eup %3592  ;;  %3606 = vpow2.f32 %v1613_v2  ;;  %v1728_v55 = vsel %vm1334_vm1, %v4492_v22, 0.0 }
 0x189   : > { %v1607_v23 = vmul.f32 1.442695, %v1535_v61  ;;  %v1621_v26 = vmul.f32 1.442695, %v1542_v45  ;;  %1729 = vadd.xlane.f32.xlu1 %v1728_v55  ;;  %v1719_v63 = vsel %vm1334_vm1, %v4496_v15, 0.0  ;;  %v4502_v29 = vpop.eup %3594 }
 0x18a   : > { %v1373_v19 = vpop.xlane.xlu0 %1372  ;;  %v1364_v21 = vpop.xlane.xlu1 %1363  ;;  %1720 = vadd.xlane.f32.xlu0 %v1719_v63  ;;  %v1731_v34 = vsel %vm1334_vm1, %v4502_v29, 0.0 }
 0x18b   : > { %v4504_v49 = vpop.eup %3596  ;;  %3608 = vpow2.f32 %v1607_v23  ;;  %v1539_v58 = vsub.f32 %v4257_v52, %v1373_v19  ;;  %v1536_v39 = vsub.f32 %v4271_v62, %v1364_v21 }
 0x18c   : > { %3610 = vpow2.f32 %v1621_v26  ;;  %v1740_v3 = vsel %vm1334_vm1, %v4504_v49, 0.0  ;;  %v4510_v11 = vpop.eup %3598 }
 0x18d   : > { %v1615_v30 = vmul.f32 1.442695, %v1539_v58  ;;  %v1609_v53 = vmul.f32 1.442695, %v1536_v39  ;;  %1741 = vadd.xlane.f32.xlu1 %v1740_v3  ;;  %v1722_v2 = vsel %vm1334_vm1, %v4510_v11, 0.0 }
 0x18e   : > { %v1376_v43 = vpop.xlane.xlu1 %1375  ;;  %v1391_v46 = vpop.xlane.xlu0 %1390  ;;  %1732 = vadd.xlane.f32.xlu0 %v1731_v34 }
 0x18f   : > { %3612 = vpow2.f32 %v1615_v30  ;;  %v1540_v52 = vsub.f32 %v4277_v6, %v1376_v43  ;;  %v1545_v62 = vsub.f32 %v4279_v8, %v1391_v46 }
 0x190   : > { %v4516_v44 = vpop.eup %3600  ;;  %3614 = vpow2.f32 %v1609_v53 }
 0x191   : > { %v4520_v32 = vpop.eup %3602  ;;  %v1617_v47 = vmul.f32 1.442695, %v1540_v52  ;;  %v1627_v33 = vmul.f32 1.442695, %v1545_v62  ;;  %1723 = vadd.xlane.f32.xlu1 %v1722_v2  ;;  %v1749_v61 = vsel %vm1334_vm1, %v4516_v44, 0.0 }
 0x192   : > { %v1403_v45 = vpop.xlane.xlu0 %1402  ;;  %v1394_v55 = vpop.xlane.xlu1 %1393  ;;  %1750 = vadd.xlane.f32.xlu0 %v1749_v61  ;;  %v1734_v26 = vsel %vm1334_vm1, %v4520_v32, 0.0 }
 0x193   : > { %3616 = vpow2.f32 %v1617_v47  ;;  %v1549_v6 = vsub.f32 %v4281_v9, %v1403_v45  ;;  %v1546_v8 = vsub.f32 %v4293_v27, %v1394_v55 }
 0x194   : > { %v4526_v23 = vpop.eup %3604  ;;  %3618 = vpow2.f32 %v1627_v33 }
 0x195   : > { %v4530_v63 = vpop.eup %3606  ;;  %v1635_v19 = vmul.f32 1.442695, %v1549_v6  ;;  %v1629_v21 = vmul.f32 1.442695, %v1546_v8  ;;  %1735 = vadd.xlane.f32.xlu1 %v1734_v26  ;;  %v1761_v58 = vsel %vm1334_vm1, %v4526_v23, 0.0 }
 0x196   : > { %v1385_v39 = vpop.xlane.xlu0 %1384  ;;  %v1406_v3 = vpop.xlane.xlu1 %1405  ;;  %1762 = vadd.xlane.f32.xlu0 %v1761_v58  ;;  %v1752_v53 = vsel %vm1334_vm1, %v4530_v63, 0.0 }
 0x197   : > { %3620 = vpow2.f32 %v1635_v19  ;;  %v1543_v9 = vsub.f32 %v4287_v17, %v1385_v39  ;;  %v1550_v27 = vsub.f32 %v4297_v31, %v1406_v3 }
 0x198   : > { %v4536_v30 = vpop.eup %3608  ;;  %3622 = vpow2.f32 %v1629_v21 }
 0x199   : > { %v4540_v34 = vpop.eup %3610  ;;  %v1623_v43 = vmul.f32 1.442695, %v1543_v9  ;;  %v1637_v46 = vmul.f32 1.442695, %v1550_v27  ;;  %1753 = vadd.xlane.f32.xlu1 %v1752_v53  ;;  %v1743_v52 = vsel %vm1334_vm1, %v4536_v30, 0.0 }
 0x19a   : > { %v1397_v62 = vpop.xlane.xlu0 %1396  ;;  %v1388_v2 = vpop.xlane.xlu1 %1387  ;;  %1744 = vadd.xlane.f32.xlu0 %v1743_v52  ;;  %v1764_v33 = vsel %vm1334_vm1, %v4540_v34, 0.0 }
 0x19b   : > { %3624 = vpow2.f32 %v1623_v43  ;;  %v1547_v17 = vsub.f32 %v4289_v35, %v1397_v62  ;;  %v1544_v31 = vsub.f32 %v4303_v41, %v1388_v2 }
 0x19c   : > { %v4546_v47 = vpop.eup %3612  ;;  %3626 = vpow2.f32 %v1637_v46 }
 0x19d   : > { %v4550_v61 = vpop.eup %3614  ;;  %v1631_v45 = vmul.f32 1.442695, %v1547_v17  ;;  %v1625_v55 = vmul.f32 1.442695, %v1544_v31  ;;  %1765 = vadd.xlane.f32.xlu1 %v1764_v33  ;;  %v1755_v6 = vsel %vm1334_vm1, %v4546_v47, 0.0 }
 0x19e   : > { %v1400_v8 = vpop.xlane.xlu1 %1399  ;;  %v1415_v26 = vpop.xlane.xlu0 %1414  ;;  %1756 = vadd.xlane.f32.xlu0 %v1755_v6  ;;  %v1746_v21 = vsel %vm1334_vm1, %v4550_v61, 0.0 }
 0x19f   : > { %3628 = vpow2.f32 %v1631_v45  ;;  %v1548_v35 = vsub.f32 %v4309_v56, %v1400_v8  ;;  %v1553_v41 = vsub.f32 %v4311_v59, %v1415_v26 }
 0x1a0   : > { %v4556_v19 = vpop.eup %3616  ;;  %3630 = vpow2.f32 %v1625_v55 }
 0x1a1   : > { %v4560_v58 = vpop.eup %3618  ;;  %v1633_v39 = vmul.f32 1.442695, %v1548_v35  ;;  %v1643_v3 = vmul.f32 1.442695, %v1553_v41  ;;  %1747 = vadd.xlane.f32.xlu1 %v1746_v21  ;;  %v1758_v46 = vsel %vm1334_vm1, %v4556_v19, 0.0 }
 0x1a2   : > { %v1427_v9 = vpop.xlane.xlu0 %1426  ;;  %v1418_v27 = vpop.xlane.xlu1 %1417  ;;  %v1773_v53 = vsel %vm1334_vm1, %v4560_v58, 0.0 }
 0x1a3   : > { %3632 = vpow2.f32 %v1633_v39  ;;  %v1557_v56 = vsub.f32 %v4313_v60, %v1427_v9  ;;  %v1554_v59 = vsub.f32 %v4325_v28, %v1418_v27  ;;  %1774 = vadd.xlane.f32.xlu0 %v1773_v53 }
 0x1a4   : > { %v4566_v43 = vpop.eup %3620  ;;  %3634 = vpow2.f32 %v1643_v3 }
 0x1a5   : > { %v4570_v52 = vpop.eup %3622  ;;  %v1651_v62 = vmul.f32 1.442695, %v1557_v56  ;;  %v1645_v2 = vmul.f32 1.442695, %v1554_v59  ;;  %1759 = vadd.xlane.f32.xlu1 %v1758_v46  ;;  %v1785_v17 = vsel %vm1334_vm1, %v4566_v43, 0.0 }
 0x1a6   : > { %v1409_v31 = vpop.xlane.xlu0 %1408  ;;  %v1430_v33 = vpop.xlane.xlu1 %1429  ;;  %v1776_v55 = vsel %vm1334_vm1, %v4570_v52, 0.0 }
 0x1a7   : > { %3636 = vpow2.f32 %v1651_v62  ;;  %v1551_v60 = vsub.f32 %v4319_v14, %v1409_v31  ;;  %v1558_v28 = vsub.f32 %v4329_v40, %v1430_v33  ;;  %1786 = vadd.xlane.f32.xlu0 %v1785_v17 }
 0x1a8   : > { %v4576_v45 = vpop.eup %3624  ;;  %3638 = vpow2.f32 %v1645_v2 }
 0x1a9   : > { %v4580_v6 = vpop.eup %3626  ;;  %v1639_v8 = vmul.f32 1.442695, %v1551_v60  ;;  %v1653_v26 = vmul.f32 1.442695, %v1558_v28  ;;  %1777 = vadd.xlane.f32.xlu1 %v1776_v55  ;;  %v1767_v35 = vsel %vm1334_vm1, %v4576_v45, 0.0 }
 0x1aa   : > { %v1421_v41 = vpop.xlane.xlu0 %1420  ;;  %v1412_v21 = vpop.xlane.xlu1 %1411  ;;  %v1788_v3 = vsel %vm1334_vm1, %v4580_v6, 0.0 }
 0x1ab   : > { %3640 = vpow2.f32 %v1639_v8  ;;  %v1555_v14 = vsub.f32 %v4321_v16, %v1421_v41  ;;  %v1552_v40 = vsub.f32 %v4335_v0, %v1412_v21  ;;  %1768 = vadd.xlane.f32.xlu0 %v1767_v35 }
 0x1ac   : > { %v4586_v39 = vpop.eup %3628  ;;  %3642 = vpow2.f32 %v1653_v26 }
 0x1ad   : > { %v4590_v9 = vpop.eup %3630  ;;  %v1647_v27 = vmul.f32 1.442695, %v1555_v14  ;;  %v1641_v53 = vmul.f32 1.442695, %v1552_v40  ;;  %1789 = vadd.xlane.f32.xlu1 %v1788_v3  ;;  %v1779_v56 = vsel %vm1334_vm1, %v4586_v39, 0.0 }
 0x1ae   : > { %v1424_v59 = vpop.xlane.xlu1 %1423  ;;  %v1439_v46 = vpop.xlane.xlu0 %1438  ;;  %v1770_v2 = vsel %vm1334_vm1, %v4590_v9, 0.0 }
 0x1af   : > { %3644 = vpow2.f32 %v1647_v27  ;;  %v1556_v16 = vsub.f32 %v4341_v4, %v1424_v59  ;;  %v1561_v0 = vsub.f32 %v4343_v18, %v1439_v46  ;;  %1780 = vadd.xlane.f32.xlu0 %v1779_v56 }
 0x1b0   : > { %v4596_v62 = vpop.eup %3632  ;;  %3646 = vpow2.f32 %v1641_v53 }
 0x1b1   : > { %v4600_v17 = vpop.eup %3634  ;;  %v1649_v31 = vmul.f32 1.442695, %v1556_v16  ;;  %v1659_v33 = vmul.f32 1.442695, %v1561_v0  ;;  %1771 = vadd.xlane.f32.xlu1 %v1770_v2  ;;  %v1782_v26 = vsel %vm1334_vm1, %v4596_v62, 0.0 }
 0x1b2   : > { %v1451_v60 = vpop.xlane.xlu0 %1450  ;;  %v1442_v28 = vpop.xlane.xlu1 %1441  ;;  %v1797_v55 = vsel %vm1334_vm1, %v4600_v17, 0.0 }
 0x1b3   : > { %3648 = vpow2.f32 %v1649_v31  ;;  %v1565_v4 = vsub.f32 %v4345_v36, %v1451_v60  ;;  %v1562_v18 = vsub.f32 %v4357_v5, %v1442_v28  ;;  %1798 = vadd.xlane.f32.xlu0 %v1797_v55 }
 0x1b4   : > { %v4606_v8 = vpop.eup %3636  ;;  %3650 = vpow2.f32 %v1659_v33 }
 0x1b5   : > { %v4610_v35 = vpop.eup %3638  ;;  %v1667_v41 = vmul.f32 1.442695, %v1565_v4  ;;  %v1661_v21 = vmul.f32 1.442695, %v1562_v18  ;;  %1783 = vadd.xlane.f32.xlu1 %v1782_v26  ;;  %v1809_v14 = vsel %vm1334_vm1, %v4606_v8, 0.0 }
 0x1b6   : > { %v1433_v40 = vpop.xlane.xlu0 %1432  ;;  %v1454_v3 = vpop.xlane.xlu1 %1453  ;;  %v1800_v53 = vsel %vm1334_vm1, %v4610_v35, 0.0 }
 0x1b7   : > { %3652 = vpow2.f32 %v1667_v41  ;;  %v1559_v36 = vsub.f32 %v4351_v54, %v1433_v40  ;;  %v1566_v5 = vsub.f32 %v4361_v24, %v1454_v3  ;;  %1810 = vadd.xlane.f32.xlu0 %v1809_v14 }
 0x1b8   : > { %v4616_v27 = vpop.eup %3640  ;;  %3654 = vpow2.f32 %v1661_v21 }
 0x1b9   : > { %v4620_v56 = vpop.eup %3642  ;;  %v1655_v59 = vmul.f32 1.442695, %v1559_v36  ;;  %v1669_v46 = vmul.f32 1.442695, %v1566_v5  ;;  %1801 = vadd.xlane.f32.xlu1 %v1800_v53  ;;  %v1791_v16 = vsel %vm1334_vm1, %v4616_v27, 0.0 }
 0x1ba   : > { %v1445_v0 = vpop.xlane.xlu0 %1444  ;;  %v1436_v2 = vpop.xlane.xlu1 %1435  ;;  %v1812_v33 = vsel %vm1334_vm1, %v4620_v56, 0.0 }
 0x1bb   : > { %3656 = vpow2.f32 %v1655_v59  ;;  %v1563_v24 = vsub.f32 %v4353_v20, %v1445_v0  ;;  %v1560_v54 = vsub.f32 %v4367_v57, %v1436_v2  ;;  %1792 = vadd.xlane.f32.xlu0 %v1791_v16 }
 0x1bc   : > { %v4626_v31 = vpop.eup %3644  ;;  %3658 = vpow2.f32 %v1669_v46 }
 0x1bd   : > { %v4630_v60 = vpop.eup %3646  ;;  %v1663_v28 = vmul.f32 1.442695, %v1563_v24  ;;  %v1657_v55 = vmul.f32 1.442695, %v1560_v54  ;;  %1813 = vadd.xlane.f32.xlu1 %v1812_v33  ;;  %v1803_v4 = vsel %vm1334_vm1, %v4626_v31, 0.0 }
 0x1be   : > { %v1448_v18 = vpop.xlane.xlu1 %1447  ;;  %v1463_v26 = vpop.xlane.xlu0 %1462  ;;  %v1794_v21 = vsel %vm1334_vm1, %v4630_v60, 0.0 }
 0x1bf   : > { %3660 = vpow2.f32 %v1663_v28  ;;  %v1564_v57 = vsub.f32 %v4373_v50, %v1448_v18  ;;  %v1569_v20 = vsub.f32 %v4375_v25, %v1463_v26  ;;  %1804 = vadd.xlane.f32.xlu0 %v1803_v4 }
 0x1c0   : > { %v4636_v41 = vpop.eup %3648  ;;  %3662 = vpow2.f32 %v1657_v55 }
 0x1c1   : > { %v4640_v14 = vpop.eup %3650  ;;  %v1665_v40 = vmul.f32 1.442695, %v1564_v57  ;;  %v1675_v3 = vmul.f32 1.442695, %v1569_v20  ;;  %1795 = vadd.xlane.f32.xlu1 %v1794_v21  ;;  %v1806_v46 = vsel %vm1334_vm1, %v4636_v41, 0.0 }
 0x1c2   : > { %v1475_v36 = vpop.xlane.xlu0 %1474  ;;  %v1466_v5 = vpop.xlane.xlu1 %1465  ;;  %v1821_v53 = vsel %vm1334_vm1, %v4640_v14, 0.0 }
 0x1c3   : > { %3664 = vpow2.f32 %v1665_v40  ;;  %v1573_v50 = vsub.f32 %v4377_v1, %v1475_v36  ;;  %v1570_v25 = vsub.f32 %v4389_v51, %v1466_v5  ;;  %1822 = vadd.xlane.f32.xlu0 %v1821_v53 }
 0x1c4   : > { %v4646_v59 = vpop.eup %3652  ;;  %3666 = vpow2.f32 %v1675_v3 }
 0x1c5   : > { %v4650_v16 = vpop.eup %3654  ;;  %v1683_v0 = vmul.f32 1.442695, %v1573_v50  ;;  %v1677_v2 = vmul.f32 1.442695, %v1570_v25  ;;  %1807 = vadd.xlane.f32.xlu1 %v1806_v46  ;;  %v1833_v24 = vsel %vm1334_vm1, %v4646_v59, 0.0 }
 0x1c6   : > { %v1457_v54 = vpop.xlane.xlu0 %1456  ;;  %v1478_v33 = vpop.xlane.xlu1 %1477  ;;  %v1824_v55 = vsel %vm1334_vm1, %v4650_v16, 0.0 }
 0x1c7   : > { %3668 = vpow2.f32 %v1683_v0  ;;  %v1567_v1 = vsub.f32 %v4383_v48, %v1457_v54  ;;  %v1574_v51 = vsub.f32 %v4393_v12, %v1478_v33  ;;  %1834 = vadd.xlane.f32.xlu0 %v1833_v24 }
 0x1c8   : > { %v4656_v28 = vpop.eup %3656  ;;  %3670 = vpow2.f32 %v1677_v2 }
 0x1c9   : > { %v4660_v4 = vpop.eup %3658  ;;  %v1671_v18 = vmul.f32 1.442695, %v1567_v1  ;;  %v1685_v26 = vmul.f32 1.442695, %v1574_v51  ;;  %1825 = vadd.xlane.f32.xlu1 %v1824_v55  ;;  %v1815_v57 = vsel %vm1334_vm1, %v4656_v28, 0.0 }
 0x1ca   : > { %v1469_v20 = vpop.xlane.xlu0 %1468  ;;  %v1460_v21 = vpop.xlane.xlu1 %1459  ;;  %v1836_v3 = vsel %vm1334_vm1, %v4660_v4, 0.0 }
 0x1cb   : > { %3672 = vpow2.f32 %v1671_v18  ;;  %v1571_v12 = vsub.f32 %v4385_v7, %v1469_v20  ;;  %v1568_v48 = vsub.f32 %v4399_v38, %v1460_v21  ;;  %1816 = vadd.xlane.f32.xlu0 %v1815_v57  ;;  %v5218_v18 = vld [vmem:[#allocation33_spill] sm:$0xff] }
 0x1cc   : > { %v4666_v40 = vpop.eup %3660  ;;  %3674 = vpow2.f32 %v1685_v26 }
 0x1cd   : > { %v4670_v36 = vpop.eup %3662  ;;  %v1679_v5 = vmul.f32 1.442695, %v1571_v12  ;;  %v1673_v53 = vmul.f32 1.442695, %v1568_v48  ;;  %1837 = vadd.xlane.f32.xlu1 %v1836_v3  ;;  %v1827_v50 = vsel %vm1334_vm1, %v4666_v40, 0.0 }
 0x1ce   : > { %v1472_v25 = vpop.xlane.xlu1 %1471  ;;  %v1487_v46 = vpop.xlane.xlu0 %1486  ;;  %v1818_v2 = vsel %vm1334_vm1, %v4670_v36, 0.0 }
 0x1cf   : > { %3676 = vpow2.f32 %v1679_v5  ;;  %v1572_v38 = vsub.f32 %v4405_v42, %v1472_v25  ;;  %v1577_v7 = vsub.f32 %v4407_v13, %v1487_v46  ;;  %1828 = vadd.xlane.f32.xlu0 %v1827_v50  ;;  %v5217_v42 = vld [vmem:[#allocation30_spill] sm:$0xff]  ;;  %v5220_v50 = vld [vmem:[#allocation31_spill] sm:$0xff] }
 0x1d0   : > { %v4676_v0 = vpop.eup %3664  ;;  %3678 = vpow2.f32 %v1673_v53  ;;  %v5221_v46 = vld [vmem:[#allocation34_spill] sm:$0xff] }
 0x1d1   : > { %v4680_v24 = vpop.eup %3666  ;;  %v1681_v54 = vmul.f32 1.442695, %v1572_v38  ;;  %v1691_v33 = vmul.f32 1.442695, %v1577_v7  ;;  %1819 = vadd.xlane.f32.xlu1 %v1818_v2  ;;  %v1830_v20 = vsel %vm1334_vm1, %v4676_v0, 0.0 }
 0x1d2   : > { %5216 = vst [vmem:[#allocation45_spill] sm:$0xff] %v4680_v24  ;;  %v1499_v1 = vpop.xlane.xlu0 %1498  ;;  %v1490_v51 = vpop.xlane.xlu1 %1489  ;;  %v1845_v55 = vsel %vm1334_vm1, %v4680_v24, 0.0 }
 0x1d3   : > { %3680 = vpow2.f32 %v1681_v54  ;;  %v1581_v13 = vsub.f32 %v5217_v42, %v1499_v1  ;;  %v1578_v26 = vsub.f32 %v5218_v18, %v1490_v51  ;;  %1846 = vadd.xlane.f32.xlu0 %v1845_v55 }
 0x1d4   : > { %v4686_v57 = vpop.eup %3668  ;;  %3682 = vpow2.f32 %v1691_v33 }
 0x1d5   : > { %5219 = vst [vmem:[#allocation30_spill] sm:$0xff] %v4686_v57  ;;  %v4690_v21 = vpop.eup %3670  ;;  %v1699_v12 = vmul.f32 1.442695, %v1581_v13  ;;  %v1693_v48 = vmul.f32 1.442695, %v1578_v26  ;;  %1831 = vadd.xlane.f32.xlu1 %v1830_v20  ;;  %v1857_v3 = vsel %vm1334_vm1, %v4686_v57, 0.0 }
 0x1d6   : > { %v1481_v5 = vpop.xlane.xlu0 %1480  ;;  %v1502_v53 = vpop.xlane.xlu1 %1501  ;;  %v1848_v2 = vsel %vm1334_vm1, %v4690_v21, 0.0  ;;  %v5223_v13 = vld [vmem:[#allocation32_spill] sm:$0xff]  ;;  %v5224_v26 = vld [vmem:[#allocation35_spill] sm:$0xff] }
 0x1d7   : > { %3684 = vpow2.f32 %v1699_v12  ;;  %v1575_v25 = vsub.f32 %v5220_v50, %v1481_v5  ;;  %v1582_v38 = vsub.f32 %v5221_v46, %v1502_v53  ;;  %1858 = vadd.xlane.f32.xlu0 %v1857_v3 }
 0x1d8   : > { %v4696_v7 = vpop.eup %3672  ;;  %3686 = vpow2.f32 %v1693_v48 }
 0x1d9   : > { %v4700_v54 = vpop.eup %3674  ;;  %v1687_v33 = vmul.f32 1.442695, %v1575_v25  ;;  %v1701_v1 = vmul.f32 1.442695, %v1582_v38  ;;  %1849 = vadd.xlane.f32.xlu1 %v1848_v2  ;;  %v1839_v51 = vsel %vm1334_vm1, %v4696_v7, 0.0  ;;  %v5226_v38 = vld [vmem:[#allocation36_spill] sm:$0xff] }
 0x1da   : > { %5222 = vst [vmem:[#allocation33_spill] sm:$0xff] %v4700_v54  ;;  %v1493_v55 = vpop.xlane.xlu0 %1492  ;;  %v1484_v42 = vpop.xlane.xlu1 %1483  ;;  %v1860_v48 = vsel %vm1334_vm1, %v4700_v54, 0.0 }
 0x1db   : > { %3688 = vpow2.f32 %v1687_v33  ;;  %v1579_v18 = vsub.f32 %v5223_v13, %v1493_v55  ;;  %v1576_v20 = vsub.f32 %v5224_v26, %v1484_v42  ;;  %1840 = vadd.xlane.f32.xlu0 %v1839_v51  ;;  %v5227_v33 = vld [vmem:[#allocation37_spill] sm:$0xff] }
 0x1dc   : > { %v4706_v12 = vpop.eup %3676  ;;  %3690 = vpow2.f32 %v1701_v1 }
 0x1dd   : > { %5225 = vst [vmem:[#allocation31_spill] sm:$0xff] %v4706_v12  ;;  %v4710_v3 = vpop.eup %3678  ;;  %v1695_v5 = vmul.f32 1.442695, %v1579_v18  ;;  %v1689_v53 = vmul.f32 1.442695, %v1576_v20  ;;  %1861 = vadd.xlane.f32.xlu1 %v1860_v48  ;;  %v1851_v50 = vsel %vm1334_vm1, %v4706_v12, 0.0 }
 0x1de   : > { %v1496_v25 = vpop.xlane.xlu1 %1495  ;;  %v1511_v46 = vpop.xlane.xlu0 %1510  ;;  %v1842_v55 = vsel %vm1334_vm1, %v4710_v3, 0.0 }
 0x1df   : > { %3692 = vpow2.f32 %v1695_v5  ;;  %v1580_v2 = vsub.f32 %v5226_v38, %v1496_v25  ;;  %v1585_v51 = vsub.f32 %v5227_v33, %v1511_v46  ;;  %1852 = vadd.xlane.f32.xlu0 %v1851_v50  ;;  %v5230_v5 = vld [vmem:[#allocation41_spill] sm:$0xff] }
 0x1e0   : > { %v4716_v1 = vpop.eup %3680  ;;  %3694 = vpow2.f32 %v1689_v53 }
 0x1e1   : > { %5228 = vst [vmem:[#allocation34_spill] sm:$0xff] %v4716_v1  ;;  %v4720_v42 = vpop.eup %3682  ;;  %v1697_v13 = vmul.f32 1.442695, %v1580_v2  ;;  %v1707_v18 = vmul.f32 1.442695, %v1585_v51  ;;  %1843 = vadd.xlane.f32.xlu1 %v1842_v55  ;;  %v1854_v53 = vsel %vm1334_vm1, %v4716_v1, 0.0 }
 0x1e2   : > { %5229 = vst [vmem:[#allocation32_spill] sm:$0xff] %v4720_v42  ;;  %v1523_v26 = vpop.xlane.xlu0 %1522  ;;  %v1869_v20 = vsel %vm1334_vm1, %v4720_v42, 0.0  ;;  %v1514_v48 = vpop.xlane.xlu1 %1513  ;;  %v5233_v55 = vld [vmem:[#allocation39_spill] sm:$0xff] }
 0x1e3   : > { %3696 = vpow2.f32 %v1697_v13  ;;  %1870 = vadd.xlane.f32.xlu0 %v1869_v20  ;;  %v1586_v50 = vsub.f32 %v5230_v5, %v1514_v48  ;;  %v5235_v48 = vld [vmem:[#allocation38_spill] sm:$0xff] }
 0x1e4   : > { %v4725_v25 = vpop.eup %3684  ;;  %3698 = vpow2.f32 %v1707_v18  ;;  %v1589_v5 = vsub.f32 %v5235_v48, %v1523_v26 }
 0x1e5   : > { %5231 = vst [vmem:[#allocation35_spill] sm:$0xff] %v4725_v25  ;;  %v4729_v46 = vpop.eup %3686  ;;  %v1709_v38 = vmul.f32 1.442695, %v1586_v50  ;;  %1855 = vadd.xlane.f32.xlu1 %v1854_v53  ;;  %v1881_v2 = vsel %vm1334_vm1, %v4725_v25, 0.0 }
 0x1e6   : > { %5232 = vst [vmem:[#allocation36_spill] sm:$0xff] %v4729_v46  ;;  %v1505_v33 = vpop.xlane.xlu0 %1504  ;;  %v1526_v51 = vpop.xlane.xlu1 %1525  ;;  %v1872_v18 = vsel %vm1334_vm1, %v4729_v46, 0.0 }
 0x1e7   : > { %1882 = vadd.xlane.f32.xlu0 %v1881_v2  ;;  %v1583_v13 = vsub.f32 %v5233_v55, %v1505_v33  ;;  %3700 = vpow2.f32 %v1709_v38  ;;  %v5237_v2 = vld [vmem:[#allocation40_spill] sm:$0xff]  ;;  %v5238_v55 = vld [vmem:[#allocation43_spill] sm:$0xff]  ;;  %v1715_v38 = vmul.f32 1.442695, %v1589_v5 }
 0x1e8   : > { %v4734_v20 = vpop.eup %3688 }
 0x1e9   : > { %5234 = vst [vmem:[#allocation37_spill] sm:$0xff] %v4734_v20  ;;  %v4739_v42 = vpop.eup %3690  ;;  %v1703_v50 = vmul.f32 1.442695, %v1583_v13  ;;  %1873 = vadd.xlane.f32.xlu1 %v1872_v18  ;;  %v1863_v53 = vsel %vm1334_vm1, %v4734_v20, 0.0 }
 0x1ea   : > { %5236 = vst [vmem:[#allocation41_spill] sm:$0xff] %v4739_v42  ;;  %v1517_v25 = vpop.xlane.xlu0 %1516  ;;  %v1508_v57 = vpop.xlane.xlu1 %1507  ;;  %v1884_v48 = vsel %vm1334_vm1, %v4739_v42, 0.0 }
 0x1eb   : > { %3702 = vpow2.f32 %v1703_v50  ;;  %1864 = vadd.xlane.f32.xlu0 %v1863_v53  ;;  %v1587_v33 = vsub.f32 %v5237_v2, %v1517_v25  ;;  %v1584_v1 = vsub.f32 %v5238_v55, %v1508_v57  ;;  %v5241_v50 = vld [vmem:[#allocation42_spill] sm:$0xff]  ;;  %v5242_v57 = vld [vmem:[#allocation44_spill] sm:$0xff] }
 0x1ec   : > { %v4745_v26 = vpop.eup %3692  ;;  %v1590_v53 = vsub.f32 %v5241_v50, %v1526_v51 }
 0x1ed   : > { %5239 = vst [vmem:[#allocation39_spill] sm:$0xff] %v4745_v26  ;;  %v4749_v46 = vpop.eup %3694  ;;  %v1711_v13 = vmul.f32 1.442695, %v1587_v33  ;;  %v1705_v18 = vmul.f32 1.442695, %v1584_v1  ;;  %1885 = vadd.xlane.f32.xlu1 %v1884_v48  ;;  %v1875_v20 = vsel %vm1334_vm1, %v4745_v26, 0.0 }
 0x1ee   : > { %5240 = vst [vmem:[#allocation38_spill] sm:$0xff] %v4749_v46  ;;  %v1520_v12 = vpop.xlane.xlu1 %1519  ;;  %v1866_v5 = vsel %vm1334_vm1, %v4749_v46, 0.0  ;;  %v1717_v33 = vmul.f32 1.442695, %v1590_v53 }
 0x1ef   : > { %3704 = vpow2.f32 %v1711_v13  ;;  %1876 = vadd.xlane.f32.xlu0 %v1875_v20  ;;  %v1588_v25 = vsub.f32 %v5242_v57, %v1520_v12 }
 0x1f0   : > { %v4755_v2 = vpop.eup %3696  ;;  %3706 = vpow2.f32 %v1705_v18 }
 0x1f1   : > { %5243 = vst [vmem:[#allocation40_spill] sm:$0xff] %v4755_v2  ;;  %v4759_v55 = vpop.eup %3698  ;;  %3708 = vpow2.f32 %v1715_v38  ;;  %v1713_v1 = vmul.f32 1.442695, %v1588_v25  ;;  %1867 = vadd.xlane.f32.xlu1 %v1866_v5  ;;  %v1878_v12 = vsel %vm1334_vm1, %v4755_v2, 0.0 }
 0x1f2   : > { %5244 = vst [vmem:[#allocation43_spill] sm:$0xff] %v4759_v55  ;;  %v1893_v51 = vsel %vm1334_vm1, %v4759_v55, 0.0 }
 0x1f3   : > { %3710 = vpow2.f32 %v1713_v1  ;;  %1894 = vadd.xlane.f32.xlu0 %v1893_v51 }
 0x1f4   : > { %v4765_v20 = vpop.eup %3700  ;;  %3712 = vpow2.f32 %v1717_v33 }
 0x1f5   : > { %5245 = vst [vmem:[#allocation42_spill] sm:$0xff] %v4765_v20  ;;  %1879 = vadd.xlane.f32.xlu1 %v1878_v12  ;;  %v1896_v38 = vsel %vm1334_vm1, %v4765_v20, 0.0 }
 0x1f8   : > { %v4767_v48 = vpop.eup %3702 }
 0x1f9   : > { %5246 = vst [vmem:[#allocation44_spill] sm:$0xff] %v4767_v48  ;;  %1897 = vadd.xlane.f32.xlu1 %v1896_v38  ;;  %v1887_v13 = vsel %vm1334_vm1, %v4767_v48, 0.0 }
 0x1fa   : > { %1888 = vadd.xlane.f32.xlu0 %v1887_v13 }
 0x1fc   : > { %v4773_v18 = vpop.eup %3704 }
 0x1fd   : > { %5247 = vst [vmem:[#allocation46_spill] sm:$0xff] %v4773_v18  ;;  %v4775_v50 = vpop.eup %3706  ;;  %v1899_v53 = vsel %vm1334_vm1, %v4773_v18, 0.0 }
 0x1fe   : > { %5248 = vst [vmem:[#allocation47_spill] sm:$0xff] %v4775_v50  ;;  %v4779_v57 = vpop.eup %3708  ;;  %1900 = vadd.xlane.f32.xlu0 %v1899_v53  ;;  %v1890_v25 = vsel %vm1334_vm1, %v4775_v50, 0.0 }
 0x1ff   : > { %5249 = vst [vmem:[#allocation48_spill] sm:$0xff] %v4779_v57  ;;  %1891 = vadd.xlane.f32.xlu1 %v1890_v25  ;;  %v1905_v1 = vsel %vm1334_vm1, %v4779_v57, 0.0 }
 0x200   : > { %v4783_v5 = vpop.eup %3710 }
 0x201   : > { %5250 = vst [vmem:[#allocation49_spill] sm:$0xff] %v4783_v5  ;;  %v1902_v33 = vsel %vm1334_vm1, %v4783_v5, 0.0  ;;  %v4789_v51 = vpop.eup %3712 }
 0x202   : > { %1906 = vadd.xlane.f32.xlu0 %v1905_v1  ;;  %5251 = vst [vmem:[#allocation50_spill] sm:$0xff] %v4789_v51  ;;  %v1908_v12 = vsel %vm1334_vm1, %v4789_v51, 0.0 }
 0x203   : > { %1903 = vadd.xlane.f32.xlu1 %v1902_v33 }
 0x207   : > { %1909 = vadd.xlane.f32.xlu1 %v1908_v12 }
 0x20b   : > { %v1727_v38 = vpop.xlane.xlu0 %1726 }
 0x20f   : > { %v1739_v13 = vpop.xlane.xlu0 %1738 }
 0x212   : > { %v1730_v53 = vpop.xlane.xlu1 %1729 }
 0x213   : > { %v1721_v25 = vpop.xlane.xlu0 %1720  ;;  %3714 = vrcp.f32 %v1730_v53 }
 0x214   : > { %3716 = vrcp.f32 %v1721_v25 }
 0x215   : > { %3718 = vrcp.f32 %v1727_v38 }
 0x216   : > { %v1742_v18 = vpop.xlane.xlu1 %1741 }
 0x217   : > { %v1733_v55 = vpop.xlane.xlu0 %1732 }
 0x21a   : > { %v1724_v57 = vpop.xlane.xlu1 %1723 }
 0x21b   : > { %3720 = vrcp.f32 %v1724_v57  ;;  %v1751_v5 = vpop.xlane.xlu0 %1750 }
 0x21c   : > { %3722 = vrcp.f32 %v1742_v18 }
 0x21d   : > { %3724 = vrcp.f32 %v1733_v55 }
 0x21e   : > { %3726 = vrcp.f32 %v1739_v13  ;;  %v1736_v1 = vpop.xlane.xlu1 %1735 }
 0x21f   : > { %3728 = vrcp.f32 %v1736_v1  ;;  %v1763_v33 = vpop.xlane.xlu0 %1762 }
 0x220   : > { %v3715_v50 = vpop.eup %3714 }
 0x221   : > { %v3717_v48 = vpop.eup %3716  ;;  %v1918_v38 = vmul.f32 %v3715_v50, %v4492_v22 }
 0x222   : > { %v1754_v51 = vpop.xlane.xlu1 %1753  ;;  %v3719_v2 = vpop.eup %3718  ;;  %v1912_v18 = vmul.f32 %v3717_v48, %v4496_v15 }
 0x223   : > { %v1745_v12 = vpop.xlane.xlu0 %1744  ;;  %3730 = vrcp.f32 %v1754_v51  ;;  %v1916_v25 = vmul.f32 %v3719_v2, %v4482_v10 }
 0x224   : > { %3732 = vrcp.f32 %v1745_v12 }
 0x225   : > { %3734 = vrcp.f32 %v1751_v5  ;;  %v2040_v51 = vpack.c.bf16 %v1918_v38, %v1916_v25 }
 0x226   : > { %v1766_v20 = vpop.xlane.xlu1 %1765 }
 0x227   : > { %v1757_v26 = vpop.xlane.xlu0 %1756 }
 0x228   : > { %v3721_v42 = vpop.eup %3720 }
 0x229   : > { %v3723_v53 = vpop.eup %3722  ;;  %v1914_v55 = vmul.f32 %v3721_v42, %v4510_v11 }
 0x22a   : > { %v3725_v57 = vpop.eup %3724  ;;  %v1748_v13 = vpop.xlane.xlu1 %1747  ;;  %v1926_v22 = vmul.f32 %v3723_v53, %v4504_v49  ;;  %v5253_v49 = vld [vmem:[#allocation2_spill] sm:$0xff] }
 0x22b   : > { %v3727_v1 = vpop.eup %3726  ;;  %3736 = vrcp.f32 %v1748_v13  ;;  %v2039_v46 = vpack.c.bf16 %v1914_v55, %v1912_v18  ;;  %v1920_v15 = vmul.f32 %v3725_v57, %v4502_v29  ;;  %v5257_v55 = vld [vmem:[#allocation9_spill] sm:$0xff] }
 0x22c   : > { %v3729_v54 = vpop.eup %3728  ;;  %3738 = vrcp.f32 %v1766_v20  ;;  %v1775_v24 = vpop.xlane.xlu0 %1774  ;;  %v1924_v42 = vmul.f32 %v3727_v1, %v4488_v37  ;;  %v5252_v20 = vld [vmem:[#allocation4_spill] sm:$0xff] }
 0x22d   : > { %3740 = vrcp.f32 %v1757_v26  ;;  %3422 = vmatprep.mubr.msk.bf16.mxu0 %vm1334_vm1, %v2039_v46  ;;  %v1922_v11 = vmul.f32 %v3729_v54, %v4520_v32  ;;  %v5254_v32 = vld [vmem:[#allocation5_spill] sm:$0xff]  ;;  %v5255_v46 = vld [vmem:[#allocation3_spill] sm:$0xff]  ;;  %v5256_v37 = vld [vmem:[#allocation8_spill] sm:$0xff] }
 0x22e   : > { %3742 = vrcp.f32 %v1763_v33  ;;  %3423 = vmatmul.mubr.msk.bf16.vlgmr.msra.gmra.mxu0 %vm1334_vm1, %v2040_v51  ;;  %v1760_v10 = vpop.xlane.xlu1 %1759  ;;  %v2042_v50 = vpack.c.bf16 %v1926_v22, %v1924_v42 }
 0x22f   : > { %3744 = vrcp.f32 %v1760_v10  ;;  %v2041_v2 = vpack.c.bf16 %v1922_v11, %v1920_v15  ;;  %3435 = vmatpush3.bf16.msra.mxu0 %v5252_v20 }
 0x230   : > { %v1787_v48 = vpop.xlane.xlu0 %1786  ;;  %3436 = vmatprep.subr.bf16.mxu0 %v5253_v49  ;;  %v3731_v26 = vpop.eup %3730 }
 0x231   : > { %3430 = vmatprep.mubr.msk.bf16.mxu1 %vm1334_vm1, %v2041_v2  ;;  %v3733_v5 = vpop.eup %3732  ;;  %v1934_v18 = vmul.f32 %v3731_v26, %v4530_v63 }
 0x232   : > { %3431 = vmatmul.mubr.msk.bf16.vlgmr.msra.gmra.mxu1 %vm1334_vm1, %v2042_v50  ;;  %v1778_v29 = vpop.xlane.xlu1 %1777  ;;  %v3735_v12 = vpop.eup %3734  ;;  %v1928_v13 = vmul.f32 %v3733_v5, %v4536_v30 }
 0x233   : > { %3437 = vmatpush3.bf16.msra.mxu0 %v5253_v49  ;;  %3443 = vmatpush3.bf16.msra.mxu1 %v5254_v32  ;;  %3746 = vrcp.f32 %v1778_v29  ;;  %v1932_v22 = vmul.f32 %v3735_v12, %v4516_v44 }
 0x234   : > { %v1769_v54 = vpop.xlane.xlu0 %1768  ;;  %3444 = vmatprep.subr.bf16.mxu1 %v5255_v46  ;;  %3450 = vmatprep.subr.bf16.mxu0 %v5256_v37 }
 0x235   : > { %3748 = vrcp.f32 %v1769_v54  ;;  %v2044_v63 = vpack.c.bf16 %v1934_v18, %v1932_v22 }
 0x236   : > { %v1790_v33 = vpop.xlane.xlu1 %1789  ;;  %3750 = vrcp.f32 %v1775_v24 }
 0x237   : > { %3445 = vmatpush3.bf16.msra.mxu1 %v5255_v46 }
 0x238   : > { %v3737_v38 = vpop.eup %3736  ;;  %v1781_v53 = vpop.xlane.xlu0 %1780  ;;  %3458 = vmatprep.subr.bf16.mxu1 %v5257_v55 }
 0x239   : > { %v3739_v57 = vpop.eup %3738  ;;  %v1930_v25 = vmul.f32 %v3737_v38, %v4550_v61 }
 0x23a   : > { %v3741_v1 = vpop.eup %3740  ;;  %v1772_v51 = vpop.xlane.xlu1 %1771  ;;  %v1942_v2 = vmul.f32 %v3739_v57, %v4540_v34  ;;  %v5258_v34 = vld [vmem:[#allocation6_spill] sm:$0xff] }
 0x23b   : > { %v3743_v15 = vpop.eup %3742  ;;  %3752 = vrcp.f32 %v1772_v51  ;;  %v2043_v11 = vpack.c.bf16 %v1930_v25, %v1928_v13  ;;  %v1936_v30 = vmul.f32 %v3741_v1, %v4546_v47 }
 0x23c   : > { %v3745_v10 = vpop.eup %3744  ;;  %3754 = vrcp.f32 %v1790_v33  ;;  %v1799_v42 = vpop.xlane.xlu0 %1798  ;;  %v1940_v24 = vmul.f32 %v3743_v15, %v4526_v23  ;;  %v5260_v23 = vld [vmem:[#allocation12_spill] sm:$0xff]  ;;  %v5261_v33 = vld [vmem:[#allocation13_spill] sm:$0xff] }
 0x23d   : > { %3756 = vrcp.f32 %v1781_v53  ;;  %3438 = vmatprep.mubr.msk.bf16.mxu0 %vm1334_vm1, %v2043_v11  ;;  %v1938_v61 = vmul.f32 %v3745_v10, %v4556_v19 }
 0x23e   : > { %3758 = vrcp.f32 %v1787_v48  ;;  %3439 = vmatmul.mubr.msk.bf16.vlgmr.msra.gmra.mxu0 %vm1334_vm1, %v2044_v63  ;;  %v1784_v44 = vpop.xlane.xlu1 %1783  ;;  %v2046_v49 = vpack.c.bf16 %v1942_v2, %v1940_v24  ;;  %v5259_v48 = vld [vmem:[#allocation7_spill] sm:$0xff] }
 0x23f   : > { %3760 = vrcp.f32 %v1784_v44  ;;  %v2045_v20 = vpack.c.bf16 %v1938_v61, %v1936_v30  ;;  %3451 = vmatpush3.bf16.msra.mxu0 %v5256_v37  ;;  %v5263_v63 = vld [vmem:[#allocation11_spill] sm:$0xff] }
 0x240   : > { %v1811_v50 = vpop.xlane.xlu0 %1810  ;;  %3452 = vmatprep.subr.bf16.mxu0 %v5258_v34  ;;  %v3747_v29 = vpop.eup %3746 }
 0x241   : > { %3446 = vmatprep.mubr.msk.bf16.mxu1 %vm1334_vm1, %v2045_v20  ;;  %v1950_v5 = vmul.f32 %v3747_v29, %v4570_v52 }
 0x242   : > { %3447 = vmatmul.mubr.msk.bf16.vlgmr.msra.gmra.mxu1 %vm1334_vm1, %v2046_v49  ;;  %v1802_v47 = vpop.xlane.xlu1 %1801  ;;  %v3749_v32 = vpop.eup %3748  ;;  %v5265_v49 = vld [vmem:[#allocation17_spill] sm:$0xff] }
 0x243   : > { %3453 = vmatpush3.bf16.msra.mxu0 %v5258_v34  ;;  %3459 = vmatpush3.bf16.msra.mxu1 %v5257_v55  ;;  %v3751_v46 = vpop.eup %3750  ;;  %3762 = vrcp.f32 %v1802_v47  ;;  %v1944_v38 = vmul.f32 %v3749_v32, %v4576_v45 }
 0x244   : > { %v1793_v19 = vpop.xlane.xlu0 %1792  ;;  %3460 = vmatprep.subr.bf16.mxu1 %v5259_v48  ;;  %3466 = vmatprep.subr.bf16.mxu0 %v5260_v23  ;;  %v1948_v57 = vmul.f32 %v3751_v46, %v4560_v58 }
 0x245   : > { %3764 = vrcp.f32 %v1793_v19 }
 0x246   : > { %v1814_v54 = vpop.xlane.xlu1 %1813  ;;  %3766 = vrcp.f32 %v1799_v42  ;;  %v2048_v52 = vpack.c.bf16 %v1950_v5, %v1948_v57 }
 0x247   : > { %3461 = vmatpush3.bf16.msra.mxu1 %v5259_v48 }
 0x248   : > { %v3753_v37 = vpop.eup %3752  ;;  %v1805_v26 = vpop.xlane.xlu0 %1804  ;;  %3474 = vmatprep.subr.bf16.mxu1 %v5261_v33 }
 0x249   : > { %v3755_v12 = vpop.eup %3754  ;;  %v1946_v53 = vmul.f32 %v3753_v37, %v4590_v9 }
 0x24a   : > { %v3757_v18 = vpop.eup %3756  ;;  %v1796_v55 = vpop.xlane.xlu1 %1795  ;;  %v1958_v22 = vmul.f32 %v3755_v12, %v4580_v6  ;;  %v5262_v6 = vld [vmem:[#allocation10_spill] sm:$0xff] }
 0x24b   : > { %v3759_v13 = vpop.eup %3758  ;;  %3768 = vrcp.f32 %v1796_v55  ;;  %v2047_v25 = vpack.c.bf16 %v1946_v53, %v1944_v38  ;;  %v1952_v45 = vmul.f32 %v3757_v18, %v4586_v39  ;;  %v5267_v53 = vld [vmem:[#allocation15_spill] sm:$0xff] }
 0x24c   : > { %v3761_v1 = vpop.eup %3760  ;;  %3770 = vrcp.f32 %v1814_v54  ;;  %v1823_v51 = vpop.xlane.xlu0 %1822  ;;  %v1956_v15 = vmul.f32 %v3759_v13, %v4566_v43  ;;  %v5264_v43 = vld [vmem:[#allocation16_spill] sm:$0xff] }
 0x24d   : > { %3772 = vrcp.f32 %v1805_v26  ;;  %3454 = vmatprep.mubr.msk.bf16.mxu0 %vm1334_vm1, %v2047_v25  ;;  %v1954_v9 = vmul.f32 %v3761_v1, %v4596_v62 }
 0x24e   : > { %3774 = vrcp.f32 %v1811_v50  ;;  %3455 = vmatmul.mubr.msk.bf16.vlgmr.msra.gmra.mxu0 %vm1334_vm1, %v2048_v52  ;;  %v1808_v58 = vpop.xlane.xlu1 %1807  ;;  %v2050_v42 = vpack.c.bf16 %v1958_v22, %v1956_v15  ;;  %v5269_v52 = vld [vmem:[#allocation21_spill] sm:$0xff] }
 0x24f   : > { %3776 = vrcp.f32 %v1808_v58  ;;  %v2049_v11 = vpack.c.bf16 %v1954_v9, %v1952_v45  ;;  %3467 = vmatpush3.bf16.msra.mxu0 %v5260_v23 }
 0x250   : > { %v1835_v10 = vpop.xlane.xlu0 %1834  ;;  %3468 = vmatprep.subr.bf16.mxu0 %v5262_v6  ;;  %v3763_v2 = vpop.eup %3762 }
 0x251   : > { %3462 = vmatprep.mubr.msk.bf16.mxu1 %vm1334_vm1, %v2049_v11  ;;  %v1966_v50 = vmul.f32 %v3763_v2, %v4610_v35 }
 0x252   : > { %3463 = vmatmul.mubr.msk.bf16.vlgmr.msra.gmra.mxu1 %vm1334_vm1, %v2050_v42  ;;  %v1826_v39 = vpop.xlane.xlu1 %1825  ;;  %v3765_v30 = vpop.eup %3764 }
 0x253   : > { %3469 = vmatpush3.bf16.msra.mxu0 %v5262_v6  ;;  %3475 = vmatpush3.bf16.msra.mxu1 %v5261_v33  ;;  %v3767_v44 = vpop.eup %3766  ;;  %3778 = vrcp.f32 %v1826_v39  ;;  %v1960_v47 = vmul.f32 %v3765_v30, %v4616_v27 }
 0x254   : > { %v1817_v62 = vpop.xlane.xlu0 %1816  ;;  %3476 = vmatprep.subr.bf16.mxu1 %v5263_v63  ;;  %3482 = vmatprep.subr.bf16.mxu0 %v5264_v43  ;;  %v1964_v29 = vmul.f32 %v3767_v44, %v4600_v17 }
 0x255   : > { %3780 = vrcp.f32 %v1817_v62 }
 0x256   : > { %v1838_v61 = vpop.xlane.xlu1 %1837  ;;  %3782 = vrcp.f32 %v1823_v51  ;;  %v2052_v35 = vpack.c.bf16 %v1966_v50, %v1964_v29 }
 0x257   : > { %3477 = vmatpush3.bf16.msra.mxu1 %v5263_v63 }
 0x258   : > { %v3769_v24 = vpop.eup %3768  ;;  %v1829_v20 = vpop.xlane.xlu0 %1828  ;;  %3490 = vmatprep.subr.bf16.mxu1 %v5265_v49 }
 0x259   : > { %v3771_v34 = vpop.eup %3770  ;;  %v1962_v19 = vmul.f32 %v3769_v24, %v4630_v60 }
 0x25a   : > { %v3773_v48 = vpop.eup %3772  ;;  %v1820_v23 = vpop.xlane.xlu1 %1819  ;;  %v1974_v26 = vmul.f32 %v3771_v34, %v4620_v56  ;;  %v5266_v56 = vld [vmem:[#allocation14_spill] sm:$0xff] }
 0x25b   : > { %v3775_v32 = vpop.eup %3774  ;;  %3784 = vrcp.f32 %v1820_v23  ;;  %v2051_v54 = vpack.c.bf16 %v1962_v19, %v1960_v47  ;;  %v1968_v27 = vmul.f32 %v3773_v48, %v4626_v31  ;;  %v5273_v47 = vld [vmem:[#allocation25_spill] sm:$0xff] }
 0x25c   : > { %v3777_v46 = vpop.eup %3776  ;;  %3786 = vrcp.f32 %v1838_v61  ;;  %v1847_v37 = vpop.xlane.xlu0 %1846  ;;  %v1972_v5 = vmul.f32 %v3775_v32, %v4606_v8  ;;  %v5268_v8 = vld [vmem:[#allocation20_spill] sm:$0xff]  ;;  %v5271_v61 = vld [vmem:[#allocation19_spill] sm:$0xff] }
 0x25d   : > { %3788 = vrcp.f32 %v1829_v20  ;;  %3470 = vmatprep.mubr.msk.bf16.mxu0 %vm1334_vm1, %v2051_v54  ;;  %v1970_v60 = vmul.f32 %v3777_v46, %v4636_v41  ;;  %v5274_v46 = vld [vmem:[#allocation45_spill] sm:$0xff] }
 0x25e   : > { %3790 = vrcp.f32 %v1835_v10  ;;  %3471 = vmatmul.mubr.msk.bf16.vlgmr.msra.gmra.mxu0 %vm1334_vm1, %v2052_v35  ;;  %v1832_v17 = vpop.xlane.xlu1 %1831  ;;  %v2054_v38 = vpack.c.bf16 %v1974_v26, %v1972_v5  ;;  %v5276_v5 = vld [vmem:[#allocation31_spill] sm:$0xff] }
 0x25f   : > { %3792 = vrcp.f32 %v1832_v17  ;;  %v2053_v33 = vpack.c.bf16 %v1970_v60, %v1968_v27  ;;  %3483 = vmatpush3.bf16.msra.mxu0 %v5264_v43  ;;  %v5275_v60 = vld [vmem:[#allocation33_spill] sm:$0xff] }
 0x260   : > { %v1859_v12 = vpop.xlane.xlu0 %1858  ;;  %3484 = vmatprep.subr.bf16.mxu0 %v5266_v56  ;;  %v3779_v18 = vpop.eup %3778 }
 0x261   : > { %3478 = vmatprep.mubr.msk.bf16.mxu1 %vm1334_vm1, %v2053_v33  ;;  %v1982_v51 = vmul.f32 %v3779_v18, %v4650_v16  ;;  %v5277_v33 = vld [vmem:[#allocation34_spill] sm:$0xff] }
 0x262   : > { %3479 = vmatmul.mubr.msk.bf16.vlgmr.msra.gmra.mxu1 %vm1334_vm1, %v2054_v38  ;;  %v1850_v31 = vpop.xlane.xlu1 %1849  ;;  %v3781_v55 = vpop.eup %3780  ;;  %v5278_v38 = vld [vmem:[#allocation30_spill] sm:$0xff] }
 0x263   : > { %3485 = vmatpush3.bf16.msra.mxu0 %v5266_v56  ;;  %3491 = vmatpush3.bf16.msra.mxu1 %v5265_v49  ;;  %v3783_v13 = vpop.eup %3782  ;;  %3794 = vrcp.f32 %v1850_v31  ;;  %v1976_v45 = vmul.f32 %v3781_v55, %v4656_v28 }
 0x264   : > { %v1841_v41 = vpop.xlane.xlu0 %1840  ;;  %3492 = vmatprep.subr.bf16.mxu1 %v5267_v53  ;;  %3498 = vmatprep.subr.bf16.mxu0 %v5268_v8  ;;  %v1980_v11 = vmul.f32 %v3783_v13, %v4640_v14  ;;  %v5281_v13 = vld [vmem:[#allocation28_spill] sm:$0xff] }
 0x265   : > { %3796 = vrcp.f32 %v1841_v41 }
 0x266   : > { %v1862_v57 = vpop.xlane.xlu1 %1861  ;;  %3798 = vrcp.f32 %v1847_v37  ;;  %v2056_v16 = vpack.c.bf16 %v1982_v51, %v1980_v11 }
 0x267   : > { %3493 = vmatpush3.bf16.msra.mxu1 %v5267_v53 }
 0x268   : > { %v3785_v25 = vpop.eup %3784  ;;  %v1853_v1 = vpop.xlane.xlu0 %1852  ;;  %3506 = vmatprep.subr.bf16.mxu1 %v5269_v52 }
 0x269   : > { %v3787_v22 = vpop.eup %3786  ;;  %v1978_v9 = vmul.f32 %v3785_v25, %v4670_v36 }
 0x26a   : > { %v3789_v58 = vpop.eup %3788  ;;  %v1844_v15 = vpop.xlane.xlu1 %1843  ;;  %v1990_v62 = vmul.f32 %v3787_v22, %v4660_v4  ;;  %v5270_v4 = vld [vmem:[#allocation18_spill] sm:$0xff] }
 0x26b   : > { %v3791_v10 = vpop.eup %3790  ;;  %3800 = vrcp.f32 %v1844_v15  ;;  %v2055_v42 = vpack.c.bf16 %v1978_v9, %v1976_v45  ;;  %v1984_v28 = vmul.f32 %v3789_v58, %v4666_v40  ;;  %v5282_v9 = vld [vmem:[#allocation36_spill] sm:$0xff]  ;;  %v5283_v15 = vld [vmem:[#allocation29_spill] sm:$0xff] }
 0x26c   : > { %v3793_v6 = vpop.eup %3792  ;;  %3802 = vrcp.f32 %v1862_v57  ;;  %v1871_v39 = vpop.xlane.xlu0 %1870  ;;  %v1988_v63 = vmul.f32 %v3791_v10, %v4646_v59  ;;  %v5272_v59 = vld [vmem:[#allocation24_spill] sm:$0xff]  ;;  %v5280_v57 = vld [vmem:[#allocation23_spill] sm:$0xff]  ;;  %v5284_v10 = vld [vmem:[#allocation37_spill] sm:$0xff] }
 0x26d   : > { %3804 = vrcp.f32 %v1853_v1  ;;  %3486 = vmatprep.mubr.msk.bf16.mxu0 %vm1334_vm1, %v2055_v42  ;;  %v1986_v36 = vmul.f32 %v3793_v6, %v4676_v0  ;;  %v5285_v6 = vld [vmem:[#allocation38_spill] sm:$0xff] }
 0x26e   : > { %3806 = vrcp.f32 %v1859_v12  ;;  %3487 = vmatmul.mubr.msk.bf16.vlgmr.msra.gmra.mxu0 %vm1334_vm1, %v2056_v16  ;;  %v1856_v14 = vpop.xlane.xlu1 %1855  ;;  %v2058_v30 = vpack.c.bf16 %v1990_v62, %v1988_v63  ;;  %v5286_v62 = vld [vmem:[#allocation32_spill] sm:$0xff] }
 0x26f   : > { %3808 = vrcp.f32 %v1856_v14  ;;  %v2057_v43 = vpack.c.bf16 %v1986_v36, %v1984_v28  ;;  %3499 = vmatpush3.bf16.msra.mxu0 %v5268_v8  ;;  %v5279_v8 = vld [vmem:[#allocation22_spill] sm:$0xff] }
 0x270   : > { %v1883_v2 = vpop.xlane.xlu0 %1882  ;;  %3500 = vmatprep.subr.bf16.mxu0 %v5270_v4  ;;  %v3795_v44 = vpop.eup %3794 }
 0x271   : > { %3494 = vmatprep.mubr.msk.bf16.mxu1 %vm1334_vm1, %v2057_v43  ;;  %v1998_v34 = vmul.f32 %v3795_v44, %v4690_v21 }
 0x272   : > { %3495 = vmatmul.mubr.msk.bf16.vlgmr.msra.gmra.mxu1 %vm1334_vm1, %v2058_v30  ;;  %v1874_v40 = vpop.xlane.xlu1 %1873  ;;  %v3797_v24 = vpop.eup %3796 }
 0x273   : > { %3501 = vmatpush3.bf16.msra.mxu0 %v5270_v4  ;;  %3507 = vmatpush3.bf16.msra.mxu1 %v5269_v52  ;;  %v3799_v50 = vpop.eup %3798  ;;  %3810 = vrcp.f32 %v1874_v40  ;;  %v1992_v23 = vmul.f32 %v3797_v24, %v4696_v7  ;;  %v5287_v4 = vld [vmem:[#allocation41_spill] sm:$0xff]  ;;  %v5290_v24 = vld [vmem:[#allocation35_spill] sm:$0xff] }
 0x274   : > { %v1865_v0 = vpop.xlane.xlu0 %1864  ;;  %3508 = vmatprep.subr.bf16.mxu1 %v5271_v61  ;;  %3514 = vmatprep.subr.bf16.mxu0 %v5272_v59  ;;  %v1996_v37 = vmul.f32 %v3799_v50, %v5274_v46 }
 0x275   : > { %3812 = vrcp.f32 %v1865_v0  ;;  %v5288_v0 = vld [vmem:[#allocation39_spill] sm:$0xff] }
 0x276   : > { %v1886_v20 = vpop.xlane.xlu1 %1885  ;;  %3814 = vrcp.f32 %v1871_v39  ;;  %v2060_v21 = vpack.c.bf16 %v1998_v34, %v1996_v37  ;;  %v5294_v37 = vld [vmem:[#allocation44_spill] sm:$0xff] }
 0x277   : > { %3509 = vmatpush3.bf16.msra.mxu1 %v5271_v61 }
 0x278   : > { %v3801_v49 = vpop.eup %3800  ;;  %3522 = vmatprep.subr.bf16.mxu1 %v5273_v47  ;;  %v1877_v48 = vpop.xlane.xlu0 %1876 }
 0x279   : > { %v3803_v19 = vpop.eup %3802  ;;  %v1994_v29 = vmul.f32 %v3801_v49, %v4710_v3 }
 0x27a   : > { %v3805_v32 = vpop.eup %3804  ;;  %v1868_v54 = vpop.xlane.xlu1 %1867  ;;  %v2006_v17 = vmul.f32 %v3803_v19, %v5275_v60  ;;  %v5296_v60 = vld [vmem:[#allocation43_spill] sm:$0xff] }
 0x27b   : > { %v3807_v35 = vpop.eup %3806  ;;  %3816 = vrcp.f32 %v1868_v54  ;;  %v2059_v26 = vpack.c.bf16 %v1994_v29, %v1992_v23  ;;  %v2000_v7 = vmul.f32 %v3805_v32, %v5276_v5  ;;  %v5292_v23 = vld [vmem:[#allocation27_spill] sm:$0xff]  ;;  %v5293_v54 = vld [vmem:[#allocation42_spill] sm:$0xff] }
 0x27c   : > { %v3809_v27 = vpop.eup %3808  ;;  %3818 = vrcp.f32 %v1886_v20  ;;  %v2004_v56 = vmul.f32 %v3807_v35, %v5278_v38  ;;  %v1895_v31 = vpop.xlane.xlu0 %1894  ;;  %v5298_v38 = vld [vmem:[#allocation49_spill] sm:$0xff] }
 0x27d   : > { %3820 = vrcp.f32 %v1877_v48  ;;  %3502 = vmatprep.mubr.msk.bf16.mxu0 %vm1334_vm1, %v2059_v26  ;;  %v2002_v3 = vmul.f32 %v3809_v27, %v5277_v33  ;;  %v5295_v26 = vld [vmem:[#allocation47_spill] sm:$0xff] }
 0x27e   : > { %3822 = vrcp.f32 %v1883_v2  ;;  %3503 = vmatmul.mubr.msk.bf16.vlgmr.msra.gmra.mxu0 %vm1334_vm1, %v2060_v21  ;;  %v1880_v12 = vpop.xlane.xlu1 %1879  ;;  %v2062_v53 = vpack.c.bf16 %v2006_v17, %v2004_v56 }
 0x27f   : > { %3824 = vrcp.f32 %v1880_v12  ;;  %v2061_v41 = vpack.c.bf16 %v2002_v3, %v2000_v7  ;;  %3515 = vmatpush3.bf16.msra.mxu0 %v5272_v59  ;;  %v5289_v59 = vld [vmem:[#allocation40_spill] sm:$0xff]  ;;  %v5297_v3 = vld [vmem:[#allocation46_spill] sm:$0xff] }
 0x280   : > { %3516 = vmatprep.subr.bf16.mxu0 %v5279_v8  ;;  %v3811_v25 = vpop.eup %3810 }
 0x281   : > { %3510 = vmatprep.mubr.msk.bf16.mxu1 %vm1334_vm1, %v2061_v41  ;;  %v2014_v58 = vmul.f32 %v3811_v25, %v5282_v9 }
 0x282   : > { %3511 = vmatmul.mubr.msk.bf16.vlgmr.msra.gmra.mxu1 %vm1334_vm1, %v2062_v53  ;;  %v1898_v18 = vpop.xlane.xlu1 %1897  ;;  %v3813_v1 = vpop.eup %3812 }
 0x283   : > { %v1889_v55 = vpop.xlane.xlu0 %1888  ;;  %3517 = vmatpush3.bf16.msra.mxu0 %v5279_v8  ;;  %3523 = vmatpush3.bf16.msra.mxu1 %v5273_v47  ;;  %3826 = vrcp.f32 %v1898_v18  ;;  %v3815_v51 = vpop.eup %3814  ;;  %v2008_v42 = vmul.f32 %v3813_v1, %v5284_v10  ;;  %v5291_v47 = vld [vmem:[#allocation26_spill] sm:$0xff]  ;;  %v5299_v8 = vld [vmem:[#allocation48_spill] sm:$0xff] }
 0x284   : > { %3524 = vmatprep.subr.bf16.mxu1 %v5280_v57  ;;  %3530 = vmatprep.subr.bf16.mxu0 %v5281_v13  ;;  %3828 = vrcp.f32 %v1889_v55  ;;  %v2012_v28 = vmul.f32 %v3815_v51, %v5286_v62  ;;  %v5300_v55 = vld [vmem:[#allocation50_spill] sm:$0xff] }
 0x285   : > { %3830 = vrcp.f32 %v1895_v31 }
 0x286   : > { %v2064_v30 = vpack.c.bf16 %v2014_v58, %v2012_v28 }
 0x287   : > { %v1901_v52 = vpop.xlane.xlu0 %1900  ;;  %3525 = vmatpush3.bf16.msra.mxu1 %v5280_v57 }
 0x288   : > { %v3817_v22 = vpop.eup %3816  ;;  %v1892_v45 = vpop.xlane.xlu1 %1891  ;;  %3538 = vmatprep.subr.bf16.mxu1 %v5283_v15 }
 0x289   : > { %v3819_v11 = vpop.eup %3818  ;;  %3832 = vrcp.f32 %v1892_v45  ;;  %v2010_v39 = vmul.f32 %v3817_v22, %v5285_v6 }
 0x28a   : > { %v3821_v16 = vpop.eup %3820  ;;  %3834 = vrcp.f32 %v1901_v52  ;;  %v2022_v40 = vmul.f32 %v3819_v11, %v5287_v4 }
 0x28b   : > { %v3823_v36 = vpop.eup %3822  ;;  %v2063_v14 = vpack.c.bf16 %v2010_v39, %v2008_v42  ;;  %v1907_v43 = vpop.xlane.xlu0 %1906  ;;  %v2016_v61 = vmul.f32 %v3821_v16, %v5288_v0 }
 0x28c   : > { %v3825_v63 = vpop.eup %3824  ;;  %v1904_v2 = vpop.xlane.xlu1 %1903  ;;  %v2020_v20 = vmul.f32 %v3823_v36, %v5290_v24 }
 0x28d   : > { %3836 = vrcp.f32 %v1904_v2  ;;  %3518 = vmatprep.mubr.msk.bf16.mxu0 %vm1334_vm1, %v2063_v14  ;;  %v2018_v44 = vmul.f32 %v3825_v63, %v5289_v59 }
 0x28e   : > { %3519 = vmatmul.mubr.msk.bf16.vlgmr.msra.gmra.mxu0 %vm1334_vm1, %v2064_v30  ;;  %3838 = vrcp.f32 %v1907_v43  ;;  %v2066_v34 = vpack.c.bf16 %v2022_v40, %v2020_v20 }
 0x28f   : > { %v2065_v50 = vpack.c.bf16 %v2018_v44, %v2016_v61  ;;  %3531 = vmatpush3.bf16.msra.mxu0 %v5281_v13 }
 0x290   : > { %v1910_v49 = vpop.xlane.xlu1 %1909  ;;  %3532 = vmatprep.subr.bf16.mxu0 %v5291_v47  ;;  %v3827_v19 = vpop.eup %3826 }
 0x291   : > { %3840 = vrcp.f32 %v1910_v49  ;;  %3526 = vmatprep.mubr.msk.bf16.mxu1 %vm1334_vm1, %v2065_v50  ;;  %v3829_v48 = vpop.eup %3828  ;;  %v2030_v46 = vmul.f32 %v3827_v19, %v5293_v54 }
 0x292   : > { %3527 = vmatmul.mubr.msk.bf16.vlgmr.msra.gmra.mxu1 %vm1334_vm1, %v2066_v34  ;;  %v3831_v29 = vpop.eup %3830  ;;  %v2024_v35 = vmul.f32 %v3829_v48, %v5294_v37 }
 0x293   : > { %3533 = vmatpush3.bf16.msra.mxu0 %v5291_v47  ;;  %3539 = vmatpush3.bf16.msra.mxu1 %v5283_v15  ;;  %v2028_v17 = vmul.f32 %v3831_v29, %v5296_v60 }
 0x294   : > { %3540 = vmatprep.subr.bf16.mxu1 %v5292_v23 }
 0x295   : > { %v2068_v33 = vpack.c.bf16 %v2030_v46, %v2028_v17 }
 0x296   : > { %v3833_v32 = vpop.eup %3832 }
 0x297   : > { %v2026_v27 = vmul.f32 %v3833_v32, %v5295_v26  ;;  %3541 = vmatpush3.bf16.msra.mxu1 %v5292_v23  ;;  %v3835_v21 = vpop.eup %3834 }
 0x298   : > { %v2032_v12 = vmul.f32 %v3835_v21, %v5297_v3 }
 0x299   : > { %v2067_v5 = vpack.c.bf16 %v2026_v27, %v2024_v35 }
 0x29a   : > { %v3837_v7 = vpop.eup %3836 }
 0x29b   : > { %3534 = vmatprep.mubr.msk.bf16.mxu0 %vm1334_vm1, %v2067_v5  ;;  %v2034_v56 = vmul.f32 %v3837_v7, %v5298_v38  ;;  %v3839_v31 = vpop.eup %3838 }
 0x29c   : > { %3535 = vmatmul.mubr.msk.bf16.vlgmr.msra.gmra.mxu0 %vm1334_vm1, %v2068_v33  ;;  %v2036_v18 = vmul.f32 %v3839_v31, %v5299_v8 }
 0x29d   : > { %v2069_v41 = vpack.c.bf16 %v2034_v56, %v2032_v12 }
 0x29e   : > { %v3841_v53 = vpop.eup %3840 }
 0x29f   : > { %v2038_v57 = vmul.f32 %v3841_v53, %v5300_v55  ;;  %3542 = vmatprep.mubr.msk.bf16.mxu1 %vm1334_vm1, %v2069_v41 }
 0x2a1   : > { %v2070_v13 = vpack.c.bf16 %v2038_v57, %v2036_v18 }
 0x2a3   : > { %3543 = vmatmul.mubr.msk.bf16.vlgmr.msra.gmra.mxu1 %vm1334_vm1, %v2070_v13 }
 0x2ee   : > { %v3424_v25 = vpop.f32.mrf.mxu0 }
 0x2ef   : > { %2953 = vst.msk [vmem:[%s4947_s20 + $0x10] sm:$0xff] %vm357_vm0, %v3424_v25 }
 0x2f0   : > { %v2111_v1 = vpop.f32.mrf.mxu0 }
 0x2f1   : > { %2951 = vst.msk [vmem:[%s4947_s20] sm:$0xff] %vm357_vm0, %v2111_v1 }
 0x2f2   : > { %v3425_v51 = vpop.f32.mrf.mxu0  ;;  %v3432_v52 = vpop.f32.mrf.mxu1 }
 0x2f3   : > { %2954 = vst.msk [vmem:[%s4947_s20 + $0x18] sm:$0xff] %vm357_vm0, %v3425_v51  ;;  %2957 = vst.msk [vmem:[%s4947_s20 + $0x30] sm:$0xff] %vm357_vm0, %v3432_v52 }
 0x2f4   : > { %v2114_v22 = vpop.f32.mrf.mxu0  ;;  %v2166_v45 = vpop.f32.mrf.mxu1 }
 0x2f5   : > { %2952 = vst.msk [vmem:[%s4947_s20 + $0x8] sm:$0xff] %vm357_vm0, %v2114_v22  ;;  %2955 = vst.msk [vmem:[%s4947_s20 + $0x20] sm:$0xff] %vm357_vm0, %v2166_v45 }
 0x2f6   : > { %v3433_v9 = vpop.f32.mrf.mxu1 }
 0x2f7   : > { %2958 = vst.msk [vmem:[%s4947_s20 + $0x38] sm:$0xff] %vm357_vm0, %v3433_v9 }
 0x2f8   : > { %v2169_v58 = vpop.f32.mrf.mxu1 }
 0x2f9   : > { %2956 = vst.msk [vmem:[%s4947_s20 + $0x28] sm:$0xff] %vm357_vm0, %v2169_v58 }
 0x2fe   : > { %v3440_v15 = vpop.f32.mrf.mxu0 }
 0x2ff   : > { %2961 = vst.msk [vmem:[%s4947_s20 + $0x50] sm:$0xff] %vm357_vm0, %v3440_v15 }
 0x300   : > { %v2221_v11 = vpop.f32.mrf.mxu0 }
 0x301   : > { %2959 = vst.msk [vmem:[%s4947_s20 + $0x40] sm:$0xff] %vm357_vm0, %v2221_v11 }
 0x302   : > { %v3441_v10 = vpop.f32.mrf.mxu0  ;;  %v3448_v42 = vpop.f32.mrf.mxu1 }
 0x303   : > { %2962 = vst.msk [vmem:[%s4947_s20 + $0x58] sm:$0xff] %vm357_vm0, %v3441_v10  ;;  %2965 = vst.msk [vmem:[%s4947_s20 + $0x70] sm:$0xff] %vm357_vm0, %v3448_v42 }
 0x304   : > { %v2224_v6 = vpop.f32.mrf.mxu0  ;;  %v2276_v39 = vpop.f32.mrf.mxu1 }
 0x305   : > { %2960 = vst.msk [vmem:[%s4947_s20 + $0x48] sm:$0xff] %vm357_vm0, %v2224_v6  ;;  %2963 = vst.msk [vmem:[%s4947_s20 + $0x60] sm:$0xff] %vm357_vm0, %v2276_v39 }
 0x306   : > { %v3449_v16 = vpop.f32.mrf.mxu1 }
 0x307   : > { %2966 = vst.msk [vmem:[%s4947_s20 + $0x78] sm:$0xff] %vm357_vm0, %v3449_v16 }
 0x308   : > { %v2279_v62 = vpop.f32.mrf.mxu1 }
 0x309   : > { %2964 = vst.msk [vmem:[%s4947_s20 + $0x68] sm:$0xff] %vm357_vm0, %v2279_v62 }
 0x30e   : > { %v3456_v28 = vpop.f32.mrf.mxu0 }
 0x30f   : > { %2969 = vst.msk [vmem:[%s4947_s20 + $0x90] sm:$0xff] %vm357_vm0, %v3456_v28 }
 0x310   : > { %v2331_v36 = vpop.f32.mrf.mxu0 }
 0x311   : > { %2967 = vst.msk [vmem:[%s4947_s20 + $0x80] sm:$0xff] %vm357_vm0, %v2331_v36 }
 0x312   : > { %v3457_v14 = vpop.f32.mrf.mxu0  ;;  %v3464_v63 = vpop.f32.mrf.mxu1 }
 0x313   : > { %2970 = vst.msk [vmem:[%s4947_s20 + $0x98] sm:$0xff] %vm357_vm0, %v3457_v14  ;;  %2973 = vst.msk [vmem:[%s4947_s20 + $0xb0] sm:$0xff] %vm357_vm0, %v3464_v63 }
 0x314   : > { %v2334_v43 = vpop.f32.mrf.mxu0  ;;  %v2386_v2 = vpop.f32.mrf.mxu1 }
 0x315   : > { %2968 = vst.msk [vmem:[%s4947_s20 + $0x88] sm:$0xff] %vm357_vm0, %v2334_v43  ;;  %2971 = vst.msk [vmem:[%s4947_s20 + $0xa0] sm:$0xff] %vm357_vm0, %v2386_v2 }
 0x316   : > { %v3465_v30 = vpop.f32.mrf.mxu1 }
 0x317   : > { %2974 = vst.msk [vmem:[%s4947_s20 + $0xb8] sm:$0xff] %vm357_vm0, %v3465_v30 }
 0x318   : > { %v2389_v4 = vpop.f32.mrf.mxu1 }
 0x319   : > { %2972 = vst.msk [vmem:[%s4947_s20 + $0xa8] sm:$0xff] %vm357_vm0, %v2389_v4 }
 0x31e   : > { %v3472_v40 = vpop.f32.mrf.mxu0 }
 0x31f   : > { %2977 = vst.msk [vmem:[%s4947_s20 + $0xd0] sm:$0xff] %vm357_vm0, %v3472_v40 }
 0x320   : > { %v2441_v0 = vpop.f32.mrf.mxu0 }
 0x321   : > { %2975 = vst.msk [vmem:[%s4947_s20 + $0xc0] sm:$0xff] %vm357_vm0, %v2441_v0 }
 0x322   : > { %v3473_v61 = vpop.f32.mrf.mxu0  ;;  %v3480_v59 = vpop.f32.mrf.mxu1 }
 0x323   : > { %2978 = vst.msk [vmem:[%s4947_s20 + $0xd8] sm:$0xff] %vm357_vm0, %v3473_v61  ;;  %2981 = vst.msk [vmem:[%s4947_s20 + $0xf0] sm:$0xff] %vm357_vm0, %v3480_v59 }
 0x324   : > { %v2444_v44 = vpop.f32.mrf.mxu0  ;;  %v2496_v24 = vpop.f32.mrf.mxu1 }
 0x325   : > { %2976 = vst.msk [vmem:[%s4947_s20 + $0xc8] sm:$0xff] %vm357_vm0, %v2444_v44  ;;  %2979 = vst.msk [vmem:[%s4947_s20 + $0xe0] sm:$0xff] %vm357_vm0, %v2496_v24 }
 0x326   : > { %v3481_v20 = vpop.f32.mrf.mxu1 }
 0x327   : > { %2982 = vst.msk [vmem:[%s4947_s20 + $0xf8] sm:$0xff] %vm357_vm0, %v3481_v20 }
 0x328   : > { %v2499_v50 = vpop.f32.mrf.mxu1 }
 0x329   : > { %2980 = vst.msk [vmem:[%s4947_s20 + $0xe8] sm:$0xff] %vm357_vm0, %v2499_v50 }
 0x32e   : > { %v3488_v49 = vpop.f32.mrf.mxu0 }
 0x32f   : > { %2985 = vst.msk [vmem:[%s4947_s20 + $0x110] sm:$0xff] %vm357_vm0, %v3488_v49 }
 0x330   : > { %v2551_v34 = vpop.f32.mrf.mxu0 }
 0x331   : > { %2983 = vst.msk [vmem:[%s4947_s20 + $0x100] sm:$0xff] %vm357_vm0, %v2551_v34 }
 0x332   : > { %v3489_v47 = vpop.f32.mrf.mxu0  ;;  %v3496_v19 = vpop.f32.mrf.mxu1 }
 0x333   : > { %2986 = vst.msk [vmem:[%s4947_s20 + $0x118] sm:$0xff] %vm357_vm0, %v3489_v47  ;;  %2989 = vst.msk [vmem:[%s4947_s20 + $0x130] sm:$0xff] %vm357_vm0, %v3496_v19 }
 0x334   : > { %v2554_v48 = vpop.f32.mrf.mxu0  ;;  %v2606_v23 = vpop.f32.mrf.mxu1 }
 0x335   : > { %2984 = vst.msk [vmem:[%s4947_s20 + $0x108] sm:$0xff] %vm357_vm0, %v2554_v48  ;;  %2987 = vst.msk [vmem:[%s4947_s20 + $0x120] sm:$0xff] %vm357_vm0, %v2606_v23 }
 0x336   : > { %v3497_v29 = vpop.f32.mrf.mxu1 }
 0x337   : > { %2990 = vst.msk [vmem:[%s4947_s20 + $0x138] sm:$0xff] %vm357_vm0, %v3497_v29 }
 0x338   : > { %v2609_v32 = vpop.f32.mrf.mxu1 }
 0x339   : > { %2988 = vst.msk [vmem:[%s4947_s20 + $0x128] sm:$0xff] %vm357_vm0, %v2609_v32 }
 0x33e   : > { %v3504_v54 = vpop.f32.mrf.mxu0 }
 0x33f   : > { %2993 = vst.msk [vmem:[%s4947_s20 + $0x150] sm:$0xff] %vm357_vm0, %v3504_v54 }
 0x340   : > { %v2661_v46 = vpop.f32.mrf.mxu0 }
 0x341   : > { %2991 = vst.msk [vmem:[%s4947_s20 + $0x140] sm:$0xff] %vm357_vm0, %v2661_v46 }
 0x342   : > { %v3505_v37 = vpop.f32.mrf.mxu0  ;;  %v3512_v35 = vpop.f32.mrf.mxu1 }
 0x343   : > { %2994 = vst.msk [vmem:[%s4947_s20 + $0x158] sm:$0xff] %vm357_vm0, %v3505_v37  ;;  %2997 = vst.msk [vmem:[%s4947_s20 + $0x170] sm:$0xff] %vm357_vm0, %v3512_v35 }
 0x344   : > { %v2664_v26 = vpop.f32.mrf.mxu0  ;;  %v2716_v27 = vpop.f32.mrf.mxu1 }
 0x345   : > { %2992 = vst.msk [vmem:[%s4947_s20 + $0x148] sm:$0xff] %vm357_vm0, %v2664_v26  ;;  %2995 = vst.msk [vmem:[%s4947_s20 + $0x160] sm:$0xff] %vm357_vm0, %v2716_v27 }
 0x346   : > { %v3513_v21 = vpop.f32.mrf.mxu1 }
 0x347   : > { %2998 = vst.msk [vmem:[%s4947_s20 + $0x178] sm:$0xff] %vm357_vm0, %v3513_v21 }
 0x348   : > { %v2719_v60 = vpop.f32.mrf.mxu1 }
 0x349   : > { %2996 = vst.msk [vmem:[%s4947_s20 + $0x168] sm:$0xff] %vm357_vm0, %v2719_v60 }
 0x34e   : > { %v3520_v17 = vpop.f32.mrf.mxu0 }
 0x34f   : > { %3001 = vst.msk [vmem:[%s4947_s20 + $0x190] sm:$0xff] %vm357_vm0, %v3520_v17 }
 0x350   : > { %v2771_v5 = vpop.f32.mrf.mxu0 }
 0x351   : > { %2999 = vst.msk [vmem:[%s4947_s20 + $0x180] sm:$0xff] %vm357_vm0, %v2771_v5 }
 0x352   : > { %v3521_v7 = vpop.f32.mrf.mxu0  ;;  %v3528_v33 = vpop.f32.mrf.mxu1 }
 0x353   : > { %3002 = vst.msk [vmem:[%s4947_s20 + $0x198] sm:$0xff] %vm357_vm0, %v3521_v7  ;;  %3005 = vst.msk [vmem:[%s4947_s20 + $0x1b0] sm:$0xff] %vm357_vm0, %v3528_v33 }
 0x354   : > { %v2774_v3 = vpop.f32.mrf.mxu0  ;;  %v2826_v12 = vpop.f32.mrf.mxu1 }
 0x355   : > { %3000 = vst.msk [vmem:[%s4947_s20 + $0x188] sm:$0xff] %vm357_vm0, %v2774_v3  ;;  %3003 = vst.msk [vmem:[%s4947_s20 + $0x1a0] sm:$0xff] %vm357_vm0, %v2826_v12 }
 0x356   : > { %v3529_v38 = vpop.f32.mrf.mxu1 }
 0x357   : > { %3006 = vst.msk [vmem:[%s4947_s20 + $0x1b8] sm:$0xff] %vm357_vm0, %v3529_v38 }
 0x358   : > { %v2829_v56 = vpop.f32.mrf.mxu1 }
 0x359   : > { %3004 = vst.msk [vmem:[%s4947_s20 + $0x1a8] sm:$0xff] %vm357_vm0, %v2829_v56 }
 0x35c   : > { %v3536_v31 = vpop.f32.mrf.mxu0 }
 0x35d   : > { %3009 = vst.msk [vmem:[%s4947_s20 + $0x1d0] sm:$0xff] %vm357_vm0, %v3536_v31 }
 0x35e   : > { %v2881_v41 = vpop.f32.mrf.mxu0 }
 0x35f   : > { %3007 = vst.msk [vmem:[%s4947_s20 + $0x1c0] sm:$0xff] %vm357_vm0, %v2881_v41 }
 0x360   : > { %v3537_v53 = vpop.f32.mrf.mxu0 }
 0x361   : > { %3010 = vst.msk [vmem:[%s4947_s20 + $0x1d8] sm:$0xff] %vm357_vm0, %v3537_v53 }
 0x362   : > { %v2884_v8 = vpop.f32.mrf.mxu0 }
 0x363   : > { %3008 = vst.msk [vmem:[%s4947_s20 + $0x1c8] sm:$0xff] %vm357_vm0, %v2884_v8  ;;  %v3544_v18 = vpop.f32.mrf.mxu1 }
 0x364   : > { %3013 = vst.msk [vmem:[%s4947_s20 + $0x1f0] sm:$0xff] %vm357_vm0, %v3544_v18 }
 0x365   : > { %v2936_v55 = vpop.f32.mrf.mxu1 }
 0x366   : > { %3011 = vst.msk [vmem:[%s4947_s20 + $0x1e0] sm:$0xff] %vm357_vm0, %v2936_v55 }
 0x367   : > { %v3545_v57 = vpop.f32.mrf.mxu1 }
 0x368   : > { %3014 = vst.msk [vmem:[%s4947_s20 + $0x1f8] sm:$0xff] %vm357_vm0, %v3545_v57 }
 0x369   : > { %v2939_v13 = vpop.f32.mrf.mxu1 }
 0x36a   : > { %3012 = vst.msk [vmem:[%s4947_s20 + $0x1e8] sm:$0xff] %vm357_vm0, %v2939_v13 }
 0x36b PF: > { %s12_s9 = sadd.s32 1, %s3848_s9  }
 0x36c   : > { %p9_p4 = scmp.ge.s32.totalorder %s12_s9, 4  }
 0x36e   :  { %11 = sbr.rel (!%p9_p4) target bundleno = 1 (0x1), region = 61 }

// kernel: body_han1_forward.5
= control target key start
LH: loop header
LB: loop body
LE: loop exit
PB: predicated region body
PF: predicated region fallthrough
CT: control target
= control target key end

     0   :  { %s2132_s23 = smov 0   ;;  %s2621_s0 = inlined_call_operand.<no memory space> [shape: f32[1], index: 0, kind: input, shape index: {}]   ;;  %s2622_s1 = inlined_call_operand.vmem [shape: f32[2,32,256], index: 1, kind: input, shape index: {}]   ;;  %s2623_s2 = inlined_call_operand.vmem [shape: f32[2,32,256], index: 2, kind: input, shape index: {}]   ;;  %s2624_s3 = inlined_call_operand.vmem [shape: f32[2,32,256], index: 3, kind: input, shape index: {}]   ;;  %s2625_s4 = inlined_call_operand.vmem [shape: bf16[9,32,32], index: 4, kind: input, shape index: {}]   ;;  %s2626_s5 = inlined_call_operand.vmem [shape: f32[32,1], index: 5, kind: input, shape index: {}]   ;;  %s2627_s6 = inlined_call_operand.vmem [shape: f32[2,32,256], index: 6, kind: output, shape index: {}]  }
   0x1   :  { %11 = sst [smem:[#allocation3]] %s2621_s0 }
   0x2 LB: > { %s1671_s24 = sadd.s32 4294967295, %s2081_s23   ;;  %p1675_p0 = scmp.ge.s32.totalorder %s2081_s23, 1  ;;  %s2081_s23 = sphi %s2132_s23, %s17_s23  }
   0x3   : > { %p233_p1 = scmp.lt.s32.totalorder %s2081_s23, 3 }
   0x5   : > { %p234_p2 = pnand %p1675_p0, %p233_p1 }
   0x7   : > { %237 = sbr.rel (%p234_p2) target bundleno = 592 (0x250), region = 44 }
   0xc   : > { %p273_p3 = scmp.lt.s32.totalorder %s1671_s24, 1  ;;  %s294_s25 = sld [smem:[#allocation3]]  ;;  %vm344_vm0 = vcmask 138240   ;;  %v2083_v0 = vmov 0.0   ;;  %vm349_vm1 = vcmask 277640   ;;  %vm394_vm2 = vcmask 1047688  }
   0xd   : > { %348 = vst.msk [vmem:[#allocation2 + $0x48] sm:$0xff] %vm344_vm0, %v2083_v0  ;;  %345 = vst.msk [vmem:[#allocation2] sm:$0xff] %vm344_vm0, %v2083_v0  ;;  %s2084_s11 = smov 17   ;;  %s2085_s12 = smov 126   ;;  %vm509_vm3 = vcmask 1039360   ;;  %vm687_vm4 = vcmask 1031168  }
   0xe   : > { %346 = vst.msk [vmem:[#allocation2 + $0x18] sm:$0xff] %vm344_vm0, %v2083_v0  ;;  %347 = vst.msk [vmem:[#allocation2 + $0x30] sm:$0xff] %vm344_vm0, %v2083_v0  ;;  %s2643_s24 = smov (!%p273_p3, %s1671_s24), 1  ;;  %s2086_s13 = smov 112   ;;  %vm518_vm11 = vcmask 261120   ;;  %vm822_vm14 = vcmask 916480  }
   0xf   : > { %353 = vst.msk [vmem:[#allocation2 + $0x58] sm:$0xff] %vm349_vm1, %v2083_v0  ;;  %350 = vst.msk [vmem:[#allocation2 + $0x10] sm:$0xff] %vm349_vm1, %v2083_v0  ;;  %s2144_s0 = sshll.u32 %s2643_s24, 6  ;;  %s2087_s14 = smov 127   ;;  %vm1060_vm15 = vcmask 900096  }
  0x10   : > { %351 = vst.msk [vmem:[#allocation2 + $0x28] sm:$0xff] %vm349_vm1, %v2083_v0  ;;  %352 = vst.msk [vmem:[#allocation2 + $0x40] sm:$0xff] %vm349_vm1, %v2083_v0  ;;  %s2150_s28 = scalar_lea.vmem %s2622_s1, %s2144_s0  ;;  %s2156_s7 = scalar_lea.vmem %s2623_s2, %s2144_s0  ;;  %vm960_vm1 = vcmask 908288  }
  0x11   : > { %s2162_s10 = scalar_lea.vmem %s2624_s3, %s2144_s0  ;;  %v301_v1 = vld [vmem:[%s2156_s7 + $0x30] sm:$0xff]  ;;  %v299_v2 = vld [vmem:[%s2156_s7 + $0x20] sm:$0xff]  ;;  %v302_v9 = vld [vmem:[%s2156_s7 + $0x38] sm:$0xff]  ;;  %s2089_s15 = smov 111  }
  0x12   : > { %v309_v3 = vld [vmem:[%s2162_s10 + $0x30] sm:$0xff]  ;;  %v319_v4 = vstv %s294_s25  ;;  %v307_v5 = vld [vmem:[%s2162_s10 + $0x20] sm:$0xff]  ;;  %v310_v10 = vld [vmem:[%s2162_s10 + $0x38] sm:$0xff]  ;;  %s2090_s16 = smov 110   ;;  %s2091_s17 = smov 96  }
  0x13   : > { %v317_v6 = vadd.f32 %v309_v3, %v301_v1  ;;  %v334_v7 = vld [vmem:[%s2150_s28 + $0x30] sm:$0xff]  ;;  %v315_v8 = vadd.f32 %v307_v5, %v299_v2  ;;  %v332_v11 = vld [vmem:[%s2150_s28 + $0x20] sm:$0xff]  ;;  %v318_v12 = vadd.f32 %v310_v10, %v302_v9  ;;  %v300_v13 = vld [vmem:[%s2156_s7 + $0x28] sm:$0xff]  ;;  %s2092_s18 = smov 94   ;;  %s2093_s19 = smov 95  }
  0x14   : > { %v308_v14 = vld [vmem:[%s2162_s10 + $0x28] sm:$0xff]  ;;  %v335_v17 = vld [vmem:[%s2150_s28 + $0x38] sm:$0xff]  ;;  %v295_v24 = vld [vmem:[%s2156_s7] sm:$0xff]  ;;  %s2604_s20 = scalar_lea.vmem %s2627_s6, %s2144_s0 }
  0x15   : > { %v326_v15 = vmul.f32 %v319_v4, %v317_v6  ;;  %v324_v16 = vmul.f32 %v319_v4, %v315_v8  ;;  %v316_v18 = vadd.f32 %v308_v14, %v300_v13  ;;  %v296_v19 = vld [vmem:[%s2156_s7 + $0x8] sm:$0xff]  ;;  %v327_v21 = vmul.f32 %v319_v4, %v318_v12  ;;  %v303_v25 = vld [vmem:[%s2162_s10] sm:$0xff]  ;;  %v298_v31 = vld [vmem:[%s2156_s7 + $0x18] sm:$0xff] }
  0x16   : > { %v304_v20 = vld [vmem:[%s2162_s10 + $0x8] sm:$0xff]  ;;  %v311_v30 = vadd.f32 %v303_v25, %v295_v24  ;;  %v306_v32 = vld [vmem:[%s2162_s10 + $0x18] sm:$0xff]  ;;  %v328_v35 = vld [vmem:[%s2150_s28] sm:$0xff] }
  0x17   : > { %v333_v22 = vld [vmem:[%s2150_s28 + $0x28] sm:$0xff]  ;;  %v312_v23 = vadd.f32 %v304_v20, %v296_v19  ;;  %v342_v26 = vadd.f32 %v334_v7, %v326_v15  ;;  %v340_v27 = vadd.f32 %v332_v11, %v324_v16  ;;  %v325_v28 = vmul.f32 %v319_v4, %v316_v18  ;;  %v297_v37 = vld [vmem:[%s2156_s7 + $0x10] sm:$0xff]  ;;  %v331_v43 = vld [vmem:[%s2150_s28 + $0x18] sm:$0xff] }
  0x18   : > { %v329_v29 = vld [vmem:[%s2150_s28 + $0x8] sm:$0xff]  ;;  %v343_v33 = vadd.f32 %v335_v17, %v327_v21  ;;  %v314_v36 = vadd.f32 %v306_v32, %v298_v31  ;;  %v305_v38 = vld [vmem:[%s2162_s10 + $0x10] sm:$0xff]  ;;  %v320_v40 = vmul.f32 %v319_v4, %v311_v30  ;;  %v2088_v17 = vmov 0   ;;  %v1544_v19 = vld [vmem:[%s2626_s5] sm:$0xff] }
  0x19   : > { %v321_v34 = vmul.f32 %v319_v4, %v312_v23  ;;  %374 = vrot.lane.b32.xlu1 %v342_v26, %s2084_s11  ;;  %370 = vrot.lane.b32.xlu0 %v340_v27, %s2084_s11  ;;  %v341_v39 = vadd.f32 %v333_v22, %v325_v28  ;;  %v313_v41 = vadd.f32 %v305_v38, %v297_v37  ;;  %v330_v44 = vld [vmem:[%s2150_s28 + $0x10] sm:$0xff]  ;;  %v1545_v20 = vld [vmem:[%s2626_s5 + $0x8] sm:$0xff] }
  0x1a   : > { %v336_v45 = vadd.f32 %v328_v35, %v320_v40  ;;  %v323_v46 = vmul.f32 %v319_v4, %v314_v36  ;;  %567 = vmatprep.mubr.bf16.mxu1 %v2088_v17  ;;  %557 = vmatprep.mubr.bf16.mxu0 %v2088_v17  ;;  %v1546_v21 = vld [vmem:[%s2626_s5 + $0x10] sm:$0xff]  ;;  %v1547_v22 = vld [vmem:[%s2626_s5 + $0x18] sm:$0xff] }
  0x1b   : > { %v337_v42 = vadd.f32 %v329_v29, %v321_v34  ;;  %v322_v47 = vmul.f32 %v319_v4, %v313_v41  ;;  %2055 = vset.pattern.permute.xlu0 %v2088_v17  ;;  %2056 = vset.pattern.permute.xlu1 %v2088_v17  ;;  %v407_v34 = vlaneseq }
  0x1c   : > { %v339_v48 = vadd.f32 %v331_v43, %v323_v46 }
  0x1d   : > { %376 = vrot.lane.b32.xlu1 %v343_v33, %s2084_s11  ;;  %372 = vrot.lane.b32.xlu0 %v341_v39, %s2084_s11  ;;  %v338_v49 = vadd.f32 %v330_v44, %v322_v47  ;;  %v408_v37 = vand.u32 127, %v407_v34 }
  0x1f   : > { %v409_v41 = vadd.s32 128, %v408_v37 }
  0x21   : > { %364 = vrot.lane.b32.xlu1 %v337_v42, %s2084_s11  ;;  %362 = vrot.lane.b32.xlu0 %v336_v45, %s2084_s11  ;;  %v421_v45 = vand.u32 15, %v409_v41 }
  0x23   : > { %vm1878_vm5 = vcmp.ne.s32.totalorder %v421_v45, 0  ;;  %vm1880_vm6 = vcmp.ne.s32.totalorder %v421_v45, 15  ;;  %v2059_v45 = vld [vmem:[%s2625_s4] sm:$0xff]  }
  0x24   : > { %vm2300_vm7 = vmpackc.low %vm1878_vm5, %vm1878_vm5 }
  0x25   : > { %368 = vrot.lane.b32.xlu1 %v339_v48, %s2084_s11  ;;  %366 = vrot.lane.b32.xlu0 %v338_v49, %s2084_s11  ;;  %vm2316_vm10 = vmpackc.low %vm1880_vm6, %vm1880_vm6 }
  0x8b   : > { %v375_v50 = vpop.permute.xlu1 %374  ;;  %v371_v51 = vpop.permute.xlu0 %370 }
  0x8c   : > { %404 = vst.msk [vmem:[#allocation2 + $0x48] sm:$0xff] %vm394_vm2, %v375_v50  ;;  %401 = vst.msk [vmem:[#allocation2 + $0x30] sm:$0xff] %vm394_vm2, %v371_v51 }
  0x8f   : > { %v377_v52 = vpop.permute.xlu1 %376  ;;  %v373_v53 = vpop.permute.xlu0 %372 }
  0x90   : > { %v381_v54 = vsel %vm344_vm0, %v375_v50, %v377_v52  ;;  %406 = vst.msk [vmem:[#allocation2 + $0x58] sm:$0xff] %vm344_vm0, %v377_v52  ;;  %v380_v55 = vsel %vm344_vm0, %v371_v51, %v373_v53  ;;  %403 = vst.msk [vmem:[#allocation2 + $0x40] sm:$0xff] %vm344_vm0, %v373_v53  ;;  %v414_v52 = vand.u32 15, %v408_v37 }
  0x91   : > { %v2216_v14 = vpack.c.bf16 %v381_v54, %v380_v55 }
  0x92   : > { %vm2304_vm8 = vcmp.ne.s32.totalorder %v414_v52, 0  ;;  %vm2308_vm9 = vcmp.ne.s32.totalorder %v414_v52, 15 }
  0x93   : > { %v365_v56 = vpop.permute.xlu1 %364  ;;  %v363_v57 = vpop.permute.xlu0 %362  ;;  %v442_v58 = vld [vmem:[#allocation2 + $0x30] sm:$0xff]  ;;  %v444_v59 = vld [vmem:[#allocation2 + $0x48] sm:$0xff]  ;;  %vm2334_vm12 = vmpackc.low %vm2304_vm8, %vm2304_vm8 }
  0x94   : > { %397 = vst.msk [vmem:[#allocation2 + $0x10] sm:$0xff] %vm344_vm0, %v365_v56  ;;  %v378_v60 = vsel %vm344_vm0, %v363_v57, %v365_v56  ;;  %v2197_v61 = vpack.i.bf16 %v444_v59, %v442_v58  ;;  %v2212_v12 = vpack.c.bf16 %v444_v59, %v442_v58  ;;  %vm2353_vm13 = vmpackc.low %vm2308_vm9, %vm2308_vm9 }
  0x95   : > { %395 = vst.msk [vmem:[#allocation2] sm:$0xff] %vm394_vm2, %v363_v57 }
  0x96   : > { %1906 = vrot.lane.b32.xlu0 %v2197_v61, %s2085_s12 }
  0x97   : > { %v369_v62 = vpop.permute.xlu1 %368  ;;  %v367_v63 = vpop.permute.xlu0 %366  ;;  %v468_v1 = vld [vmem:[#allocation2 + $0x40] sm:$0xff]  ;;  %v469_v8 = vld [vmem:[#allocation2 + $0x58] sm:$0xff] }
  0x98   : > { %400 = vst.msk [vmem:[#allocation2 + $0x28] sm:$0xff] %vm344_vm0, %v369_v62  ;;  %v379_v0 = vsel %vm344_vm0, %v367_v63, %v369_v62  ;;  %v1920_v2 = vpack.i.bf16 %v468_v1, %v380_v55  ;;  %v1925_v9 = vpack.i.bf16 %v469_v8, %v381_v54  ;;  %v480_v15 = vpack.c.bf16 %v469_v8, %v468_v1  ;;  %v2058_v8 = vld [vmem:[%s2625_s4 + $0x10] sm:$0xff]  }
  0x99   : > { %398 = vst.msk [vmem:[#allocation2 + $0x18] sm:$0xff] %vm394_vm2, %v367_v63  ;;  %v2232_v18 = vpack.c.bf16 %v379_v0, %v378_v60  ;;  %vm1195_vm0 = vcmask 785408   ;;  %vm1333_vm2 = vcmask 777216  }
  0x9a   : > { %1916 = vrot.lane.b32.xlu0 %v2197_v61, %s2086_s13 }
  0x9b   : > { %v466_v10 = vld [vmem:[#allocation2 + $0x10] sm:$0xff] }
  0x9c   : > { %v438_v3 = vld [vmem:[#allocation2] sm:$0xff]  ;;  %v1930_v11 = vpack.i.bf16 %v466_v10, %v378_v60  ;;  %v2067_v60 = vld [vmem:[%s2625_s4 + $0x50] sm:$0xff]  }
  0x9e   : > { %1921 = vrot.lane.b32.xlu0 %v1920_v2, %s2085_s12 }
  0x9f   : > { %v467_v5 = vld [vmem:[#allocation2 + $0x28] sm:$0xff] }
  0xa0   : > { %v440_v4 = vld [vmem:[#allocation2 + $0x18] sm:$0xff]  ;;  %v2207_v7 = vpack.i.bf16 %v467_v5, %v379_v0  ;;  %v477_v13 = vpack.c.bf16 %v467_v5, %v466_v10 }
  0xa1   : > { %v2205_v6 = vpack.i.bf16 %v440_v4, %v438_v3  ;;  %v2222_v16 = vpack.c.bf16 %v440_v4, %v438_v3  ;;  %v2074_v3 = vld [vmem:[%s2625_s4 + $0x88] sm:$0xff]  }
  0xa2   : > { %1936 = vrot.lane.b32.xlu0 %v2207_v7, %s2085_s12 }
  0xa3   : > { %1911 = vrot.lane.b32.xlu1 %v2205_v6, %s2085_s12 }
  0xa6   : > { %1941 = vrot.lane.b32.xlu0 %v1920_v2, %s2086_s13 }
  0xa7   : > { %1926 = vrot.lane.b32.xlu1 %v1925_v9, %s2085_s12 }
  0xaa   : > { %503 = vrot.lane.b32.xlu0 %v2212_v12, %s2087_s14 }
  0xab   : > { %1931 = vrot.lane.b32.xlu1 %v1930_v11, %s2085_s12 }
  0xae   : > { %501 = vrot.lane.b32.xlu0 %v477_v13, %s2087_s14 }
  0xaf   : > { %1946 = vrot.lane.b32.xlu1 %v1925_v9, %s2086_s13 }
  0xb2   : > { %505 = vrot.lane.b32.xlu0 %v2216_v14, %s2087_s14 }
  0xb3   : > { %1951 = vrot.lane.b32.xlu1 %v1930_v11, %s2086_s13 }
  0xb6   : > { %1956 = vrot.lane.b32.xlu0 %v2207_v7, %s2086_s13 }
  0xb7   : > { %507 = vrot.lane.b32.xlu1 %v480_v15, %s2087_s14 }
  0xba   : > { %958 = vrot.lane.b32.xlu0 %v480_v15, %s2089_s15 }
  0xbb   : > { %497 = vrot.lane.b32.xlu1 %v2222_v16, %s2087_s14 }
  0xbe   : > { %954 = vrot.lane.b32.xlu0 %v2212_v12, %s2089_s15 }
  0xbf   : > { %1961 = vrot.lane.b32.xlu1 %v2205_v6, %s2086_s13 }
  0xc2   : > { %952 = vrot.lane.b32.xlu0 %v477_v13, %s2089_s15 }
  0xc3   : > { %499 = vrot.lane.b32.xlu1 %v2232_v18, %s2087_s14 }
  0xc6   : > { %1966 = vrot.lane.b32.xlu0 %v1920_v2, %s2090_s16 }
  0xc7   : > { %948 = vrot.lane.b32.xlu1 %v2222_v16, %s2089_s15 }
  0xca   : > { %1976 = vrot.lane.b32.xlu0 %v2197_v61, %s2090_s16 }
  0xcb   : > { %1971 = vrot.lane.b32.xlu1 %v1925_v9, %s2090_s16 }
  0xce   : > { %1986 = vrot.lane.b32.xlu0 %v1925_v9, %s2091_s17 }
  0xcf   : > { %1981 = vrot.lane.b32.xlu1 %v1920_v2, %s2091_s17 }
  0xd2   : > { %1996 = vrot.lane.b32.xlu0 %v1930_v11, %s2090_s16 }
  0xd3   : > { %1991 = vrot.lane.b32.xlu1 %v2197_v61, %s2091_s17 }
  0xd6   : > { %2006 = vrot.lane.b32.xlu0 %v2205_v6, %s2090_s16 }
  0xd7   : > { %2001 = vrot.lane.b32.xlu1 %v2207_v7, %s2090_s16 }
  0xda   : > { %2016 = vrot.lane.b32.xlu0 %v2207_v7, %s2091_s17 }
  0xdb   : > { %956 = vrot.lane.b32.xlu1 %v2216_v14, %s2089_s15 }
  0xde   : > { %2026 = vrot.lane.b32.xlu0 %v1920_v2, %s2092_s18 }
  0xdf   : > { %950 = vrot.lane.b32.xlu1 %v2232_v18, %s2089_s15 }
  0xe2   : > { %1327 = vrot.lane.b32.xlu0 %v2212_v12, %s2093_s19 }
  0xe3   : > { %2011 = vrot.lane.b32.xlu1 %v1930_v11, %s2091_s17 }
  0xe6   : > { %2041 = vrot.lane.b32.xlu0 %v1930_v11, %s2092_s18 }
  0xe7   : > { %2021 = vrot.lane.b32.xlu1 %v2205_v6, %s2091_s17 }
  0xea   : > { %1329 = vrot.lane.b32.xlu0 %v2216_v14, %s2093_s19 }
  0xeb   : > { %1331 = vrot.lane.b32.xlu1 %v480_v15, %s2093_s19 }
  0xee   : > { %1323 = vrot.lane.b32.xlu0 %v2232_v18, %s2093_s19 }
  0xef   : > { %2031 = vrot.lane.b32.xlu1 %v1925_v9, %s2092_s18 }
  0xf2   : > { %1321 = vrot.lane.b32.xlu0 %v2222_v16, %s2093_s19 }
  0xf3   : > { %2036 = vrot.lane.b32.xlu1 %v2197_v61, %s2092_s18 }
  0xf6   : > { %1550 = vperm.xlu0 %2055, %v1544_v19  }
  0xf7   : > { %1325 = vrot.lane.b32.xlu1 %v477_v13, %s2093_s19 }
  0xfa   : > { %1565 = vperm.xlu0 %2055, %v1547_v22  }
  0xfb   : > { %2046 = vrot.lane.b32.xlu1 %v2207_v7, %s2092_s18  ;;  %v2057_v7 = vld [vmem:[%s2625_s4 + $0x18] sm:$0xff]  }
  0xff   : > { %2051 = vrot.lane.b32.xlu1 %v2205_v6, %s2092_s18 }
 0x103   : > { %1555 = vperm.xlu1 %2056, %v1545_v20  }
 0x107   : > { %1560 = vperm.xlu1 %2056, %v1546_v21  }
 0x108   : > { %v2263_v23 = vpop.permute.xlu0 %1906 }
 0x109   : > { %v1909_v56 = vunpack.i.h.bf16 %v2263_v23  ;;  %v1908_v4 = vunpack.i.l.bf16 %v2263_v23 }
 0x10c   : > { %v2265_v24 = vpop.permute.xlu0 %1916 }
 0x10d   : > { %v1918_v34 = vunpack.i.l.bf16 %v2265_v24 }
 0x110   : > { %v2267_v25 = vpop.permute.xlu0 %1921 }
 0x111   : > { %v1924_v48 = vunpack.i.h.bf16 %v2267_v25  ;;  %v1923_v49 = vunpack.i.l.bf16 %v2267_v25 }
 0x113   : > { %v693_v57 = vsel %vm687_vm4, %v1923_v49, %v1924_v48  ;;  %v692_v15 = vsel %vm687_vm4, %v1908_v4, %v1923_v49  ;;  %v2061_v4 = vld [vmem:[%s2625_s4 + $0x8] sm:$0xff]  }
 0x114   : > { %v2271_v27 = vpop.permute.xlu0 %1936 }
 0x115   : > { %v2269_v26 = vpop.permute.xlu1 %1911  ;;  %v1939_v63 = vunpack.i.h.bf16 %v2271_v27  ;;  %v1938_v0 = vunpack.i.l.bf16 %v2271_v27 }
 0x116   : > { %v1914_v19 = vunpack.i.h.bf16 %v2269_v26  ;;  %v1913_v20 = vunpack.i.l.bf16 %v2269_v26 }
 0x117   : > { %v691_v25 = vsel %vm687_vm4, %v1938_v0, %v1939_v63 }
 0x118   : > { %v2273_v29 = vpop.permute.xlu0 %1941 }
 0x119   : > { %v1927_v28 = vpop.permute.xlu1 %1926  ;;  %v1944_v27 = vunpack.i.h.bf16 %v2273_v29 }
 0x11a   : > { %v1929_v46 = vunpack.i.h.bf16 %v1927_v28  ;;  %v1928_v47 = vunpack.i.l.bf16 %v1927_v28  ;;  %v1943_v28 = vunpack.i.l.bf16 %v2273_v29  ;;  %v1919_v29 = vunpack.i.h.bf16 %v2265_v24 }
 0x11c   : > { %v504_v31 = vpop.permute.xlu0 %503  ;;  %v695_v53 = vsel %vm687_vm4, %v1928_v47, %v1929_v46  ;;  %v694_v5 = vsel %vm687_vm4, %v1909_v56, %v1928_v47  ;;  %v2060_v46 = vld [vmem:[%s2625_s4 + $0x20] sm:$0xff]   ;;  %v827_v49 = vsel %vm822_vm14, %v1918_v34, %v1943_v28 }
 0x11d   : > { %v2275_v30 = vpop.permute.xlu1 %1931  ;;  %v1725_v6 = vpack.c.bf16 %v695_v53, %v693_v57  ;;  %v1730_v26 = vpack.c.bf16 %v694_v5, %v692_v15  ;;  %v2062_v5 = vld [vmem:[%s2625_s4 + $0x28] sm:$0xff]  }
 0x11e   : > { %v1934_v54 = vunpack.i.h.bf16 %v2275_v30  ;;  %v1933_v55 = vunpack.i.l.bf16 %v2275_v30 }
 0x120   : > { %v502_v33 = vpop.permute.xlu0 %501  ;;  %v689_v9 = vsel %vm687_vm4, %v1933_v55, %v1934_v54 }
 0x121   : > { %v2277_v32 = vpop.permute.xlu1 %1946  ;;  %v1735_v30 = vpack.c.bf16 %v691_v25, %v689_v9 }
 0x122   : > { %v1949_v10 = vunpack.i.h.bf16 %v2277_v32  ;;  %v1948_v11 = vunpack.i.l.bf16 %v2277_v32 }
 0x124   : > { %v506_v36 = vpop.permute.xlu0 %505  ;;  %v829_v24 = vsel %vm822_vm14, %v1919_v29, %v1948_v11 }
 0x125   : > { %v2279_v35 = vpop.permute.xlu1 %1951  ;;  %v512_v42 = vsel %vm509_vm3, %v504_v31, %v506_v36  ;;  %v830_v31 = vsel %vm822_vm14, %v1948_v11, %v1949_v10  ;;  %v1758_v53 = vpack.c.bf16 %v829_v24, %v827_v49 }
 0x126   : > { %v1953_v41 = vunpack.i.l.bf16 %v2279_v35 }
 0x128   : > { %v2281_v39 = vpop.permute.xlu0 %1956 }
 0x129   : > { %v508_v38 = vpop.permute.xlu1 %507  ;;  %v1959_v32 = vunpack.i.h.bf16 %v2281_v39 }
 0x12a   : > { %v513_v40 = vsel %vm509_vm3, %v506_v36, %v508_v38  ;;  %v690_v36 = vsel %vm687_vm4, %v1914_v19, %v1938_v0 }
 0x12b   : > { %537 = vmatprep.subr.bf16.mxu0 %v513_v40  ;;  %1882 = vmatprep.subr.bf16.mxu1 %v513_v40  ;;  %v1954_v40 = vunpack.i.h.bf16 %v2279_v35 }
 0x12c   : > { %538 = vmatpush1.bf16.msra.mxu0 %v512_v42  ;;  %1884 = vmatpush1.bf16.msra.mxu1 %v512_v42  ;;  %v2285_v44 = vpop.permute.xlu0 %958 }
 0x12d   : > { %v498_v43 = vpop.permute.xlu1 %497  ;;  %v824_v54 = vsel %vm822_vm14, %v1953_v41, %v1954_v40 }
 0x130   : > { %v2291_v51 = vpop.permute.xlu0 %954 }
 0x131   : > { %v2289_v50 = vpop.permute.xlu1 %1961 }
 0x134   : > { %v2298_v59 = vpop.permute.xlu0 %952 }
 0x135   : > { %v500_v58 = vpop.permute.xlu1 %499 }
 0x136   : > { %v511_v1 = vsel %vm509_vm3, %v500_v58, %v502_v33  ;;  %v510_v2 = vsel %vm509_vm3, %v498_v43, %v500_v58  ;;  %v1958_v33 = vunpack.i.l.bf16 %v2281_v39  ;;  %v1963_v43 = vunpack.i.l.bf16 %v2289_v50 }
 0x137   : > { %539 = vmatprep.subr.bf16.mxu0 %v511_v1  ;;  %1883 = vmatprep.subr.bf16.mxu1 %v511_v1  ;;  %vm1433_vm3 = vcmask 769024  }
 0x138   : > { %540 = vmatpush1.bf16.msra.mxu0 %v510_v2  ;;  %1885 = vmatpush1.bf16.msra.mxu1 %v510_v2  ;;  %v2348_v22 = vpop.permute.xlu0 %1966  ;;  %v826_v35 = vsel %vm822_vm14, %v1958_v33, %v1959_v32  ;;  %v823_v57 = vsel %vm822_vm14, %v1963_v43, %v1953_v41 }
 0x139   : > { %v2341_v21 = vpop.permute.xlu1 %948  ;;  %1698 = vmatprep.subr.msk.bf16.mxu1 %vm2300_vm7, %v2216_v14  ;;  %1726 = vmatprep.subr.msk.bf16.mxu0 %vm2316_vm10, %v1725_v6  ;;  %v688_v14 = vsel %vm687_vm4, %v1913_v20, %v1933_v55  ;;  %v1969_v55 = vunpack.i.h.bf16 %v2348_v22  ;;  %v1968_v56 = vunpack.i.l.bf16 %v2348_v22 }
 0x13a   : > { %v1740_v39 = vpack.c.bf16 %v690_v36, %v688_v14 }
 0x13b   : > { %1691 = vmatmul.mubr.msk.bf16.vlgmr.msra.gmra.mxu1 %vm518_vm11, %v2057_v7  ;;  %1690 = vmatmul.mubr.msk.bf16.vlgmr.msra.gmra.mxu0 %vm518_vm11, %v2058_v8  ;;  %v1066_v1 = vsel %vm1060_vm15, %v1968_v56, %v1969_v55 }
 0x13c   : > { %1703 = vmatpush1.bf16.msk.msra.mxu1 %vm2334_vm12, %v2212_v12  ;;  %1731 = vmatpush1.bf16.msk.msra.mxu0 %vm2353_vm13, %v1730_v26  ;;  %v1977_v38 = vpop.permute.xlu0 %1976  ;;  %v828_v12 = vsel %vm822_vm14, %v1943_v28, %v1944_v27 }
 0x13d   : > { %v2374_v37 = vpop.permute.xlu1 %1971  ;;  %1708 = vmatprep.subr.msk.bf16.mxu1 %vm2300_vm7, %v2232_v18  ;;  %1736 = vmatprep.subr.msk.bf16.mxu0 %vm2316_vm10, %v1735_v30  ;;  %v1753_v42 = vpack.c.bf16 %v830_v31, %v828_v12  ;;  %v1964_v18 = vunpack.i.h.bf16 %v2289_v50  ;;  %v1979_v6 = vunpack.i.h.bf16 %v1977_v38  ;;  %v1978_v7 = vunpack.i.l.bf16 %v1977_v38  ;;  %v2063_v12 = vld [vmem:[%s2625_s4 + $0x30] sm:$0xff]  }
 0x13e   : > { %626 = vmatprep.mubr.bf16.mxu1 %v2088_v17  ;;  %769 = vmatprep.mubr.bf16.mxu0 %v2088_v17  ;;  %v1974_v47 = vunpack.i.h.bf16 %v2374_v37  ;;  %v1973_v48 = vunpack.i.l.bf16 %v2374_v37 }
 0x13f   : > { %v825_v58 = vsel %vm822_vm14, %v1964_v18, %v1958_v33  ;;  %v1065_v22 = vsel %vm1060_vm15, %v1978_v7, %v1968_v56  ;;  %v2065_v56 = vld [vmem:[%s2625_s4 + $0x38] sm:$0xff]  }
 0x140   : > { %1713 = vmatpush1.bf16.msk.msra.mxu1 %vm2334_vm12, %v2222_v16  ;;  %1741 = vmatpush1.bf16.msk.msra.mxu0 %vm2353_vm13, %v1740_v39  ;;  %v2408_v52 = vpop.permute.xlu0 %1986  ;;  %v1763_v16 = vpack.c.bf16 %v826_v35, %v824_v54  ;;  %v1068_v61 = vsel %vm1060_vm15, %v1973_v48, %v1974_v47  ;;  %v1768_v0 = vpack.c.bf16 %v825_v58, %v823_v57 }
 0x141   : > { %v2404_v50 = vpop.permute.xlu1 %1981  ;;  %1754 = vmatprep.subr.msk.bf16.mxu1 %vm2300_vm7, %v1753_v42  ;;  %v1789_v2 = vpack.c.bf16 %v1068_v61, %v1066_v1  ;;  %v1989_v10 = vunpack.i.h.bf16 %v2408_v52  ;;  %v1988_v11 = vunpack.i.l.bf16 %v2408_v52  ;;  %v1067_v20 = vsel %vm1060_vm15, %v1979_v6, %v1973_v48  ;;  %v2064_v48 = vld [vmem:[%s2625_s4 + $0x40] sm:$0xff]   ;;  %v2066_v1 = vld [vmem:[%s2625_s4 + $0x48] sm:$0xff]  }
 0x142   : > { %v1984_v8 = vunpack.i.h.bf16 %v2404_v50  ;;  %v1983_v9 = vunpack.i.l.bf16 %v2404_v50  ;;  %v1794_v40 = vpack.c.bf16 %v1067_v20, %v1065_v22 }
 0x143   : > { %1714 = vmatmul.mubr.msk.bf16.vlgmr.msra.gmra.mxu1 %vm518_vm11, %v2059_v45  ;;  %1742 = vmatmul.mubr.msk.bf16.vlgmr.msra.gmra.mxu0 %vm518_vm11, %v2060_v46  ;;  %v1203_v28 = vsel %vm1195_vm0, %v1988_v11, %v1989_v10 }
 0x144   : > { %1759 = vmatpush1.bf16.msk.msra.mxu1 %vm2334_vm12, %v1758_v53  ;;  %636 = vmatprep.mubr.bf16.mxu1 %v2088_v17  ;;  %v1997_v63 = vpop.permute.xlu0 %1996  ;;  %v1201_v27 = vsel %vm1195_vm0, %v1983_v9, %v1984_v8 }
 0x145   : > { %v1992_v62 = vpop.permute.xlu1 %1991  ;;  %1764 = vmatprep.subr.msk.bf16.mxu1 %vm2300_vm7, %v1763_v16  ;;  %779 = vmatprep.mubr.bf16.mxu0 %v2088_v17  ;;  %v1999_v33 = vunpack.i.h.bf16 %v1997_v63  ;;  %v1998_v29 = vunpack.i.l.bf16 %v1997_v63  ;;  %v1817_v41 = vpack.c.bf16 %v1203_v28, %v1201_v27 }
 0x146   : > { %v1994_v14 = vunpack.i.h.bf16 %v1992_v62  ;;  %v1993_v30 = vunpack.i.l.bf16 %v1992_v62 }
 0x148   : > { %1769 = vmatpush1.bf16.msk.msra.mxu1 %vm2334_vm12, %v1768_v0  ;;  %v2007_v19 = vpop.permute.xlu0 %2006  ;;  %v1200_v24 = vsel %vm1195_vm0, %v1993_v30, %v1983_v9 }
 0x149   : > { %v2002_v15 = vpop.permute.xlu1 %2001  ;;  %1790 = vmatprep.subr.msk.bf16.mxu1 %vm2316_vm10, %v1789_v2  ;;  %v2009_v37 = vunpack.i.h.bf16 %v2007_v19  ;;  %v2008_v38 = vunpack.i.l.bf16 %v2007_v19 }
 0x14a   : > { %v2004_v25 = vunpack.i.h.bf16 %v2002_v15  ;;  %v2003_v26 = vunpack.i.l.bf16 %v2002_v15 }
 0x14b   : > { %1715 = vmatmul.mubr.msk.bf16.gmra.mxu1 %vm518_vm11, %v2061_v4  ;;  %1743 = vmatmul.mubr.msk.bf16.gmra.mxu0 %vm518_vm11, %v2062_v5  ;;  %v1061_v47 = vsel %vm1060_vm15, %v2008_v38, %v1998_v29 }
 0x14c   : > { %904 = vmatprep.mubr.bf16.mxu1 %v2088_v17  ;;  %1007 = vmatprep.mubr.bf16.mxu0 %v2088_v17  ;;  %v2017_v32 = vpop.permute.xlu0 %2016  ;;  %v1064_v39 = vsel %vm1060_vm15, %v2003_v26, %v2004_v25  ;;  %v1063_v35 = vsel %vm1060_vm15, %v2009_v37, %v2003_v26  ;;  %v2068_v25 = vld [vmem:[%s2625_s4 + $0x60] sm:$0xff]  }
 0x14d   : > { %v957_v31 = vpop.permute.xlu1 %956  ;;  %v2019_v49 = vunpack.i.h.bf16 %v2017_v32  ;;  %v2018_v50 = vunpack.i.l.bf16 %v2017_v32  ;;  %v1804_v53 = vpack.c.bf16 %v1063_v35, %v1061_v47 }
 0x14e   : > { %v963_v34 = vsel %vm960_vm1, %v2291_v51, %v957_v31  ;;  %v964_v36 = vsel %vm960_vm1, %v957_v31, %v2285_v44  ;;  %v1202_v51 = vsel %vm1195_vm0, %v1994_v14, %v1988_v11  ;;  %v1062_v44 = vsel %vm1060_vm15, %v1998_v29, %v1999_v33  ;;  %v2069_v31 = vld [vmem:[%s2625_s4 + $0x58] sm:$0xff]  }
 0x14f   : > { %987 = vmatprep.subr.bf16.mxu0 %v964_v36  ;;  %v1799_v46 = vpack.c.bf16 %v1064_v39, %v1062_v44  ;;  %v1822_v52 = vpack.c.bf16 %v1202_v51, %v1200_v24  ;;  %v1199_v16 = vsel %vm1195_vm0, %v2018_v50, %v2019_v49 }
 0x150   : > { %988 = vmatpush1.bf16.msra.mxu0 %v963_v34  ;;  %v2456_v18 = vpop.permute.xlu0 %2026 }
 0x151   : > { %v951_v42 = vpop.permute.xlu1 %950  ;;  %v2029_v9 = vunpack.i.h.bf16 %v2456_v18  ;;  %v2028_v10 = vunpack.i.l.bf16 %v2456_v18  ;;  %v2071_v18 = vld [vmem:[%s2625_s4 + $0x70] sm:$0xff]  }
 0x152   : > { %v961_v43 = vsel %vm960_vm1, %v2341_v21, %v951_v42  ;;  %v962_v45 = vsel %vm960_vm1, %v951_v42, %v2298_v59 }
 0x153   : > { %1770 = vmatmul.mubr.msk.bf16.vlgmr.msra.gmra.mxu1 %vm518_vm11, %v2063_v12  ;;  %989 = vmatprep.subr.bf16.mxu0 %v962_v45  ;;  %v1439_v26 = vsel %vm1433_vm3, %v2028_v10, %v2029_v9  ;;  %v2070_v12 = vld [vmem:[%s2625_s4 + $0x68] sm:$0xff]  }
 0x154   : > { %1795 = vmatpush1.bf16.msk.msra.mxu1 %vm2353_vm13, %v1794_v40  ;;  %990 = vmatpush1.bf16.msra.mxu0 %v961_v43  ;;  %v1328_v21 = vpop.permute.xlu0 %1327 }
 0x155   : > { %1800 = vmatprep.subr.msk.bf16.mxu1 %vm2316_vm10, %v1799_v46  ;;  %v2012_v59 = vpop.permute.xlu1 %2011  ;;  %1818 = vmatprep.subr.msk.bf16.mxu0 %vm2300_vm7, %v1817_v41 }
 0x156   : > { %v2014_v54 = vunpack.i.h.bf16 %v2012_v59  ;;  %v2013_v55 = vunpack.i.l.bf16 %v2012_v59  ;;  %914 = vmatprep.mubr.bf16.mxu1 %v2088_v17  ;;  %v2073_v59 = vld [vmem:[%s2625_s4 + $0x78] sm:$0xff]  }
 0x157   : > { %1778 = vmatmul.mubr.msk.bf16.vlgmr.msra.gmra.mxu0 %vm518_vm11, %v2064_v48 }
 0x158   : > { %v1197_v57 = vsel %vm1195_vm0, %v2013_v55, %v2014_v54  ;;  %1805 = vmatpush1.bf16.msk.msra.mxu1 %vm2353_vm13, %v1804_v53  ;;  %1823 = vmatpush1.bf16.msk.msra.mxu0 %vm2334_vm12, %v1822_v52  ;;  %v2487_v62 = vpop.permute.xlu0 %2041 }
 0x159   : > { %v1827_v58 = vpack.c.bf16 %v1199_v16, %v1197_v57  ;;  %v2022_v61 = vpop.permute.xlu1 %2021  ;;  %1017 = vmatprep.mubr.bf16.mxu0 %v2088_v17  ;;  %v2044_v39 = vunpack.i.h.bf16 %v2487_v62  ;;  %v2043_v40 = vunpack.i.l.bf16 %v2487_v62 }
 0x15a   : > { %v2024_v63 = vunpack.i.h.bf16 %v2022_v61  ;;  %v2023_v0 = vunpack.i.l.bf16 %v2022_v61 }
 0x15b   : > { %1771 = vmatmul.mubr.msk.bf16.gmra.mxu1 %vm518_vm11, %v2065_v56  ;;  %1828 = vmatprep.subr.msk.bf16.mxu0 %vm2300_vm7, %v1827_v58  ;;  %v1435_v51 = vsel %vm1433_vm3, %v2043_v40, %v2044_v39 }
 0x15c   : > { %v1196_v2 = vsel %vm1195_vm0, %v2023_v0, %v2013_v55  ;;  %v1198_v4 = vsel %vm1195_vm0, %v2024_v63, %v2018_v50  ;;  %1142 = vmatprep.mubr.bf16.mxu1 %v2088_v17  ;;  %v1330_v7 = vpop.permute.xlu0 %1329  ;;  %v2072_v50 = vld [vmem:[%s2625_s4 + $0x80] sm:$0xff]  }
 0x15d   : > { %v1832_v5 = vpack.c.bf16 %v1198_v4, %v1196_v2  ;;  %v1332_v6 = vpop.permute.xlu1 %1331  ;;  %v1336_v22 = vsel %vm1333_vm2, %v1328_v21, %v1330_v7 }
 0x15e   : > { %v1337_v8 = vsel %vm1333_vm2, %v1330_v7, %v1332_v6 }
 0x15f   : > { %1779 = vmatmul.mubr.msk.bf16.gmra.mxu0 %vm518_vm11, %v2066_v1  ;;  %1360 = vmatprep.subr.bf16.mxu1 %v1337_v8 }
 0x160   : > { %1833 = vmatpush1.bf16.msk.msra.mxu0 %vm2334_vm12, %v1832_v5  ;;  %1277 = vmatprep.mubr.bf16.mxu0 %v2088_v17  ;;  %v1324_v20 = vpop.permute.xlu0 %1323 }
 0x161   : > { %v2032_v11 = vpop.permute.xlu1 %2031 }
 0x162   : > { %v2034_v15 = vunpack.i.h.bf16 %v2032_v11  ;;  %v2033_v19 = vunpack.i.l.bf16 %v2032_v11 }
 0x163   : > { %1806 = vmatmul.mubr.msk.bf16.vlgmr.msra.gmra.mxu1 %vm518_vm11, %v2067_v60 }
 0x164   : > { %v1441_v13 = vsel %vm1433_vm3, %v2033_v19, %v2034_v15  ;;  %1361 = vmatpush1.bf16.msra.mxu1 %v1336_v22  ;;  %1152 = vmatprep.mubr.bf16.mxu1 %v2088_v17  ;;  %v1322_v29 = vpop.permute.xlu0 %1321 }
 0x165   : > { %v1853_v27 = vpack.c.bf16 %v1441_v13, %v1439_v26  ;;  %v2037_v28 = vpop.permute.xlu1 %2036  ;;  %v1334_v38 = vsel %vm1333_vm2, %v1322_v29, %v1324_v20 }
 0x166   : > { %v2039_v14 = vunpack.i.h.bf16 %v2037_v28  ;;  %v2038_v30 = vunpack.i.l.bf16 %v2037_v28 }
 0x167   : > { %1834 = vmatmul.mubr.msk.bf16.vlgmr.msra.gmra.mxu0 %vm518_vm11, %v2068_v25  ;;  %1854 = vmatprep.subr.msk.bf16.mxu0 %vm2316_vm10, %v1853_v27 }
 0x168   : > { %v1438_v32 = vsel %vm1433_vm3, %v2038_v30, %v2028_v10  ;;  %v1440_v33 = vsel %vm1433_vm3, %v2039_v14, %v2033_v19  ;;  %1287 = vmatprep.mubr.bf16.mxu0 %v2088_v17 }
 0x169   : > { %v1858_v34 = vpack.c.bf16 %v1440_v33, %v1438_v32  ;;  %v1326_v36 = vpop.permute.xlu1 %1325 }
 0x16a   : > { %v1335_v37 = vsel %vm1333_vm2, %v1324_v20, %v1326_v36 }
 0x16b   : > { %1807 = vmatmul.mubr.msk.bf16.gmra.mxu1 %vm518_vm11, %v2069_v31  ;;  %1362 = vmatprep.subr.bf16.mxu1 %v1335_v37 }
 0x16c   : > { %1859 = vmatpush1.bf16.msk.msra.mxu0 %vm2353_vm13, %v1858_v34  ;;  %1363 = vmatpush1.bf16.msra.mxu1 %v1334_v38 }
 0x16d   : > { %v2047_v41 = vpop.permute.xlu1 %2046  ;;  %1380 = vmatprep.mubr.bf16.mxu1 %v2088_v17 }
 0x16e   : > { %v2049_v24 = vunpack.i.h.bf16 %v2047_v41  ;;  %v2048_v42 = vunpack.i.l.bf16 %v2047_v41 }
 0x16f   : > { %1835 = vmatmul.mubr.msk.bf16.gmra.mxu0 %vm518_vm11, %v2070_v12 }
 0x170   : > { %v1437_v44 = vsel %vm1433_vm3, %v2048_v42, %v2049_v24  ;;  %1515 = vmatprep.mubr.bf16.mxu0 %v2088_v17 }
 0x171   : > { %v1863_v43 = vpack.c.bf16 %v1437_v44, %v1435_v51  ;;  %v2052_v45 = vpop.permute.xlu1 %2051 }
 0x172   : > { %v2054_v46 = vunpack.i.h.bf16 %v2052_v45  ;;  %v2053_v35 = vunpack.i.l.bf16 %v2052_v45 }
 0x173   : > { %1842 = vmatmul.mubr.msk.bf16.vlgmr.msra.gmra.mxu1 %vm518_vm11, %v2071_v18  ;;  %1864 = vmatprep.subr.msk.bf16.mxu0 %vm2316_vm10, %v1863_v43 }
 0x174   : > { %v1434_v47 = vsel %vm1433_vm3, %v2053_v35, %v2043_v40  ;;  %v1436_v48 = vsel %vm1433_vm3, %v2054_v46, %v2048_v42  ;;  %1390 = vmatprep.mubr.bf16.mxu1 %v2088_v17 }
 0x175   : > { %v1868_v49 = vpack.c.bf16 %v1436_v48, %v1434_v47 }
 0x177   : > { %1869 = vmatpush1.bf16.msk.msra.mxu0 %vm2353_vm13, %v1868_v49 }
 0x17a   : > { %1870 = vmatmul.mubr.msk.bf16.vlgmr.msra.gmra.mxu0 %vm518_vm11, %v2072_v50 }
 0x17b   : > { %1843 = vmatmul.mubr.msk.bf16.gmra.mxu1 %vm518_vm11, %v2073_v59  ;;  %1525 = vmatprep.mubr.bf16.mxu0 %v2088_v17 }
 0x182   : > { %1871 = vmatmul.mubr.msk.bf16.gmra.mxu0 %vm518_vm11, %v2074_v3 }
 0x1fb   : > { %v569_v21 = vpop.f32.mrf.mxu1  ;;  %v559_v52 = vpop.f32.mrf.mxu0 }
 0x1fd   : > { %v2565_v23 = vpop.f32.mrf.mxu1  ;;  %v561_v53 = vpop.f32.mrf.mxu0 }
 0x1ff   : > { %v2567_v54 = vpop.f32.mrf.mxu1  ;;  %v563_v55 = vpop.f32.mrf.mxu0 }
 0x201   : > { %v2569_v56 = vpop.f32.mrf.mxu1  ;;  %v565_v16 = vpop.f32.mrf.mxu0 }
 0x203   : > { %v628_v57 = vpop.f32.mrf.mxu1  ;;  %v771_v58 = vpop.f32.mrf.mxu0 }
 0x204   : > { %v629_v39 = vadd.f32 %v628_v57, %v559_v52 }
 0x205   : > { %v630_v17 = vpop.f32.mrf.mxu1  ;;  %v773_v61 = vpop.f32.mrf.mxu0 }
 0x206   : > { %v631_v24 = vadd.f32 %v630_v17, %v561_v53  ;;  %v790_v51 = vadd.f32 %v771_v58, %v629_v39 }
 0x207   : > { %v632_v62 = vpop.f32.mrf.mxu1  ;;  %v775_v63 = vpop.f32.mrf.mxu0 }
 0x208   : > { %v633_v44 = vadd.f32 %v632_v62, %v563_v55  ;;  %v791_v46 = vadd.f32 %v773_v61, %v631_v24 }
 0x209   : > { %v634_v0 = vpop.f32.mrf.mxu1  ;;  %v777_v1 = vpop.f32.mrf.mxu0 }
 0x20a   : > { %v635_v35 = vadd.f32 %v634_v0, %v565_v16  ;;  %v792_v59 = vadd.f32 %v775_v63, %v633_v44 }
 0x20b   : > { %v638_v2 = vpop.f32.mrf.mxu1  ;;  %v781_v4 = vpop.f32.mrf.mxu0 }
 0x20c   : > { %v639_v50 = vadd.f32 %v638_v2, %v569_v21  ;;  %v793_v58 = vadd.f32 %v777_v1, %v635_v35 }
 0x20d   : > { %v640_v5 = vpop.f32.mrf.mxu1  ;;  %v783_v6 = vpop.f32.mrf.mxu0 }
 0x20e   : > { %v641_v53 = vadd.f32 %v640_v5, %v2565_v23  ;;  %v794_v61 = vadd.f32 %v781_v4, %v639_v50 }
 0x20f   : > { %v642_v7 = vpop.f32.mrf.mxu1  ;;  %v2571_v60 = vpop.f32.mrf.mxu0 }
 0x210   : > { %v643_v16 = vadd.f32 %v642_v7, %v2567_v54  ;;  %v795_v2 = vadd.f32 %v783_v6, %v641_v53  ;;  %v1551_v7 = vpop.permute.xlu0 %1550 }
 0x211   : > { %v644_v8 = vpop.f32.mrf.mxu1  ;;  %v2573_v10 = vpop.f32.mrf.mxu0 }
 0x213   : > { %v906_v9 = vpop.f32.mrf.mxu1 }
 0x214   : > { %v925_v47 = vadd.f32 %v906_v9, %v790_v51 }
 0x215   : > { %v908_v11 = vpop.f32.mrf.mxu1 }
 0x216   : > { %v926_v3 = vadd.f32 %v908_v11, %v791_v46  ;;  %v645_v11 = vadd.f32 %v644_v8, %v2569_v56 }
 0x217   : > { %v910_v15 = vpop.f32.mrf.mxu1  ;;  %v1009_v19 = vpop.f32.mrf.mxu0 }
 0x218   : > { %v1028_v52 = vadd.f32 %v1009_v19, %v925_v47  ;;  %v927_v55 = vadd.f32 %v910_v15, %v792_v59  ;;  %v797_v56 = vadd.f32 %v2573_v10, %v645_v11 }
 0x219   : > { %v912_v20 = vpop.f32.mrf.mxu1  ;;  %v1011_v22 = vpop.f32.mrf.mxu0 }
 0x21a   : > { %v1029_v62 = vadd.f32 %v1011_v22, %v926_v3  ;;  %v928_v0 = vadd.f32 %v912_v20, %v793_v58 }
 0x21b   : > { %v916_v25 = vpop.f32.mrf.mxu1  ;;  %v1013_v26 = vpop.f32.mrf.mxu0 }
 0x21c   : > { %v1030_v9 = vadd.f32 %v1013_v26, %v927_v55  ;;  %v929_v19 = vadd.f32 %v916_v25, %v794_v61 }
 0x21d   : > { %v918_v13 = vpop.f32.mrf.mxu1  ;;  %v1015_v27 = vpop.f32.mrf.mxu0 }
 0x21e   : > { %v1031_v5 = vadd.f32 %v1015_v27, %v928_v0  ;;  %v930_v4 = vadd.f32 %v918_v13, %v795_v2 }
 0x21f   : > { %v2575_v28 = vpop.f32.mrf.mxu1  ;;  %v1019_v14 = vpop.f32.mrf.mxu0 }
 0x220   : > { %v1032_v44 = vadd.f32 %v1019_v14, %v929_v19 }
 0x221   : > { %v2577_v30 = vpop.f32.mrf.mxu1  ;;  %v2579_v31 = vpop.f32.mrf.mxu0 }
 0x222   : > { %v1033_v25 = vadd.f32 %v2579_v31, %v930_v4 }
 0x223   : > { %v2581_v32 = vpop.f32.mrf.mxu0  ;;  %v1144_v33 = vpop.f32.mrf.mxu1 }
 0x224   : > { %v1163_v39 = vadd.f32 %v1144_v33, %v1028_v52  ;;  %v796_v33 = vadd.f32 %v2571_v60, %v643_v16 }
 0x225   : > { %v2583_v29 = vpop.f32.mrf.mxu0  ;;  %v1146_v34 = vpop.f32.mrf.mxu1 }
 0x226   : > { %v1164_v24 = vadd.f32 %v1146_v34, %v1029_v62  ;;  %v931_v8 = vadd.f32 %v2575_v28, %v796_v33 }
 0x227   : > { %v1148_v36 = vpop.f32.mrf.mxu1  ;;  %v1279_v37 = vpop.f32.mrf.mxu0 }
 0x228   : > { %v1298_v21 = vadd.f32 %v1279_v37, %v1163_v39  ;;  %v1165_v51 = vadd.f32 %v1148_v36, %v1030_v9 }
 0x229   : > { %v1150_v38 = vpop.f32.mrf.mxu1  ;;  %v1281_v12 = vpop.f32.mrf.mxu0 }
 0x22a   : > { %v1299_v1 = vadd.f32 %v1281_v12, %v1164_v24  ;;  %v1166_v20 = vadd.f32 %v1150_v38, %v1031_v5  ;;  %v1556_v12 = vpop.permute.xlu1 %1555  ;;  %v932_v38 = vadd.f32 %v2577_v30, %v797_v56 }
 0x22b   : > { %v1154_v40 = vpop.f32.mrf.mxu1  ;;  %v1283_v41 = vpop.f32.mrf.mxu0 }
 0x22c   : > { %v1300_v26 = vadd.f32 %v1283_v41, %v1165_v51  ;;  %v1167_v27 = vadd.f32 %v1154_v40, %v1032_v44  ;;  %v1034_v41 = vadd.f32 %v2581_v32, %v931_v8  ;;  %v1035_v50 = vadd.f32 %v2583_v29, %v932_v38 }
 0x22d   : > { %v1156_v42 = vpop.f32.mrf.mxu1  ;;  %v1285_v18 = vpop.f32.mrf.mxu0 }
 0x22e   : > { %v1301_v60 = vadd.f32 %v1285_v18, %v1166_v20  ;;  %v1561_v39 = vpop.permute.xlu1 %1560 }
 0x22f   : > { %v2585_v43 = vpop.f32.mrf.mxu1  ;;  %v1289_v45 = vpop.f32.mrf.mxu0 }
 0x230   : > { %2640 = vst [vmem:[#allocation4_spill] sm:$0xff] %v2585_v43  ;;  %v1302_v47 = vadd.f32 %v1289_v45, %v1167_v27 }
 0x231   : > { %v2587_v48 = vpop.f32.mrf.mxu1  ;;  %v1291_v49 = vpop.f32.mrf.mxu0 }
 0x232   : > { %v1170_v58 = vadd.f32 %v2587_v48, %v1035_v50 }
 0x233   : > { %v1382_v57 = vpop.f32.mrf.mxu1  ;;  %v2590_v17 = vpop.f32.mrf.mxu0 }
 0x234   : > { %v1401_v15 = vadd.f32 %v1382_v57, %v1298_v21 }
 0x235   : > { %v1384_v43 = vpop.f32.mrf.mxu1  ;;  %v1295_v23 = vpop.f32.mrf.mxu0 }
 0x236   : > { %v1402_v34 = vadd.f32 %v1384_v43, %v1299_v1  ;;  %v1168_v43 = vadd.f32 %v1156_v42, %v1033_v25  ;;  %v1305_v0 = vadd.f32 %v1295_v23, %v1170_v58  ;;  %v1566_v1 = vpop.permute.xlu0 %1565 }
 0x237   : > { %v1386_v63 = vpop.f32.mrf.mxu1  ;;  %v2641_v59 = vld [vmem:[#allocation4_spill] sm:$0xff] }
 0x238   : > { %v1403_v13 = vadd.f32 %v1386_v63, %v1300_v26  ;;  %v1169_v30 = vadd.f32 %v2641_v59, %v1034_v41  ;;  %v1303_v3 = vadd.f32 %v1291_v49, %v1168_v43 }
 0x239   : > { %v1388_v22 = vpop.f32.mrf.mxu1 }
 0x23a   : > { %v1517_v54 = vpop.f32.mrf.mxu0  ;;  %v1404_v28 = vadd.f32 %v1388_v22, %v1301_v60  ;;  %v1304_v55 = vadd.f32 %v2590_v17, %v1169_v30 }
 0x23b   : > { %v1536_v37 = vadd.f32 %v1517_v54, %v1401_v15  ;;  %v1392_v6 = vpop.f32.mrf.mxu1 }
 0x23c   : > { %v1519_v36 = vpop.f32.mrf.mxu0  ;;  %v1405_v45 = vadd.f32 %v1392_v6, %v1302_v47 }
 0x23d   : > { %v1568_v14 = vadd.f32 %v1551_v7, %v1536_v37  ;;  %v1537_v46 = vadd.f32 %v1519_v36, %v1402_v34  ;;  %v1394_v35 = vpop.f32.mrf.mxu1 }
 0x23e   : > { %v1521_v10 = vpop.f32.mrf.mxu0  ;;  %v1406_v29 = vadd.f32 %v1394_v35, %v1303_v3 }
 0x23f   : > { %v1576_v31 = vmax.f32 %v1568_v14, 0.0  ;;  %v1569_v40 = vadd.f32 %v1551_v7, %v1537_v46  ;;  %v1538_v18 = vadd.f32 %v1521_v10, %v1403_v13  ;;  %v1396_v32 = vpop.f32.mrf.mxu1 }
 0x240   : > { %v1523_v42 = vpop.f32.mrf.mxu0  ;;  %v1407_v21 = vadd.f32 %v1396_v32, %v1304_v55 }
 0x241   : > { %1584 = vst [vmem:[%s2604_s20] sm:$0xff] %v1576_v31  ;;  %v1577_v52 = vmax.f32 %v1569_v40, 0.0  ;;  %v1570_v57 = vadd.f32 %v1556_v12, %v1538_v18  ;;  %v1539_v53 = vadd.f32 %v1523_v42, %v1404_v28  ;;  %v1398_v9 = vpop.f32.mrf.mxu1 }
 0x242   : > { %v1527_v62 = vpop.f32.mrf.mxu0  ;;  %v1408_v11 = vadd.f32 %v1398_v9, %v1305_v0 }
 0x243   : > { %1585 = vst [vmem:[%s2604_s20 + $0x8] sm:$0xff] %v1577_v52  ;;  %v1578_v61 = vmax.f32 %v1570_v57, 0.0  ;;  %v1571_v16 = vadd.f32 %v1556_v12, %v1539_v53  ;;  %v1540_v49 = vadd.f32 %v1527_v62, %v1405_v45 }
 0x244   : > { %v1529_v24 = vpop.f32.mrf.mxu0 }
 0x245   : > { %1586 = vst [vmem:[%s2604_s20 + $0x10] sm:$0xff] %v1578_v61  ;;  %v1579_v63 = vmax.f32 %v1571_v16, 0.0  ;;  %v1572_v2 = vadd.f32 %v1561_v39, %v1540_v49  ;;  %v1541_v48 = vadd.f32 %v1529_v24, %v1406_v29 }
 0x246   : > { %v1531_v17 = vpop.f32.mrf.mxu0 }
 0x247   : > { %1587 = vst [vmem:[%s2604_s20 + $0x18] sm:$0xff] %v1579_v63  ;;  %v1580_v19 = vmax.f32 %v1572_v2, 0.0  ;;  %v1573_v5 = vadd.f32 %v1561_v39, %v1541_v48  ;;  %v1542_v51 = vadd.f32 %v1531_v17, %v1407_v21 }
 0x248   : > { %v1533_v15 = vpop.f32.mrf.mxu0 }
 0x249   : > { %1588 = vst [vmem:[%s2604_s20 + $0x20] sm:$0xff] %v1580_v19  ;;  %v1581_v23 = vmax.f32 %v1573_v5, 0.0  ;;  %v1574_v22 = vadd.f32 %v1566_v1, %v1542_v51  ;;  %v1543_v33 = vadd.f32 %v1533_v15, %v1408_v11 }
 0x24b   : > { %1589 = vst [vmem:[%s2604_s20 + $0x28] sm:$0xff] %v1581_v23  ;;  %v1582_v4 = vmax.f32 %v1574_v22, 0.0  ;;  %v1575_v44 = vadd.f32 %v1566_v1, %v1543_v33 }
 0x24d   : > { %1590 = vst [vmem:[%s2604_s20 + $0x30] sm:$0xff] %v1582_v4  ;;  %v1583_v54 = vmax.f32 %v1575_v44, 0.0 }
 0x24f   : > { %1591 = vst [vmem:[%s2604_s20 + $0x38] sm:$0xff] %v1583_v54 }
 0x250 PF: > { %s17_s23 = sadd.s32 1, %s2081_s23  }
 0x251   : > { %p14_p4 = scmp.ge.s32.totalorder %s17_s23, 4  }
 0x253   :  { %16 = sbr.rel (!%p14_p4) target bundleno = 2 (0x2), region = 88 }

</bundles_post_ra>
